<compile_context>
chip_gen: v7x
topology: tpu7x:2x2x1
jax: 0.10.0
libtpu: 0.0.40
codegen_flags: <defaults>
</compile_context>

<pallas_src>
import jax
import jax.numpy as jnp
from jax.experimental import pallas as pl
from jax.experimental.pallas import tpu as pltpu

# ----------------------------- config (small) --------------------------------
B = 2                 # batch    (v6e note: raise B / fold a vmap axis into the
C = 4                 #           token dim to feed the MXU; at this size the
IMG = 16              #           kernel is launch-latency bound by design)
P = 4                 # patch_size
SPAT = IMG // P       # spat_size = 4  -> Hp = Wp = 4
NP = SPAT * SPAT      # 16 spatial tokens
NUM_SPEC_TOKENS = 16  # num_tokens (spec_size = 4)
ENC_DIM = 32          # quantizer latent_dim
CODEBOOK_SIZE = 64
COMMIT_W = 1.0        # commitment_weight
NORM_PIX_LOSS = True
SPAT_SPEC = True
PPC = P * P * C       # 64 values per patch token


# ------------------- fused encoder/VQ/decoder/loss kernel --------------------
def _fused_forward_kernel(
    pf_ref, nm_ref,
    emb_w_ref, emb_b_ref,
    s2s_w_ref, s2s_b_ref,
    fw_spat_ref, fw_spec_ref, fb_ref,
    cbt_ref, cb_ref, cb_sq_ref,
    sp2sp_w_ref, sp2sp_b_ref,
    dspat_w_ref, dspat_b_ref, dspec_w_ref, dspec_b_ref,
    row_sel_ref, row_sel_t_ref, col_sel_ref, col_sel_t_ref, chan_ex_ref,
    dec_ref, tok_ref, loss_ref,
):
    f32 = jnp.float32
    bf16 = jnp.bfloat16

    pf = pf_ref[...]                                   # (N, PPC) f32, also loss target x
    pf_bf = pf.astype(bf16)

    # ---- patch embeddings: spat | spec heads fused into one (64, 64) matmul
    emb = jnp.dot(pf_bf, emb_w_ref[...], preferred_element_type=f32) + emb_b_ref[...]
    spat_enc = emb[:, :ENC_DIM]                        # (B*Np, E)
    spec_enc = emb[:, ENC_DIM:]                        # (B*Nt, E)

    # ---- spec -> spatial-grid projection: kron(I_B, W) block-diag matmul
    # replaces the reference's per-batch "transpose -> Linear -> transpose".
    spec_spat = (jnp.dot(s2s_w_ref[...], spec_enc.astype(bf16),
                         preferred_element_type=f32) + s2s_b_ref[...])   # (B*Hp*Wp, E)

    # ---- fusion 1x1 conv == per-pixel channel matmul (concat folded into
    # two partial GEMMs against the split conv weight).
    z = (jnp.dot(spat_enc.astype(bf16), fw_spat_ref[...], preferred_element_type=f32)
         + jnp.dot(spec_spat.astype(bf16), fw_spec_ref[...], preferred_element_type=f32)
         + fb_ref[...])                                # (N, E) f32

    # ---- vector quantizer: nearest neighbour (f32 distances, pre-transposed
    # codebook so the GEMM needs no in-kernel transpose).
    # TODO(synk): VectorQuantizerLucid EMA updates / dead-code replacement /
    # straight-through gradients are training-time features; forward-path
    # quantization + commitment loss only.
    dots = jnp.dot(z, cbt_ref[...], preferred_element_type=f32)          # (N, K)
    dist = cb_sq_ref[...] - 2.0 * dots                 # ||z||^2 dropped: same argmin
    num_codes = dist.shape[1]
    min_d = jnp.min(dist, axis=-1, keepdims=True)
    iota_k = jax.lax.broadcasted_iota(jnp.int32, dist.shape, 1)
    idx = jnp.min(jnp.where(dist == min_d, iota_k, num_codes),
                  axis=-1, keepdims=True)              # first argmin, (N, 1)
    onehot = (iota_k == idx).astype(f32)               # (N, K)
    q = jnp.dot(onehot, cb_ref[...], preferred_element_type=f32)         # (N, E) f32

    tok_ref[...] = idx.astype(jnp.int32)

    d = q - z
    code_loss = (COMMIT_W / float(z.shape[0] * z.shape[1])) * jnp.sum(
        d * d, axis=(0, 1), keepdims=True)             # (1, 1)

    # ---- decoders: spat head on quantized tokens, spec head on the
    # spat->spec projected tokens.  One lane-dense (N, 128) output slab.
    q_bf = q.astype(bf16)
    spec_latent = (jnp.dot(sp2sp_w_ref[...], q_bf, preferred_element_type=f32)
                   + sp2sp_b_ref[...])                 # (B*Nt, E) f32
    spat_tok = (jnp.dot(q_bf, dspat_w_ref[...], preferred_element_type=f32)
                + dspat_b_ref[...])                    # (N, PPC) f32
    spec_tok = (jnp.dot(spec_latent.astype(bf16), dspec_w_ref[...],
                        preferred_element_type=f32) + dspec_b_ref[...])  # (N, PPC)
    dec_ref[...] = jnp.concatenate([spat_tok, spec_tok], axis=-1)        # (N, 2*PPC)

    # ---- masked norm-pix reconstruction losses, in patch-token layout ------
    # Per-(batch, channel) masked stats via constant selector matmuls:
    #   row_sel  (B, N):   1 where token row belongs to batch b
    #   col_sel  (PPC, C): 1 where patch column k maps to channel c (k % C)
    #   chan_ex  (PP, PPC): broadcast per-pixel mask over the C channel cols
    m_pix = 1.0 - nm_ref[...]                          # (N, P*P); reference does ~nan_mask
    m = jnp.dot(m_pix, chan_ex_ref[...], preferred_element_type=f32)     # (N, PPC)
    row_sel = row_sel_ref[...]
    row_sel_t = row_sel_t_ref[...]
    col_sel = col_sel_ref[...]
    col_sel_t = col_sel_t_ref[...]

    cnt = jnp.dot(jnp.dot(row_sel, m, preferred_element_type=f32), col_sel,
                  preferred_element_type=f32)          # (B, C) valid-pixel counts
    # guard fully-masked (b, c) against 0/0 NaN; reference would NaN there.
    inv_cnt = 1.0 / jnp.maximum(cnt, 1.0)

    def _masked_norm(a):
        """Per-(batch, channel) masked mean/var normalization (norm_pix_loss)."""
        s = jnp.dot(jnp.dot(row_sel, a * m, preferred_element_type=f32), col_sel,
                    preferred_element_type=f32) * inv_cnt                # (B, C)
        mean = jnp.dot(jnp.dot(row_sel_t, s, preferred_element_type=f32), col_sel_t,
                       preferred_element_type=f32)                       # (N, PPC)
        d2 = (a - mean) * (a - mean) * m
        v = jnp.dot(jnp.dot(row_sel, d2, preferred_element_type=f32), col_sel,
                    preferred_element_type=f32) * inv_cnt
        var = jnp.dot(jnp.dot(row_sel_t, v, preferred_element_type=f32), col_sel_t,
                      preferred_element_type=f32)
        return jnp.where(m > 0.0, (a - mean) * jax.lax.rsqrt(var + 1e-6), a)

    if NORM_PIX_LOSS:
        x_n = _masked_norm(pf)
        sp_n = _masked_norm(spat_tok)
        sc_n = _masked_norm(spec_tok)
    else:
        x_n, sp_n, sc_n = pf, spat_tok, spec_tok

    # denominator counts each valid pixel ONCE (not per channel), matching the
    # reference `torch.sum(nan_mask)` on the (B, H, W) mask.
    den = jnp.sum(m_pix, axis=(0, 1), keepdims=True)
    dsp = (x_n - sp_n) * m
    dsc = (x_n - sc_n) * m
    spat_loss = jnp.sum(dsp * dsp, axis=(0, 1), keepdims=True) / den
    spec_loss = jnp.sum(dsc * dsc, axis=(0, 1), keepdims=True) / den

    # merged scalar outputs: [spat_loss, spec_loss, code_loss, 0...]
    lane = jax.lax.broadcasted_iota(jnp.int32, (1, 8), 1)
    loss_ref[...] = (spat_loss * (lane == 0).astype(f32)
                     + spec_loss * (lane == 1).astype(f32)
                     + code_loss * (lane == 2).astype(f32))


def fused_forward_core(pf, nm_pp, pk):
    n = pf.shape[0]
    vmem = pl.BlockSpec(memory_space=pltpu.MemorySpace.VMEM)
    return pl.pallas_call(
        _fused_forward_kernel,
        out_shape=(
            jax.ShapeDtypeStruct((n, 2 * PPC), jnp.float32),   # (32, 128) dec tokens
            jax.ShapeDtypeStruct((n, 1), jnp.int32),           # VQ token ids
            jax.ShapeDtypeStruct((1, 8), jnp.float32),         # [spat, spec, code] losses
        ),
        in_specs=[vmem] * 23,
        out_specs=(vmem, vmem, vmem),
        # total live data is <1 MiB: fits every generation's scoped VMEM.
        # No grid: single invocation.  (v7x note: only add a parallel batch
        # grid axis across the two TensorCores once B is large enough that
        # the work exceeds the core-sync overhead — not at B=2.)
        compiler_params=pltpu.CompilerParams(vmem_limit_bytes=8 * 1024 * 1024),
        cost_estimate=pl.CostEstimate(flops=600_000, transcendentals=0,
                                      bytes_accessed=120_000),
    )(pf, nm_pp,
      pk["embed_w"], pk["embed_b"],
      pk["s2s_block"], pk["s2s_bias"],
      pk["fusion_w_spat"], pk["fusion_w_spec"], pk["fusion_b"],
      pk["codebook_t"], pk["codebook"], pk["cb_sq"],
      pk["sp2sp_block"], pk["sp2sp_bias"],
      pk["dec_spat_w"], pk["dec_spat_b"], pk["dec_spec_w"], pk["dec_spec_b"],
      pk["row_sel"], pk["row_sel_t"], pk["col_sel"], pk["col_sel_t"],
      pk["chan_expand"])


# --------------------------------- host glue ---------------------------------
def patchify(x):
    """(B, C, H, W) -> (B*Np, p*p*C), column k = pr*P*C + pc*C + c."""
    b, c, h, w = x.shape
    hp, wp = h // P, w // P
    x = x.reshape(b, c, hp, P, wp, P)
    x = jnp.einsum("bchpwq->bhwpqc", x)
    return x.reshape(b * hp * wp, P * P * c)


def patchify_mask(m):
    """(B, H, W) -> (B*Np, p*p), column q = pr*P + pc (== k // C above)."""
    b, h, w = m.shape
    hp, wp = h // P, w // P
    m = m.reshape(b, hp, P, wp, P)
    m = jnp.einsum("bhpwq->bhwpq", m)
    return m.reshape(b * hp * wp, P * P)


def init_params(key):
    keys = jax.random.split(key, 8)
    s = 0.02
    return {
        # weights stored as (in_features, out_features) == torch W.T
        "spat_embed_w": jax.random.normal(keys[0], (PPC, ENC_DIM)) * s,
        "spat_embed_b": jnp.zeros((ENC_DIM,), jnp.float32),
        "spec_embed_w": jax.random.normal(keys[1], (PPC, ENC_DIM)) * s,
        "spec_embed_b": jnp.zeros((ENC_DIM,), jnp.float32),
        "spec_to_spat_w": jax.random.normal(keys[2], (NUM_SPEC_TOKENS, SPAT * SPAT)) * s,
        "spec_to_spat_b": jnp.zeros((SPAT * SPAT,), jnp.float32),
        "fusion_w": jax.random.normal(keys[3], (2 * ENC_DIM, ENC_DIM)) * s,  # conv1x1 W.T
        "fusion_b": jnp.zeros((ENC_DIM,), jnp.float32),
        "spat_to_spec_w": jax.random.normal(keys[4], (SPAT * SPAT, NUM_SPEC_TOKENS)) * s,
        "spat_to_spec_b": jnp.zeros((NUM_SPEC_TOKENS,), jnp.float32),
        "spat_dec_w": jax.random.normal(keys[5], (ENC_DIM, PPC)) * s,
        "spat_dec_b": jnp.zeros((PPC,), jnp.float32),
        "spec_dec_w": jax.random.normal(keys[6], (ENC_DIM, PPC)) * s,
        "spec_dec_b": jnp.zeros((PPC,), jnp.float32),
        "codebook": jax.random.normal(keys[7], (CODEBOOK_SIZE, ENC_DIM)),
    }


def pack_params(p):
    """One-time (parameter-only) repacking for the fused kernel."""
    bf16 = jnp.bfloat16
    eye_b = jnp.eye(B, dtype=jnp.float32)
    # loss-normalization selector matrices (constants)
    row_sel = jnp.repeat(eye_b, NP, axis=1)                              # (B, B*Np)
    col_sel = jnp.tile(jnp.eye(C, dtype=jnp.float32), (P * P, 1))        # (PPC, C)
    chan_ex = jnp.repeat(jnp.eye(P * P, dtype=jnp.float32), C, axis=1)   # (PP, PPC)
    return {
        # MXU operands in bf16 (f32 accumulate in-kernel); biases stay f32.
        "embed_w": jnp.concatenate([p["spat_embed_w"], p["spec_embed_w"]],
                                   axis=1).astype(bf16),
        "embed_b": jnp.concatenate([p["spat_embed_b"], p["spec_embed_b"]])[None, :],
        # block-diagonal per-batch projections (replace host transposes)
        "s2s_block": jnp.kron(eye_b, p["spec_to_spat_w"].T).astype(bf16),
        "s2s_bias": jnp.tile(p["spec_to_spat_b"], (B,))[:, None],
        "fusion_w_spat": p["fusion_w"][:ENC_DIM, :].astype(bf16),
        "fusion_w_spec": p["fusion_w"][ENC_DIM:, :].astype(bf16),
        "fusion_b": p["fusion_b"][None, :],
        # VQ: f32 codebook (exact distances / gather); pre-transposed copy.
        "codebook": p["codebook"],
        "codebook_t": p["codebook"].T,
        "cb_sq": jnp.sum(p["codebook"] ** 2, axis=1)[None, :],
        "sp2sp_block": jnp.kron(eye_b, p["spat_to_spec_w"].T).astype(bf16),
        "sp2sp_bias": jnp.tile(p["spat_to_spec_b"], (B,))[:, None],
        "dec_spat_w": p["spat_dec_w"].astype(bf16),
        "dec_spat_b": p["spat_dec_b"][None, :],
        "dec_spec_w": p["spec_dec_w"].astype(bf16),
        "dec_spec_b": p["spec_dec_b"][None, :],
        "row_sel": row_sel, "row_sel_t": row_sel.T,
        "col_sel": col_sel, "col_sel_t": col_sel.T,
        "chan_expand": chan_ex,
    }


def spat_spec_forward(packed, x, nan_mask):
    # TODO(synk): spat_mae_b / spec_mae_b ViT transformer encoder-decoders are
    # external modules; they are replaced by single linear patch-embedding /
    # prediction heads.  Only this module's own fusion / projection /
    # quantization / loss math is reproduced.
    # TODO(synk): spec tokens reuse the spatial patch tokens only because
    # NP == NUM_SPEC_TOKENS here; a real spectral encoder would differ.
    b = x.shape[0]
    pf = patchify(x)                                        # (B*Np, PPC), also loss x
    nm_pp = patchify_mask(nan_mask.astype(jnp.float32))     # (B*Np, P*P)

    dec_out, tok, losses = fused_forward_core(pf, nm_pp, packed)

    # combined unpatchify of both heads: one reshape + one transpose
    imgs = dec_out.reshape(b, SPAT, SPAT, 2, P, P, C)
    imgs = jnp.einsum("bhwspqc->sbchpwq", imgs).reshape(2, b, C, IMG, IMG)
    spat_dec = imgs[0]
    tokens = tok[:, 0].reshape(b, SPAT * SPAT)
    spat_loss = losses[0, 0]
    code_loss = losses[0, 2]

    if SPAT_SPEC:
        spec_dec = imgs[1]
        spec_loss = losses[0, 1]
    else:
        spec_dec = None
        spec_loss = None

    return spat_loss, spec_loss, code_loss, tokens, spat_dec, spec_dec


# ---------------------------------- main --------------------------------------
if __name__ == "__main__":
    key = jax.random.PRNGKey(0)
    kp, kx, km = jax.random.split(key, 3)

    params = init_params(kp)
    packed = pack_params(params)
    x = jax.random.normal(kx, (B, C, IMG, IMG), dtype=jnp.float32)
    # the reference inverts the mask (`~nan_mask`) before using it, so keep a
    # mix of True/False to get a finite loss
    nan_mask = jax.random.bernoulli(km, 0.5, (B, IMG, IMG))

    fwd = jax.jit(spat_spec_forward)
    outs = fwd(packed, x, nan_mask)
    for o in outs:
        if o is not None:
            jax.block_until_ready(o)

    spat_loss, spec_loss, code_loss, tokens, spat_dec, spec_dec = outs
    assert spat_dec.shape == (B, C, IMG, IMG)
    assert spec_dec.shape == (B, C, IMG, IMG)
    assert tokens.shape == (B, SPAT * SPAT)
    assert jnp.isfinite(spat_loss) and jnp.isfinite(spec_loss) and jnp.isfinite(code_loss)

    print("KERNEL_OK")
</pallas_src>

<mosaic_0001>
module attributes {stable_mosaic.version = 11 : i64} {
  func.func @_fused_forward_kernel(%arg0: memref<32x64xf32, #tpu.memory_space<vmem>>, %arg1: memref<32x16xf32, #tpu.memory_space<vmem>>, %arg2: memref<64x64xbf16, #tpu.memory_space<vmem>>, %arg3: memref<1x64xf32, #tpu.memory_space<vmem>>, %arg4: memref<32x32xbf16, #tpu.memory_space<vmem>>, %arg5: memref<32x1xf32, #tpu.memory_space<vmem>>, %arg6: memref<32x32xbf16, #tpu.memory_space<vmem>>, %arg7: memref<32x32xbf16, #tpu.memory_space<vmem>>, %arg8: memref<1x32xf32, #tpu.memory_space<vmem>>, %arg9: memref<32x64xf32, #tpu.memory_space<vmem>>, %arg10: memref<64x32xf32, #tpu.memory_space<vmem>>, %arg11: memref<1x64xf32, #tpu.memory_space<vmem>>, %arg12: memref<32x32xbf16, #tpu.memory_space<vmem>>, %arg13: memref<32x1xf32, #tpu.memory_space<vmem>>, %arg14: memref<32x64xbf16, #tpu.memory_space<vmem>>, %arg15: memref<1x64xf32, #tpu.memory_space<vmem>>, %arg16: memref<32x64xbf16, #tpu.memory_space<vmem>>, %arg17: memref<1x64xf32, #tpu.memory_space<vmem>>, %arg18: memref<2x32xf32, #tpu.memory_space<vmem>>, %arg19: memref<32x2xf32, #tpu.memory_space<vmem>>, %arg20: memref<64x4xf32, #tpu.memory_space<vmem>>, %arg21: memref<4x64xf32, #tpu.memory_space<vmem>>, %arg22: memref<16x64xf32, #tpu.memory_space<vmem>>, %arg23: memref<32x128xf32, #tpu.memory_space<vmem>>, %arg24: memref<32x1xi32, #tpu.memory_space<vmem>>, %arg25: memref<1x8xf32, #tpu.memory_space<vmem>>) attributes {dimension_semantics = [], scalar_prefetch = 0 : i64, scratch_operands = 0 : i64, tpu.core_type = #tpu.core_type<tc>} {
    %c0 = arith.constant 0 : index
    %c0_0 = arith.constant 0 : index
    %0 = vector.load %arg0[%c0, %c0_0] : memref<32x64xf32, #tpu.memory_space<vmem>>, vector<32x64xf32>
    %1 = arith.truncf %0 : vector<32x64xf32> to vector<32x64xbf16>
    %c0_1 = arith.constant 0 : index
    %c0_2 = arith.constant 0 : index
    %2 = vector.load %arg2[%c0_1, %c0_2] : memref<64x64xbf16, #tpu.memory_space<vmem>>, vector<64x64xbf16>
    %cst = arith.constant dense<0.000000e+00> : vector<32x64xf32>
    %3 = tpu.matmul %1, %2, %cst {dimension_numbers = #tpu.dot_dimension_numbers<[1], [0], [0], [1], [0, 0, 1, 1], [], []>} : vector<32x64xbf16>, vector<64x64xbf16>, vector<32x64xf32> -> vector<32x64xf32>
    %c0_3 = arith.constant 0 : index
    %c0_4 = arith.constant 0 : index
    %4 = vector.load %arg3[%c0_3, %c0_4] : memref<1x64xf32, #tpu.memory_space<vmem>>, vector<1x64xf32>
    %5 = vector.broadcast %4 : vector<1x64xf32> to vector<32x64xf32>
    %6 = arith.addf %3, %5 : vector<32x64xf32>
    %7 = vector.extract_strided_slice %6 {offsets = [0, 0], sizes = [32, 32], strides = [1, 1]} : vector<32x64xf32> to vector<32x32xf32>
    %8 = vector.extract_strided_slice %6 {offsets = [0, 32], sizes = [32, 32], strides = [1, 1]} : vector<32x64xf32> to vector<32x32xf32>
    %c0_5 = arith.constant 0 : index
    %c0_6 = arith.constant 0 : index
    %9 = vector.load %arg4[%c0_5, %c0_6] : memref<32x32xbf16, #tpu.memory_space<vmem>>, vector<32x32xbf16>
    %10 = arith.truncf %8 : vector<32x32xf32> to vector<32x32xbf16>
    %cst_7 = arith.constant dense<0.000000e+00> : vector<32x32xf32>
    %11 = tpu.matmul %9, %10, %cst_7 {dimension_numbers = #tpu.dot_dimension_numbers<[1], [0], [0], [1], [0, 0, 1, 1], [], []>} : vector<32x32xbf16>, vector<32x32xbf16>, vector<32x32xf32> -> vector<32x32xf32>
    %c0_8 = arith.constant 0 : index
    %c0_9 = arith.constant 0 : index
    %12 = vector.load %arg5[%c0_8, %c0_9] : memref<32x1xf32, #tpu.memory_space<vmem>>, vector<32x1xf32>
    %13 = vector.broadcast %12 : vector<32x1xf32> to vector<32x32xf32>
    %14 = arith.addf %11, %13 : vector<32x32xf32>
    %15 = arith.truncf %7 : vector<32x32xf32> to vector<32x32xbf16>
    %c0_10 = arith.constant 0 : index
    %c0_11 = arith.constant 0 : index
    %16 = vector.load %arg6[%c0_10, %c0_11] : memref<32x32xbf16, #tpu.memory_space<vmem>>, vector<32x32xbf16>
    %cst_12 = arith.constant dense<0.000000e+00> : vector<32x32xf32>
    %17 = tpu.matmul %15, %16, %cst_12 {dimension_numbers = #tpu.dot_dimension_numbers<[1], [0], [0], [1], [0, 0, 1, 1], [], []>} : vector<32x32xbf16>, vector<32x32xbf16>, vector<32x32xf32> -> vector<32x32xf32>
    %18 = arith.truncf %14 : vector<32x32xf32> to vector<32x32xbf16>
    %c0_13 = arith.constant 0 : index
    %c0_14 = arith.constant 0 : index
    %19 = vector.load %arg7[%c0_13, %c0_14] : memref<32x32xbf16, #tpu.memory_space<vmem>>, vector<32x32xbf16>
    %cst_15 = arith.constant dense<0.000000e+00> : vector<32x32xf32>
    %20 = tpu.matmul %18, %19, %cst_15 {dimension_numbers = #tpu.dot_dimension_numbers<[1], [0], [0], [1], [0, 0, 1, 1], [], []>} : vector<32x32xbf16>, vector<32x32xbf16>, vector<32x32xf32> -> vector<32x32xf32>
    %21 = arith.addf %17, %20 : vector<32x32xf32>
    %c0_16 = arith.constant 0 : index
    %c0_17 = arith.constant 0 : index
    %22 = vector.load %arg8[%c0_16, %c0_17] : memref<1x32xf32, #tpu.memory_space<vmem>>, vector<1x32xf32>
    %23 = vector.broadcast %22 : vector<1x32xf32> to vector<32x32xf32>
    %24 = arith.addf %21, %23 : vector<32x32xf32>
    %c0_18 = arith.constant 0 : index
    %c0_19 = arith.constant 0 : index
    %25 = vector.load %arg9[%c0_18, %c0_19] : memref<32x64xf32, #tpu.memory_space<vmem>>, vector<32x64xf32>
    %cst_20 = arith.constant dense<0.000000e+00> : vector<32x64xf32>
    %26 = tpu.matmul %24, %25, %cst_20 {dimension_numbers = #tpu.dot_dimension_numbers<[1], [0], [0], [1], [0, 0, 1, 1], [], []>} : vector<32x32xf32>, vector<32x64xf32>, vector<32x64xf32> -> vector<32x64xf32>
    %c0_21 = arith.constant 0 : index
    %c0_22 = arith.constant 0 : index
    %27 = vector.load %arg11[%c0_21, %c0_22] : memref<1x64xf32, #tpu.memory_space<vmem>>, vector<1x64xf32>
    %cst_23 = arith.constant 2.000000e+00 : f32
    %28 = vector.broadcast %cst_23 : f32 to vector<32x64xf32>
    %29 = arith.mulf %28, %26 : vector<32x64xf32>
    %30 = vector.broadcast %27 : vector<1x64xf32> to vector<32x64xf32>
    %31 = arith.subf %30, %29 : vector<32x64xf32>
    %cst_24 = arith.constant dense<0x7F800000> : vector<32xf32>
    %32 = vector.multi_reduction <minimumf>, %31, %cst_24 [1] : vector<32x64xf32> to vector<32xf32>
    %33 = vector.shape_cast %32 : vector<32xf32> to vector<32x1xf32>
    %34 = tpu.iota {dimensions = array<i32: 1>} : vector<32x64xi32>
    %35 = vector.broadcast %33 : vector<32x1xf32> to vector<32x64xf32>
    %36 = arith.cmpf oeq, %31, %35 : vector<32x64xf32>
    %c64_i32 = arith.constant 64 : i32
    %37 = vector.broadcast %c64_i32 : i32 to vector<32x64xi32>
    %38 = arith.select %36, %34, %37 : vector<32x64xi1>, vector<32x64xi32>
    %cst_25 = arith.constant dense<2147483647> : vector<32xi32>
    %39 = vector.multi_reduction <minsi>, %38, %cst_25 [1] : vector<32x64xi32> to vector<32xi32>
    %40 = vector.shape_cast %39 : vector<32xi32> to vector<32x1xi32>
    %41 = vector.broadcast %40 : vector<32x1xi32> to vector<32x64xi32>
    %42 = arith.cmpi eq, %34, %41 : vector<32x64xi32>
    %43 = arith.extui %42 : vector<32x64xi1> to vector<32x64xi32>
    %44 = arith.sitofp %43 : vector<32x64xi32> to vector<32x64xf32>
    %c0_26 = arith.constant 0 : index
    %c0_27 = arith.constant 0 : index
    %45 = vector.load %arg10[%c0_26, %c0_27] : memref<64x32xf32, #tpu.memory_space<vmem>>, vector<64x32xf32>
    %cst_28 = arith.constant dense<0.000000e+00> : vector<32x32xf32>
    %46 = tpu.matmul %44, %45, %cst_28 {dimension_numbers = #tpu.dot_dimension_numbers<[1], [0], [0], [1], [0, 0, 1, 1], [], []>} : vector<32x64xf32>, vector<64x32xf32>, vector<32x32xf32> -> vector<32x32xf32>
    %c0_29 = arith.constant 0 : index
    %c0_30 = arith.constant 0 : index
    %47 = vector.load %arg24[%c0_29, %c0_30] : memref<32x1xi32, #tpu.memory_space<vmem>>, vector<32x1xi32>
    tpu.vector_store %arg24[%c0_29, %c0_30], %40 {strides = array<i32>} : memref<32x1xi32, #tpu.memory_space<vmem>>, vector<32x1xi32>,
    %48 = arith.subf %46, %24 : vector<32x32xf32>
    %49 = arith.mulf %48, %48 : vector<32x32xf32>
    %50 = vector.shape_cast %49 : vector<32x32xf32> to vector<1x32x32xf32>
    %cst_31 = arith.constant dense<0.000000e+00> : vector<1xf32>
    %51 = vector.multi_reduction <add>, %50, %cst_31 [1, 2] : vector<1x32x32xf32> to vector<1xf32>
    %52 = vector.shape_cast %51 : vector<1xf32> to vector<1x1x1xf32>
    %53 = vector.extract %52[0, 0, 0] : f32 from vector<1x1x1xf32>
    %54 = vector.broadcast %53 : f32 to vector<1x1xf32>
    %cst_32 = arith.constant 9.765625E-4 : f32
    %55 = vector.broadcast %cst_32 : f32 to vector<1x1xf32>
    %56 = arith.mulf %55, %54 : vector<1x1xf32>
    %57 = arith.truncf %46 : vector<32x32xf32> to vector<32x32xbf16>
    %c0_33 = arith.constant 0 : index
    %c0_34 = arith.constant 0 : index
    %58 = vector.load %arg12[%c0_33, %c0_34] : memref<32x32xbf16, #tpu.memory_space<vmem>>, vector<32x32xbf16>
    %cst_35 = arith.constant dense<0.000000e+00> : vector<32x32xf32>
    %59 = tpu.matmul %58, %57, %cst_35 {dimension_numbers = #tpu.dot_dimension_numbers<[1], [0], [0], [1], [0, 0, 1, 1], [], []>} : vector<32x32xbf16>, vector<32x32xbf16>, vector<32x32xf32> -> vector<32x32xf32>
    %c0_36 = arith.constant 0 : index
    %c0_37 = arith.constant 0 : index
    %60 = vector.load %arg13[%c0_36, %c0_37] : memref<32x1xf32, #tpu.memory_space<vmem>>, vector<32x1xf32>
    %61 = vector.broadcast %60 : vector<32x1xf32> to vector<32x32xf32>
    %62 = arith.addf %59, %61 : vector<32x32xf32>
    %c0_38 = arith.constant 0 : index
    %c0_39 = arith.constant 0 : index
    %63 = vector.load %arg14[%c0_38, %c0_39] : memref<32x64xbf16, #tpu.memory_space<vmem>>, vector<32x64xbf16>
    %cst_40 = arith.constant dense<0.000000e+00> : vector<32x64xf32>
    %64 = tpu.matmul %57, %63, %cst_40 {dimension_numbers = #tpu.dot_dimension_numbers<[1], [0], [0], [1], [0, 0, 1, 1], [], []>} : vector<32x32xbf16>, vector<32x64xbf16>, vector<32x64xf32> -> vector<32x64xf32>
    %c0_41 = arith.constant 0 : index
    %c0_42 = arith.constant 0 : index
    %65 = vector.load %arg15[%c0_41, %c0_42] : memref<1x64xf32, #tpu.memory_space<vmem>>, vector<1x64xf32>
    %66 = vector.broadcast %65 : vector<1x64xf32> to vector<32x64xf32>
    %67 = arith.addf %64, %66 : vector<32x64xf32>
    %68 = arith.truncf %62 : vector<32x32xf32> to vector<32x32xbf16>
    %c0_43 = arith.constant 0 : index
    %c0_44 = arith.constant 0 : index
    %69 = vector.load %arg16[%c0_43, %c0_44] : memref<32x64xbf16, #tpu.memory_space<vmem>>, vector<32x64xbf16>
    %cst_45 = arith.constant dense<0.000000e+00> : vector<32x64xf32>
    %70 = tpu.matmul %68, %69, %cst_45 {dimension_numbers = #tpu.dot_dimension_numbers<[1], [0], [0], [1], [0, 0, 1, 1], [], []>} : vector<32x32xbf16>, vector<32x64xbf16>, vector<32x64xf32> -> vector<32x64xf32>
    %c0_46 = arith.constant 0 : index
    %c0_47 = arith.constant 0 : index
    %71 = vector.load %arg17[%c0_46, %c0_47] : memref<1x64xf32, #tpu.memory_space<vmem>>, vector<1x64xf32>
    %72 = vector.broadcast %71 : vector<1x64xf32> to vector<32x64xf32>
    %73 = arith.addf %70, %72 : vector<32x64xf32>
    %74 = tpu.concatenate %67, %73 in 1 : vector<32x64xf32>, vector<32x64xf32> -> vector<32x128xf32>
    %c0_48 = arith.constant 0 : index
    %c0_49 = arith.constant 0 : index
    %75 = vector.load %arg23[%c0_48, %c0_49] : memref<32x128xf32, #tpu.memory_space<vmem>>, vector<32x128xf32>
    tpu.vector_store %arg23[%c0_48, %c0_49], %74 {strides = array<i32>} : memref<32x128xf32, #tpu.memory_space<vmem>>, vector<32x128xf32>,
    %c0_50 = arith.constant 0 : index
    %c0_51 = arith.constant 0 : index
    %76 = vector.load %arg1[%c0_50, %c0_51] : memref<32x16xf32, #tpu.memory_space<vmem>>, vector<32x16xf32>
    %cst_52 = arith.constant 1.000000e+00 : f32
    %77 = vector.broadcast %cst_52 : f32 to vector<32x16xf32>
    %78 = arith.subf %77, %76 : vector<32x16xf32>
    %c0_53 = arith.constant 0 : index
    %c0_54 = arith.constant 0 : index
    %79 = vector.load %arg22[%c0_53, %c0_54] : memref<16x64xf32, #tpu.memory_space<vmem>>, vector<16x64xf32>
    %cst_55 = arith.constant dense<0.000000e+00> : vector<32x64xf32>
    %80 = tpu.matmul %78, %79, %cst_55 {dimension_numbers = #tpu.dot_dimension_numbers<[1], [0], [0], [1], [0, 0, 1, 1], [], []>} : vector<32x16xf32>, vector<16x64xf32>, vector<32x64xf32> -> vector<32x64xf32>
    %c0_56 = arith.constant 0 : index
    %c0_57 = arith.constant 0 : index
    %81 = vector.load %arg18[%c0_56, %c0_57] : memref<2x32xf32, #tpu.memory_space<vmem>>, vector<2x32xf32>
    %c0_58 = arith.constant 0 : index
    %c0_59 = arith.constant 0 : index
    %82 = vector.load %arg19[%c0_58, %c0_59] : memref<32x2xf32, #tpu.memory_space<vmem>>, vector<32x2xf32>
    %c0_60 = arith.constant 0 : index
    %c0_61 = arith.constant 0 : index
    %83 = vector.load %arg20[%c0_60, %c0_61] : memref<64x4xf32, #tpu.memory_space<vmem>>, vector<64x4xf32>
    %c0_62 = arith.constant 0 : index
    %c0_63 = arith.constant 0 : index
    %84 = vector.load %arg21[%c0_62, %c0_63] : memref<4x64xf32, #tpu.memory_space<vmem>>, vector<4x64xf32>
    %cst_64 = arith.constant dense<0.000000e+00> : vector<2x64xf32>
    %85 = tpu.matmul %81, %80, %cst_64 {dimension_numbers = #tpu.dot_dimension_numbers<[1], [0], [0], [1], [0, 0, 1, 1], [], []>} : vector<2x32xf32>, vector<32x64xf32>, vector<2x64xf32> -> vector<2x64xf32>
    %cst_65 = arith.constant dense<0.000000e+00> : vector<2x4xf32>
    %86 = tpu.matmul %85, %83, %cst_65 {dimension_numbers = #tpu.dot_dimension_numbers<[1], [0], [0], [1], [0, 0, 1, 1], [], []>} : vector<2x64xf32>, vector<64x4xf32>, vector<2x4xf32> -> vector<2x4xf32>
    %cst_66 = arith.constant 1.000000e+00 : f32
    %87 = vector.broadcast %cst_66 : f32 to vector<2x4xf32>
    %88 = arith.maximumf %86, %87 : vector<2x4xf32>
    %cst_67 = arith.constant 1.000000e+00 : f32
    %89 = vector.broadcast %cst_67 : f32 to vector<2x4xf32>
    %90 = arith.divf %89, %88 : vector<2x4xf32>
    %91 = arith.mulf %0, %80 : vector<32x64xf32>
    %cst_68 = arith.constant dense<0.000000e+00> : vector<2x64xf32>
    %92 = tpu.matmul %81, %91, %cst_68 {dimension_numbers = #tpu.dot_dimension_numbers<[1], [0], [0], [1], [0, 0, 1, 1], [], []>} : vector<2x32xf32>, vector<32x64xf32>, vector<2x64xf32> -> vector<2x64xf32>
    %cst_69 = arith.constant dense<0.000000e+00> : vector<2x4xf32>
    %93 = tpu.matmul %92, %83, %cst_69 {dimension_numbers = #tpu.dot_dimension_numbers<[1], [0], [0], [1], [0, 0, 1, 1], [], []>} : vector<2x64xf32>, vector<64x4xf32>, vector<2x4xf32> -> vector<2x4xf32>
    %94 = arith.mulf %93, %90 : vector<2x4xf32>
    %cst_70 = arith.constant dense<0.000000e+00> : vector<32x4xf32>
    %95 = tpu.matmul %82, %94, %cst_70 {dimension_numbers = #tpu.dot_dimension_numbers<[1], [0], [0], [1], [0, 0, 1, 1], [], []>} : vector<32x2xf32>, vector<2x4xf32>, vector<32x4xf32> -> vector<32x4xf32>
    %cst_71 = arith.constant dense<0.000000e+00> : vector<32x64xf32>
    %96 = tpu.matmul %95, %84, %cst_71 {dimension_numbers = #tpu.dot_dimension_numbers<[1], [0], [0], [1], [0, 0, 1, 1], [], []>} : vector<32x4xf32>, vector<4x64xf32>, vector<32x64xf32> -> vector<32x64xf32>
    %97 = arith.subf %0, %96 : vector<32x64xf32>
    %98 = arith.subf %0, %96 : vector<32x64xf32>
    %99 = arith.mulf %97, %98 : vector<32x64xf32>
    %100 = arith.mulf %99, %80 : vector<32x64xf32>
    %cst_72 = arith.constant dense<0.000000e+00> : vector<2x64xf32>
    %101 = tpu.matmul %81, %100, %cst_72 {dimension_numbers = #tpu.dot_dimension_numbers<[1], [0], [0], [1], [0, 0, 1, 1], [], []>} : vector<2x32xf32>, vector<32x64xf32>, vector<2x64xf32> -> vector<2x64xf32>
    %cst_73 = arith.constant dense<0.000000e+00> : vector<2x4xf32>
    %102 = tpu.matmul %101, %83, %cst_73 {dimension_numbers = #tpu.dot_dimension_numbers<[1], [0], [0], [1], [0, 0, 1, 1], [], []>} : vector<2x64xf32>, vector<64x4xf32>, vector<2x4xf32> -> vector<2x4xf32>
    %103 = arith.mulf %102, %90 : vector<2x4xf32>
    %cst_74 = arith.constant dense<0.000000e+00> : vector<32x4xf32>
    %104 = tpu.matmul %82, %103, %cst_74 {dimension_numbers = #tpu.dot_dimension_numbers<[1], [0], [0], [1], [0, 0, 1, 1], [], []>} : vector<32x2xf32>, vector<2x4xf32>, vector<32x4xf32> -> vector<32x4xf32>
    %cst_75 = arith.constant dense<0.000000e+00> : vector<32x64xf32>
    %105 = tpu.matmul %104, %84, %cst_75 {dimension_numbers = #tpu.dot_dimension_numbers<[1], [0], [0], [1], [0, 0, 1, 1], [], []>} : vector<32x4xf32>, vector<4x64xf32>, vector<32x64xf32> -> vector<32x64xf32>
    %cst_76 = arith.constant 0.000000e+00 : f32
    %106 = vector.broadcast %cst_76 : f32 to vector<32x64xf32>
    %107 = arith.cmpf ogt, %80, %106 : vector<32x64xf32>
    %108 = arith.subf %0, %96 : vector<32x64xf32>
    %cst_77 = arith.constant 9.99999997E-7 : f32
    %109 = vector.broadcast %cst_77 : f32 to vector<32x64xf32>
    %110 = arith.addf %105, %109 : vector<32x64xf32>
    %111 = math.rsqrt %110 : vector<32x64xf32>
    %112 = arith.mulf %108, %111 : vector<32x64xf32>
    %113 = arith.select %107, %112, %0 : vector<32x64xi1>, vector<32x64xf32>
    %114 = arith.mulf %67, %80 : vector<32x64xf32>
    %cst_78 = arith.constant dense<0.000000e+00> : vector<2x64xf32>
    %115 = tpu.matmul %81, %114, %cst_78 {dimension_numbers = #tpu.dot_dimension_numbers<[1], [0], [0], [1], [0, 0, 1, 1], [], []>} : vector<2x32xf32>, vector<32x64xf32>, vector<2x64xf32> -> vector<2x64xf32>
    %cst_79 = arith.constant dense<0.000000e+00> : vector<2x4xf32>
    %116 = tpu.matmul %115, %83, %cst_79 {dimension_numbers = #tpu.dot_dimension_numbers<[1], [0], [0], [1], [0, 0, 1, 1], [], []>} : vector<2x64xf32>, vector<64x4xf32>, vector<2x4xf32> -> vector<2x4xf32>
    %117 = arith.mulf %116, %90 : vector<2x4xf32>
    %cst_80 = arith.constant dense<0.000000e+00> : vector<32x4xf32>
    %118 = tpu.matmul %82, %117, %cst_80 {dimension_numbers = #tpu.dot_dimension_numbers<[1], [0], [0], [1], [0, 0, 1, 1], [], []>} : vector<32x2xf32>, vector<2x4xf32>, vector<32x4xf32> -> vector<32x4xf32>
    %cst_81 = arith.constant dense<0.000000e+00> : vector<32x64xf32>
    %119 = tpu.matmul %118, %84, %cst_81 {dimension_numbers = #tpu.dot_dimension_numbers<[1], [0], [0], [1], [0, 0, 1, 1], [], []>} : vector<32x4xf32>, vector<4x64xf32>, vector<32x64xf32> -> vector<32x64xf32>
    %120 = arith.subf %67, %119 : vector<32x64xf32>
    %121 = arith.subf %67, %119 : vector<32x64xf32>
    %122 = arith.mulf %120, %121 : vector<32x64xf32>
    %123 = arith.mulf %122, %80 : vector<32x64xf32>
    %cst_82 = arith.constant dense<0.000000e+00> : vector<2x64xf32>
    %124 = tpu.matmul %81, %123, %cst_82 {dimension_numbers = #tpu.dot_dimension_numbers<[1], [0], [0], [1], [0, 0, 1, 1], [], []>} : vector<2x32xf32>, vector<32x64xf32>, vector<2x64xf32> -> vector<2x64xf32>
    %cst_83 = arith.constant dense<0.000000e+00> : vector<2x4xf32>
    %125 = tpu.matmul %124, %83, %cst_83 {dimension_numbers = #tpu.dot_dimension_numbers<[1], [0], [0], [1], [0, 0, 1, 1], [], []>} : vector<2x64xf32>, vector<64x4xf32>, vector<2x4xf32> -> vector<2x4xf32>
    %126 = arith.mulf %125, %90 : vector<2x4xf32>
    %cst_84 = arith.constant dense<0.000000e+00> : vector<32x4xf32>
    %127 = tpu.matmul %82, %126, %cst_84 {dimension_numbers = #tpu.dot_dimension_numbers<[1], [0], [0], [1], [0, 0, 1, 1], [], []>} : vector<32x2xf32>, vector<2x4xf32>, vector<32x4xf32> -> vector<32x4xf32>
    %cst_85 = arith.constant dense<0.000000e+00> : vector<32x64xf32>
    %128 = tpu.matmul %127, %84, %cst_85 {dimension_numbers = #tpu.dot_dimension_numbers<[1], [0], [0], [1], [0, 0, 1, 1], [], []>} : vector<32x4xf32>, vector<4x64xf32>, vector<32x64xf32> -> vector<32x64xf32>
    %cst_86 = arith.constant 0.000000e+00 : f32
    %129 = vector.broadcast %cst_86 : f32 to vector<32x64xf32>
    %130 = arith.cmpf ogt, %80, %129 : vector<32x64xf32>
    %131 = arith.subf %67, %119 : vector<32x64xf32>
    %cst_87 = arith.constant 9.99999997E-7 : f32
    %132 = vector.broadcast %cst_87 : f32 to vector<32x64xf32>
    %133 = arith.addf %128, %132 : vector<32x64xf32>
    %134 = math.rsqrt %133 : vector<32x64xf32>
    %135 = arith.mulf %131, %134 : vector<32x64xf32>
    %136 = arith.select %130, %135, %67 : vector<32x64xi1>, vector<32x64xf32>
    %137 = arith.mulf %73, %80 : vector<32x64xf32>
    %cst_88 = arith.constant dense<0.000000e+00> : vector<2x64xf32>
    %138 = tpu.matmul %81, %137, %cst_88 {dimension_numbers = #tpu.dot_dimension_numbers<[1], [0], [0], [1], [0, 0, 1, 1], [], []>} : vector<2x32xf32>, vector<32x64xf32>, vector<2x64xf32> -> vector<2x64xf32>
    %cst_89 = arith.constant dense<0.000000e+00> : vector<2x4xf32>
    %139 = tpu.matmul %138, %83, %cst_89 {dimension_numbers = #tpu.dot_dimension_numbers<[1], [0], [0], [1], [0, 0, 1, 1], [], []>} : vector<2x64xf32>, vector<64x4xf32>, vector<2x4xf32> -> vector<2x4xf32>
    %140 = arith.mulf %139, %90 : vector<2x4xf32>
    %cst_90 = arith.constant dense<0.000000e+00> : vector<32x4xf32>
    %141 = tpu.matmul %82, %140, %cst_90 {dimension_numbers = #tpu.dot_dimension_numbers<[1], [0], [0], [1], [0, 0, 1, 1], [], []>} : vector<32x2xf32>, vector<2x4xf32>, vector<32x4xf32> -> vector<32x4xf32>
    %cst_91 = arith.constant dense<0.000000e+00> : vector<32x64xf32>
    %142 = tpu.matmul %141, %84, %cst_91 {dimension_numbers = #tpu.dot_dimension_numbers<[1], [0], [0], [1], [0, 0, 1, 1], [], []>} : vector<32x4xf32>, vector<4x64xf32>, vector<32x64xf32> -> vector<32x64xf32>
    %143 = arith.subf %73, %142 : vector<32x64xf32>
    %144 = arith.subf %73, %142 : vector<32x64xf32>
    %145 = arith.mulf %143, %144 : vector<32x64xf32>
    %146 = arith.mulf %145, %80 : vector<32x64xf32>
    %cst_92 = arith.constant dense<0.000000e+00> : vector<2x64xf32>
    %147 = tpu.matmul %81, %146, %cst_92 {dimension_numbers = #tpu.dot_dimension_numbers<[1], [0], [0], [1], [0, 0, 1, 1], [], []>} : vector<2x32xf32>, vector<32x64xf32>, vector<2x64xf32> -> vector<2x64xf32>
    %cst_93 = arith.constant dense<0.000000e+00> : vector<2x4xf32>
    %148 = tpu.matmul %147, %83, %cst_93 {dimension_numbers = #tpu.dot_dimension_numbers<[1], [0], [0], [1], [0, 0, 1, 1], [], []>} : vector<2x64xf32>, vector<64x4xf32>, vector<2x4xf32> -> vector<2x4xf32>
    %149 = arith.mulf %148, %90 : vector<2x4xf32>
    %cst_94 = arith.constant dense<0.000000e+00> : vector<32x4xf32>
    %150 = tpu.matmul %82, %149, %cst_94 {dimension_numbers = #tpu.dot_dimension_numbers<[1], [0], [0], [1], [0, 0, 1, 1], [], []>} : vector<32x2xf32>, vector<2x4xf32>, vector<32x4xf32> -> vector<32x4xf32>
    %cst_95 = arith.constant dense<0.000000e+00> : vector<32x64xf32>
    %151 = tpu.matmul %150, %84, %cst_95 {dimension_numbers = #tpu.dot_dimension_numbers<[1], [0], [0], [1], [0, 0, 1, 1], [], []>} : vector<32x4xf32>, vector<4x64xf32>, vector<32x64xf32> -> vector<32x64xf32>
    %cst_96 = arith.constant 0.000000e+00 : f32
    %152 = vector.broadcast %cst_96 : f32 to vector<32x64xf32>
    %153 = arith.cmpf ogt, %80, %152 : vector<32x64xf32>
    %154 = arith.subf %73, %142 : vector<32x64xf32>
    %cst_97 = arith.constant 9.99999997E-7 : f32
    %155 = vector.broadcast %cst_97 : f32 to vector<32x64xf32>
    %156 = arith.addf %151, %155 : vector<32x64xf32>
    %157 = math.rsqrt %156 : vector<32x64xf32>
    %158 = arith.mulf %154, %157 : vector<32x64xf32>
    %159 = arith.select %153, %158, %73 : vector<32x64xi1>, vector<32x64xf32>
    %160 = vector.shape_cast %78 : vector<32x16xf32> to vector<1x32x16xf32>
    %cst_98 = arith.constant dense<0.000000e+00> : vector<1xf32>
    %161 = vector.multi_reduction <add>, %160, %cst_98 [1, 2] : vector<1x32x16xf32> to vector<1xf32>
    %162 = vector.shape_cast %161 : vector<1xf32> to vector<1x1x1xf32>
    %163 = vector.extract %162[0, 0, 0] : f32 from vector<1x1x1xf32>
    %164 = vector.broadcast %163 : f32 to vector<1x1xf32>
    %165 = arith.subf %113, %136 : vector<32x64xf32>
    %166 = arith.mulf %165, %80 : vector<32x64xf32>
    %167 = arith.subf %113, %159 : vector<32x64xf32>
    %168 = arith.mulf %167, %80 : vector<32x64xf32>
    %169 = arith.mulf %166, %166 : vector<32x64xf32>
    %170 = vector.shape_cast %169 : vector<32x64xf32> to vector<1x32x64xf32>
    %cst_99 = arith.constant dense<0.000000e+00> : vector<1xf32>
    %171 = vector.multi_reduction <add>, %170, %cst_99 [1, 2] : vector<1x32x64xf32> to vector<1xf32>
    %172 = vector.shape_cast %171 : vector<1xf32> to vector<1x1x1xf32>
    %173 = vector.extract %172[0, 0, 0] : f32 from vector<1x1x1xf32>
    %174 = vector.broadcast %173 : f32 to vector<1x1xf32>
    %175 = arith.divf %174, %164 : vector<1x1xf32>
    %176 = arith.mulf %168, %168 : vector<32x64xf32>
    %177 = vector.shape_cast %176 : vector<32x64xf32> to vector<1x32x64xf32>
    %cst_100 = arith.constant dense<0.000000e+00> : vector<1xf32>
    %178 = vector.multi_reduction <add>, %177, %cst_100 [1, 2] : vector<1x32x64xf32> to vector<1xf32>
    %179 = vector.shape_cast %178 : vector<1xf32> to vector<1x1x1xf32>
    %180 = vector.extract %179[0, 0, 0] : f32 from vector<1x1x1xf32>
    %181 = vector.broadcast %180 : f32 to vector<1x1xf32>
    %182 = arith.divf %181, %164 : vector<1x1xf32>
    %183 = tpu.iota {dimensions = array<i32: 1>} : vector<1x8xi32>
    %c0_i32 = arith.constant 0 : i32
    %184 = vector.broadcast %c0_i32 : i32 to vector<1x8xi32>
    %185 = arith.cmpi eq, %183, %184 : vector<1x8xi32>
    %186 = arith.extui %185 : vector<1x8xi1> to vector<1x8xi32>
    %187 = arith.sitofp %186 : vector<1x8xi32> to vector<1x8xf32>
    %188 = vector.broadcast %175 : vector<1x1xf32> to vector<1x8xf32>
    %189 = arith.mulf %188, %187 : vector<1x8xf32>
    %c1_i32 = arith.constant 1 : i32
    %190 = vector.broadcast %c1_i32 : i32 to vector<1x8xi32>
    %191 = arith.cmpi eq, %183, %190 : vector<1x8xi32>
    %192 = arith.extui %191 : vector<1x8xi1> to vector<1x8xi32>
    %193 = arith.sitofp %192 : vector<1x8xi32> to vector<1x8xf32>
    %194 = vector.broadcast %182 : vector<1x1xf32> to vector<1x8xf32>
    %195 = arith.mulf %194, %193 : vector<1x8xf32>
    %196 = arith.addf %189, %195 : vector<1x8xf32>
    %c2_i32 = arith.constant 2 : i32
    %197 = vector.broadcast %c2_i32 : i32 to vector<1x8xi32>
    %198 = arith.cmpi eq, %183, %197 : vector<1x8xi32>
    %199 = arith.extui %198 : vector<1x8xi1> to vector<1x8xi32>
    %200 = arith.sitofp %199 : vector<1x8xi32> to vector<1x8xf32>
    %201 = vector.broadcast %56 : vector<1x1xf32> to vector<1x8xf32>
    %202 = arith.mulf %201, %200 : vector<1x8xf32>
    %203 = arith.addf %196, %202 : vector<1x8xf32>
    %c0_101 = arith.constant 0 : index
    %c0_102 = arith.constant 0 : index
    %204 = vector.load %arg25[%c0_101, %c0_102] : memref<1x8xf32, #tpu.memory_space<vmem>>, vector<1x8xf32>
    tpu.vector_store %arg25[%c0_101, %c0_102], %203 {strides = array<i32>} : memref<1x8xf32, #tpu.memory_space<vmem>>, vector<1x8xf32>,
    return
  }
}

</mosaic_0001>

<bundles_post_ra>
// kernel: squeeze.7
= control target key start
LH: loop header
LB: loop body
LE: loop exit
PB: predicated region body
PF: predicated region fallthrough
CT: control target
= control target key end

     0   :  { %s85_s0 = inlined_call_operand.vmem [shape: s32[32], index: 0, kind: input, shape index: {}]   ;;  %s86_s1 = inlined_call_operand.hbm [shape: s32[2,16], index: 1, kind: output, shape index: {}]  }
   0x1   :  { %v5_v0 = vld [vmem:[%s85_s0] sm:$0x1] }
   0x2   :  { %2 = vsyncpa [#allocation1], 0  ;;  %6 = vst [vmem:[#allocation3] sm:$0x1] %v5_v0  ;;  %vm8_vm0 = vcmask 130048   ;;  %s58_s0 = smov 112  }
   0x3   :  { %s59_s8 = smov [#allocation0]  }
   0x4   :  { %s26_s9 = sshll.u32 %s59_s8, 4  ;;  %s27_s9 = int_to_ptr.vmem [resolvable:$true] %s26_s9 }
   0x5   :  { %s34_s10 = scalar_lea.vmem %s27_s9, 32  ;;  %p39_p1 = scmp.lt.s32.totalorder %s27_s9, %s27_s9 }
   0x6   :  { %p35_p0 = scmp.ne.s32.totalorder %s27_s9, %s34_s10  ;;  %p40_p2 = scmp.lt.s32.totalorder %s34_s10, %s34_s10 }
   0x8   :  { %p41_p3 = por %p40_p2, %p39_p1 }
   0x9   :  { %v10_v1 = vld [vmem:[#allocation3] sm:$0x1]  }
   0xa   :  { %v7_v2 = vld [vmem:[#allocation3] sm:$0x1]   ;;  %11 = vrot.lane.b32.xlu0 %v10_v1, %s58_s0  ;;  %p42_p4 = pnand %p41_p3, %p35_p0 }
   0xb   :  { %9 = vst.msk [vmem:[#allocation2] sm:$0x1] %vm8_vm0, %v7_v2  }
  0x7c   :  { %v12_v3 = vpop.permute.xlu0 %11  }
  0x7d   :  { %15 = vst.msk [vmem:[#allocation2 + $0x1] sm:$0x1] %vm8_vm0, %v12_v3  }
  0x84   :  { %v19_v4 = vld [vmem:[#allocation2] sm:$0x3] }
  0x85   :  { %21 = vst [vmem:[#allocation0] sm:$0x3] %v19_v4 }
  0x86   :  { %45 = shalt.err (!%p42_p4)
}
  0x87   :  { %s46_s13 = scalar_lea.hbm %s86_s1, 32 }
  0x88   :  { %p47_p5 = scmp.ne.s32.totalorder %s86_s1, %s46_s13  ;;  %p50_p6 = scmp.lt.u32.totalorder %s46_s13, %s86_s1 }
  0x8a   :  { %p52_p7 = pnand %p50_p6, %p47_p5 }
  0x8c   :  { %55 = shalt.err (!%p52_p7)
}
  0x8d   :  { %29 = dma.vmem_to_hbm [thread:$0]  %s27_s9, 32, %s86_s1, [#allocation1]  }
  0x8e   :  { %56 = dma.done.wait [#allocation1], 32  }
  0x8f   :  { %57 = vsyncadd [#allocation1], 4294967264 }
  0x90   :  { %31 = vsyncpa [#allocation1], 1 }

// kernel: spat_spec_forward.1
= control target key start
LH: loop header
LB: loop body
LE: loop exit
PB: predicated region body
PF: predicated region fallthrough
CT: control target
= control target key end

     0   :  { %vm123_vm0 = vcmask 523264   ;;  %vm227_vm1 = vcmask 261120   ;;  %v4495_v20 = vmov 0   ;;  %s4496_s29 = smov 96   ;;  %vm753_vm10 = vcmask 7168   ;;  %s5502_s2 = inlined_call_operand.vmem [shape: bf16[64,64], index: 2, kind: input, shape index: {}]   ;;  %s5503_s0 = inlined_call_operand.vmem [shape: f32[32,64], index: 0, kind: input, shape index: {}]   ;;  %s5504_s3 = inlined_call_operand.vmem [shape: f32[1,64], index: 3, kind: input, shape index: {}]   ;;  %s5505_s4 = inlined_call_operand.vmem [shape: bf16[32,32], index: 4, kind: input, shape index: {}]   ;;  %s5506_s5 = inlined_call_operand.vmem [shape: f32[32,1], index: 5, kind: input, shape index: {}]   ;;  %s5507_s7 = inlined_call_operand.vmem [shape: bf16[32,32], index: 7, kind: input, shape index: {}]   ;;  %s5508_s6 = inlined_call_operand.vmem [shape: bf16[32,32], index: 6, kind: input, shape index: {}]   ;;  %s5509_s9 = inlined_call_operand.vmem [shape: f32[32,64], index: 9, kind: input, shape index: {}]   ;;  %s5510_s8 = inlined_call_operand.vmem [shape: f32[1,32], index: 8, kind: input, shape index: {}]   ;;  %s5511_s11 = inlined_call_operand.vmem [shape: f32[1,64], index: 11, kind: input, shape index: {}]   ;;  %s5512_s10 = inlined_call_operand.vmem [shape: f32[64,32], index: 10, kind: input, shape index: {}]   ;;  %s5513_s13 = inlined_call_operand.vmem [shape: f32[32,1], index: 13, kind: input, shape index: {}]   ;;  %s5514_s24 = inlined_call_operand.vmem [shape: s32[32,1], index: 24, kind: output, shape index: {1}]   ;;  %s5515_s12 = inlined_call_operand.vmem [shape: bf16[32,32], index: 12, kind: input, shape index: {}]   ;;  %s5516_s14 = inlined_call_operand.vmem [shape: bf16[32,64], index: 14, kind: input, shape index: {}]   ;;  %s5517_s22 = inlined_call_operand.vmem [shape: f32[16,64], index: 22, kind: input, shape index: {}]   ;;  %s5518_s1 = inlined_call_operand.vmem [shape: f32[32,16], index: 1, kind: input, shape index: {}]   ;;  %s5519_s16 = inlined_call_operand.vmem [shape: bf16[32,64], index: 16, kind: input, shape index: {}]   ;;  %s5520_s15 = inlined_call_operand.vmem [shape: f32[1,64], index: 15, kind: input, shape index: {}]   ;;  %s5521_s18 = inlined_call_operand.vmem [shape: f32[2,32], index: 18, kind: input, shape index: {}]   ;;  %s5522_s20 = inlined_call_operand.vmem [shape: f32[64,4], index: 20, kind: input, shape index: {}]   ;;  %s5523_s17 = inlined_call_operand.vmem [shape: f32[1,64], index: 17, kind: input, shape index: {}]   ;;  %s5524_s19 = inlined_call_operand.vmem [shape: f32[32,2], index: 19, kind: input, shape index: {}]   ;;  %s5525_s21 = inlined_call_operand.vmem [shape: f32[4,64], index: 21, kind: input, shape index: {}]   ;;  %s5526_s23 = inlined_call_operand.vmem [shape: f32[32,128], index: 23, kind: output, shape index: {0}]   ;;  %s5527_s25 = inlined_call_operand.vmem [shape: f32[1,8], index: 25, kind: output, shape index: {2}]  }
   0x1   :  { %5537 = sst [smem:[#allocation2_spill]] %s5502_s2  ;;  %4445 = vset.pattern.permute.xlu1 %v4495_v20  ;;  %4446 = vset.pattern.permute.xlu0 %v4495_v20  ;;  %v566_v20 = vlaneseq  ;;  %vm1071_vm15 = vcmask 130048  }
   0x2   :  { %5538 = sst [smem:[#allocation3_spill]] %s5503_s0 }
   0x3   :  { %5539 = sst [smem:[#allocation4_spill]] %s5504_s3  ;;  %s5548_s27 = sld [smem:[#allocation3_spill]] }
   0x4   :  { %5540 = sst [smem:[#allocation5_spill]] %s5505_s4  ;;  %s5549_s4 = sld [smem:[#allocation4_spill]] }
   0x5   :  { %5541 = sst [smem:[#allocation6_spill]] %s5506_s5 }
   0x6   :  { %5542 = sst [smem:[#allocation7_spill]] %s5507_s7 }
   0x7   :  { %5543 = sst [smem:[#allocation8_spill]] %s5508_s6  ;;  %s5547_s6 = sld [smem:[#allocation2_spill]] }
   0x8   :  { %5544 = sst [smem:[#allocation9_spill]] %s5509_s9  ;;  %s5552_s28 = sld [smem:[#allocation7_spill]] }
   0x9   :  { %5545 = sst [smem:[#allocation10_spill]] %s5510_s8  ;;  %v4643_v3 = vld [vmem:[%s5548_s27] sm:$0xff]  ;;  %v4648_v4 = vld [vmem:[%s5548_s27 + $0x8] sm:$0xff]  ;;  %v4659_v7 = vld [vmem:[%s5548_s27 + $0x10] sm:$0xff]  ;;  %s5550_s8 = sld [smem:[#allocation5_spill]] }
   0xa   :  { %5546 = sst [smem:[#allocation11_spill]] %s5511_s11  ;;  %v82_v5 = vpack.c.bf16 %v4648_v4, %v4643_v3  ;;  %v4664_v8 = vld [vmem:[%s5548_s27 + $0x18] sm:$0xff]  ;;  %v3519_v10 = vld [vmem:[%s5549_s4] ss:$0 sm:$0xff]  ;;  %s5551_s11 = sld [smem:[#allocation6_spill]] }
   0xb   :  { %v83_v9 = vpack.c.bf16 %v4664_v8, %v4659_v7  ;;  %s5553_s3 = sld [smem:[#allocation8_spill]]  ;;  %s5554_s9 = sld [smem:[#allocation9_spill]] }
   0xc   :  { %3869 = vmatprep.mubr.msk.bf16.mxu0 %vm123_vm0, %v82_v5 }
   0xd   :  { %v4447_v0 = vld [vmem:[%s5547_s6] sm:$0xff]   ;;  %v4448_v1 = vld [vmem:[%s5547_s6 + $0x8] sm:$0xff]   ;;  %v4449_v2 = vld [vmem:[%s5547_s6 + $0x10] sm:$0xff]  }
   0xe   :  { %3861 = vmatprep.subr.bf16.mxu0 %v4447_v0  ;;  %v4450_v6 = vld [vmem:[%s5547_s6 + $0x18] sm:$0xff]   ;;  %v4453_v30 = vld [vmem:[%s5552_s28] sm:$0xff]   ;;  %v4454_v31 = vld [vmem:[%s5552_s28 + $0x8] sm:$0xff]  }
   0xf   :  { %3862 = vmatpush3.bf16.msra.mxu0 %v4447_v0  ;;  %v4451_v12 = vld [vmem:[%s5550_s8] sm:$0xff]   ;;  %v4452_v29 = vld [vmem:[%s5550_s8 + $0x8] sm:$0xff]  }
  0x10   :  { %3863 = vmatprep.subr.bf16.mxu0 %v4448_v1  ;;  %3877 = vmatprep.mubr.msk.bf16.mxu1 %vm227_vm1, %v4451_v12  ;;  %v185_v21 = vld [vmem:[%s5551_s11] sm:$0xff]  ;;  %v186_v24 = vld [vmem:[%s5551_s11 + $0x8] sm:$0xff]  ;;  %v188_v25 = vld [vmem:[%s5551_s11 + $0x18] sm:$0xff] }
  0x11   :  { %191 = vperm.xlu1 %4445, %v185_v21   ;;  %v187_v26 = vld [vmem:[%s5551_s11 + $0x10] sm:$0xff]  ;;  %v4455_v32 = vld [vmem:[%s5553_s3] sm:$0xff]   ;;  %v439_v34 = vld [vmem:[%s5554_s9 + $0x8] sm:$0xff]  ;;  %v4746_v21 = vand.u32 127, %v566_v20 }
  0x12   :  { %v438_v33 = vld [vmem:[%s5554_s9] sm:$0xff]  ;;  %v4456_v50 = vld [vmem:[%s5553_s3 + $0x8] sm:$0xff]   ;;  %v440_v51 = vld [vmem:[%s5554_s9 + $0x10] sm:$0xff]  ;;  %s5555_s3 = sld [smem:[#allocation10_spill]] }
  0x13   :  { %3864 = vmatpush3.bf16.msra.mxu0 %v4448_v1  ;;  %v4273_v35 = vpack.c.bf16 %v439_v34, %v438_v33  ;;  %v441_v52 = vld [vmem:[%s5554_s9 + $0x18] sm:$0xff]  ;;  %s5556_s9 = sld [smem:[#allocation11_spill]] }
  0x14   :  { %3865 = vmatprep.subr.bf16.mxu0 %v4449_v2  ;;  %v4277_v53 = vpack.c.bf16 %v441_v52, %v440_v51 }
  0x15   :  { %196 = vperm.xlu1 %4445, %v186_v24  }
  0x17   :  { %3866 = vmatpush3.bf16.msra.mxu0 %v4449_v2 }
  0x18   :  { %3867 = vmatprep.subr.bf16.mxu0 %v4450_v6  ;;  %v3538_v54 = vld [vmem:[%s5555_s3] ss:$0 sm:$0xff] }
  0x19   :  { %206 = vperm.xlu1 %4445, %v188_v25   ;;  %v3543_v0 = vld [vmem:[%s5556_s9] ss:$0 sm:$0xff] }
  0x1b   :  { %3868 = vmatpush3.bf16.msra.mxu0 %v4450_v6 }
  0x1c   :  { %4274 = vmatprep.subr.bf16.mxu0 %v4273_v35 }
  0x1e   :  { %3870 = vmatmul.mubr.msk.bf16.vlgmr.msra.gmra.mrb[0].mxu0 %vm123_vm0, %v83_v9 }
  0x1f   :  { %4276 = vmatpush3.bf16.msra.mxu0 %v4273_v35 }
  0x20   :  { %4278 = vmatprep.subr.bf16.mxu0 %v4277_v53 }
  0x23   :  { %4280 = vmatpush3.bf16.msra.mxu0 %v4277_v53 }
  0x90   :  { %v192_v36 = vpop.permute.xlu1 %191 }
  0x94   :  { %v197_v37 = vpop.permute.xlu1 %196 }
  0x98   :  { %v207_v41 = vpop.permute.xlu1 %206 }
  0xf1   :  { %v3871_v11 = vpop.f32.mrb[0].mxu0 }
  0xf2   :  { %v164_v13 = vpop.f32.mrb[1].mxu0  ;;  %v173_v15 = vadd.f32 %v3871_v11, %v3519_v10 }
  0xf3   :  { %v3872_v14 = vpop.f32.mrb[2].mxu0  ;;  %v165_v18 = vadd.f32 %v3519_v10, %v164_v13 }
  0xf4   :  { %v176_v16 = vadd.f32 %v3872_v14, %v3519_v10  ;;  %v167_v17 = vpop.f32.mrb[3].mxu0 }
  0xf5   :  { %v168_v19 = vadd.f32 %v3519_v10, %v167_v17 }
  0xf6   :  { %v184_v22 = vpack.c.bf16 %v176_v16, %v173_v15 }
  0xf7   :  { %v183_v23 = vpack.c.bf16 %v168_v19, %v165_v18 }
  0xf9   :  { %221 = vrot.lane.b32.xlu0 %v183_v23, %s4496_s29 }
  0xfd   :  { %223 = vrot.lane.b32.xlu0 %v184_v22, %s4496_s29 }
 0x101   :  { %201 = vperm.xlu0 %4446, %v187_v26  }
 0x16b   :  { %v222_v27 = vpop.permute.xlu0 %221 }
 0x16c   :  { %3873 = vmatprep.subr.bf16.mxu1 %v222_v27 }
 0x16d   :  { %3874 = vmatpush3.bf16.msra.mxu1 %v222_v27 }
 0x16f   :  { %v224_v28 = vpop.permute.xlu0 %223 }
 0x170   :  { %3875 = vmatprep.subr.bf16.mxu1 %v224_v28 }
 0x171   :  { %3876 = vmatpush3.bf16.msra.mxu1 %v224_v28 }
 0x172   :  { %3881 = vmatprep.subr.bf16.mxu1 %v4453_v30 }
 0x174   :  { %3878 = vmatmul.mubr.msk.bf16.vlgmr.msra.gmra.mrb[0].mxu1 %vm227_vm1, %v4452_v29 }
 0x175   :  { %3882 = vmatpush3.bf16.msra.mxu1 %v4453_v30 }
 0x176   :  { %3883 = vmatprep.subr.bf16.mxu1 %v4454_v31 }
 0x179   :  { %3884 = vmatpush3.bf16.msra.mxu1 %v4454_v31 }
 0x17a   :  { %3889 = vmatprep.subr.bf16.mxu1 %v4455_v32 }
 0x180   :  { %v202_v39 = vpop.permute.xlu0 %201 }
 0x247   :  { %v3879_v38 = vpop.f32.mrb[0].mxu1 }
 0x248   :  { %v268_v40 = vpop.f32.mrb[1].mxu1  ;;  %v277_v43 = vadd.f32 %v3879_v38, %v202_v39 }
 0x249   :  { %v3880_v42 = vpop.f32.mrb[2].mxu1  ;;  %v269_v46 = vadd.f32 %v268_v40, %v192_v36 }
 0x24a   :  { %v280_v44 = vadd.f32 %v3880_v42, %v207_v41  ;;  %v271_v45 = vpop.f32.mrb[3].mxu1  ;;  %v648_v42 = vld [vmem:[%s5512_s10] sm:$0xff] }
 0x24b   :  { %v272_v47 = vadd.f32 %v271_v45, %v197_v37 }
 0x24c   :  { %v288_v48 = vpack.c.bf16 %v280_v44, %v277_v43  ;;  %v649_v43 = vld [vmem:[%s5512_s10 + $0x8] sm:$0xff]  ;;  %v650_v44 = vld [vmem:[%s5512_s10 + $0x10] sm:$0xff] }
 0x24d   :  { %v287_v49 = vpack.c.bf16 %v272_v47, %v269_v46  ;;  %v4281_v45 = vpack.c.bf16 %v649_v43, %v648_v42  ;;  %v651_v46 = vld [vmem:[%s5512_s10 + $0x18] sm:$0xff] }
 0x24e   :  { %v4285_v47 = vpack.c.bf16 %v651_v46, %v650_v44  ;;  %v4457_v44 = vld [vmem:[%s5515_s12] sm:$0xff]  }
 0x24f   :  { %3885 = vmatprep.mubr.msk.bf16.mxu1 %vm227_vm1, %v287_v49  ;;  %4282 = vmatprep.subr.bf16.mxu0 %v4281_v45 }
 0x250   :  { %3886 = vmatmul.mubr.msk.bf16.vlgmr.msra.gmra.mrb[4].mxu1 %vm227_vm1, %v288_v48 }
 0x251   :  { %3893 = vmatprep.mubr.msk.bf16.mxu1 %vm227_vm1, %v183_v23  ;;  %3890 = vmatpush3.bf16.msra.mxu1 %v4455_v32 }
 0x252   :  { %3891 = vmatprep.subr.bf16.mxu1 %v4456_v50 }
 0x255   :  { %3892 = vmatpush3.bf16.msra.mxu1 %v4456_v50 }
 0x25c   :  { %3894 = vmatmul.mubr.msk.bf16.vlgmr.msra.gmra.mrb[4].mxu1 %vm227_vm1, %v184_v22 }
 0x25d   :  { %3937 = vmatprep.mubr.msk.bf16.mxu1 %vm227_vm1, %v4457_v44 }
 0x32f   :  { %v3895_v55 = vpop.f32.mrb[4].mxu1 }
 0x330   :  { %v412_v56 = vpop.f32.mrb[5].mxu1  ;;  %v4729_v61 = vadd.f32 %v3895_v55, %v3538_v54 }
 0x331   :  { %v4723_v57 = vadd.f32 %v3538_v54, %v412_v56  ;;  %v3896_v58 = vpop.f32.mrb[6].mxu1 }
 0x332   :  { %v415_v59 = vpop.f32.mrb[7].mxu1  ;;  %v4735_v62 = vadd.f32 %v3896_v58, %v3538_v54 }
 0x333   :  { %v4725_v60 = vadd.f32 %v3538_v54, %v415_v59  ;;  %3905 = vmatprep.mubr.msk.f32.mxu0 %vm227_vm1, %v4723_v57 }
 0x335   :  { %3906 = vmatmul.mubr.msk.f32.vlgmr.msra.gmra.mrb[4].mxu0 %vm227_vm1, %v4725_v60 }
 0x336   :  { %3908 = vmatprep.mubr.msk.f32.mxu0 %vm227_vm1, %v4729_v61  ;;  %4284 = vmatpush3.bf16.msra.mxu0 %v4281_v45 }
 0x337   :  { %4286 = vmatprep.subr.bf16.mxu0 %v4285_v47 }
 0x339   :  { %3909 = vmatmul.mubr.msk.f32.gmra.mrb[6].mxu0 %vm227_vm1, %v4735_v62 }
 0x33a   :  { %4288 = vmatpush3.bf16.msra.mxu0 %v4285_v47 }
 0x408   :  { %v3907_v63 = vpop.f32.mrb[4].mxu0 }
 0x409   :  { %v541_v1 = vmul.f32 2.0, %v3907_v63  ;;  %v520_v2 = vpop.f32.mrb[5].mxu0 }
 0x40a   :  { %v540_v5 = vmul.f32 2.0, %v520_v2 }
 0x40b   :  { %v551_v6 = vsub.f32 %v3543_v0, %v541_v1 }
 0x40c   :  { %v3910_v9 = vpop.f32.mrb[6].mxu0  ;;  %v550_v10 = vsub.f32 %v3543_v0, %v540_v5 }
 0x40d   :  { %v543_v11 = vmul.f32 2.0, %v3910_v9  ;;  %v530_v12 = vpop.f32.mrb[7].mxu0  ;;  %v557_v13 = vsel %vm123_vm0, %v551_v6, inf  ;;  %v653_v9 = vld [vmem:[%s5512_s10 + $0x28] sm:$0xff] }
 0x40e   :  { %v542_v14 = vmul.f32 2.0, %v530_v12  ;;  %558 = vmin.xlane.f32.xlu0 %v557_v13  ;;  %v554_v15 = vsel %vm123_vm0, %v550_v10, inf  ;;  %v655_v12 = vld [vmem:[%s5512_s10 + $0x38] sm:$0xff] }
 0x40f   :  { %555 = vmin.xlane.f32.xlu1 %v554_v15  ;;  %v553_v16 = vsub.f32 %v3543_v0, %v543_v11  ;;  %v654_v11 = vld [vmem:[%s5512_s10 + $0x30] sm:$0xff] }
 0x410   :  { %v552_v17 = vsub.f32 %v3543_v0, %v542_v14  ;;  %v4293_v13 = vpack.c.bf16 %v655_v12, %v654_v11  ;;  %v791_v14 = vld [vmem:[%s5513_s13 + $0x8] sm:$0xff]  ;;  %v792_v15 = vld [vmem:[%s5513_s13 + $0x10] sm:$0xff]  ;;  %v4852_v12 = vld [vmem:[%s5518_s1] sm:$0xff] }
 0x411   :  { %v563_v18 = vsel %vm123_vm0, %v553_v16, inf }
 0x412   :  { %v560_v19 = vsel %vm123_vm0, %v552_v17, inf }
 0x413   :  { %564 = vmin.xlane.f32.xlu1 %v563_v18  ;;  %561 = vmin.xlane.f32.xlu0 %v560_v19 }
 0x49b   :  { %v559_v22 = vpop.xlane.xlu0 %558 }
 0x49c   :  { %vm569_vm2 = vcmp.eq.f32.partialorder %v551_v6, %v559_v22  ;;  %v556_v23 = vpop.xlane.xlu1 %555  ;;  %v652_v6 = vld [vmem:[%s5512_s10 + $0x20] sm:$0xff] }
 0x49d   :  { %v573_v24 = vsel %vm569_vm2, %v4746_v21, 64  ;;  %vm568_vm3 = vcmp.eq.f32.partialorder %v550_v10, %v556_v23  ;;  %v4289_v10 = vpack.c.bf16 %v653_v9, %v652_v6  ;;  %v1070_v6 = vld [vmem:[%s5517_s22 + $0x8] sm:$0xff]  ;;  %vm4499_vm2 = vmmov 0  }
 0x49e   :  { %v591_v25 = vsel %vm123_vm0, %v573_v24, 2147483647  ;;  %v572_v26 = vsel %vm568_vm3, %v4746_v21, 64  ;;  %vm1480_vm3 = vcmask 15360  }
 0x49f   :  { %v576_v27 = vsel %vm123_vm0, %v572_v26, 2147483647  ;;  %v593_v28 = vshra.s32 %v591_v25, 16  ;;  %v592_v48 = vand.u32 65535, %v591_v25  ;;  %4290 = vmatprep.subr.bf16.mxu0 %v4289_v10 }
 0x4a0   :  { %v565_v29 = vpop.xlane.xlu1 %564  ;;  %v562_v30 = vpop.xlane.xlu0 %561  ;;  %v578_v31 = vshra.s32 %v576_v27, 16  ;;  %v577_v49 = vand.u32 65535, %v576_v27  ;;  %4292 = vmatpush3.bf16.msra.mxu0 %v4289_v10 }
 0x4a1   :  { %vm571_vm4 = vcmp.eq.f32.partialorder %v553_v16, %v565_v29  ;;  %vm570_vm5 = vcmp.eq.f32.partialorder %v552_v17, %v562_v30  ;;  %v595_v32 = vcvt.s32.f32 %v593_v28  ;;  %v594_v51 = vcvt.s32.f32 %v592_v48  ;;  %4294 = vmatprep.subr.bf16.mxu0 %v4293_v13  ;;  %v790_v16 = vld [vmem:[%s5513_s13] sm:$0xff]  ;;  %v793_v17 = vld [vmem:[%s5513_s13 + $0x18] sm:$0xff] }
 0x4a2   :  { %v575_v33 = vsel %vm571_vm4, %v4746_v21, 64  ;;  %v574_v34 = vsel %vm570_vm5, %v4746_v21, 64  ;;  %v580_v35 = vcvt.s32.f32 %v578_v31  ;;  %v579_v53 = vcvt.s32.f32 %v577_v49 }
 0x4a3   :  { %v621_v36 = vsel %vm123_vm0, %v575_v33, 2147483647  ;;  %v606_v37 = vsel %vm123_vm0, %v574_v34, 2147483647  ;;  %596 = vmin.xlane.f32.xlu1 %v595_v32  ;;  %vm1493_vm4 = vcmask 1041408   ;;  %vm1595_vm5 = vcmask 1043456  }
 0x4a4   :  { %581 = vmin.xlane.f32.xlu0 %v580_v35  ;;  %v623_v38 = vshra.s32 %v621_v36, 16  ;;  %v608_v39 = vshra.s32 %v606_v37, 16  ;;  %v622_v54 = vand.u32 65535, %v621_v36  ;;  %v607_v55 = vand.u32 65535, %v606_v37  ;;  %4296 = vmatpush3.bf16.msra.mxu0 %v4293_v13 }
 0x4a5   :  { %v4497_v37 = vmov 0.0   ;;  %v1065_v13 = vsub.f32 1.0, %v4852_v12 }
 0x4a6   :  { %v625_v40 = vcvt.s32.f32 %v623_v38  ;;  %v610_v41 = vcvt.s32.f32 %v608_v39  ;;  %v624_v0 = vcvt.s32.f32 %v622_v54  ;;  %v609_v1 = vcvt.s32.f32 %v607_v55 }
 0x4a8   :  { %626 = vmin.xlane.f32.xlu1 %v625_v40  ;;  %611 = vmin.xlane.f32.xlu0 %v610_v41 }
 0x530   :  { %v597_v50 = vpop.xlane.xlu1 %596 }
 0x531   :  { %v582_v52 = vpop.xlane.xlu0 %581  ;;  %vm598_vm6 = vcmp.eq.f32.partialorder %v595_v32, %v597_v50  ;;  %v603_v18 = vcvt.f32.s32 %v597_v50 }
 0x532   :  { %v599_v56 = vsel %vm598_vm6, %v594_v51, inf  ;;  %vm583_vm7 = vcmp.eq.f32.partialorder %v580_v35, %v582_v52  ;;  %v588_v19 = vcvt.f32.s32 %v582_v52  ;;  %vm1582_vm6 = vcmask 31744  }
 0x533   :  { %600 = vmin.xlane.f32.xlu1 %v599_v56  ;;  %v584_v58 = vsel %vm583_vm7, %v579_v53, inf  ;;  %v604_v22 = vshll.u32 %v603_v18, 16  ;;  %v4874_v18 = vld [vmem:[%s5518_s1 + $0x18] sm:$0xff] }
 0x534   :  { %585 = vmin.xlane.f32.xlu0 %v584_v58  ;;  %v589_v26 = vshll.u32 %v588_v19, 16  ;;  %v5535_v19 = vsub.f32 1.0, %v4874_v18 }
 0x535   :  { %v627_v59 = vpop.xlane.xlu1 %626  ;;  %v612_v63 = vpop.xlane.xlu0 %611 }
 0x536   :  { %vm628_vm8 = vcmp.eq.f32.partialorder %v625_v40, %v627_v59  ;;  %vm613_vm9 = vcmp.eq.f32.partialorder %v610_v41, %v612_v63  ;;  %v633_v23 = vcvt.f32.s32 %v627_v59  ;;  %v618_v27 = vcvt.f32.s32 %v612_v63 }
 0x537   :  { %v629_v2 = vsel %vm628_vm8, %v624_v0, inf  ;;  %v614_v5 = vsel %vm613_vm9, %v609_v1, inf  ;;  %v4458_v1 = vld [vmem:[%s5515_s12 + $0x8] sm:$0xff]  }
 0x538   :  { %630 = vmin.xlane.f32.xlu1 %v629_v2  ;;  %615 = vmin.xlane.f32.xlu0 %v614_v5  ;;  %v634_v31 = vshll.u32 %v633_v23, 16  ;;  %v619_v34 = vshll.u32 %v618_v27, 16  ;;  %v1069_v5 = vld [vmem:[%s5517_s22] sm:$0xff]  ;;  %v4498_v23 = vmov 0.0|0.0  }
 0x539   :  { %v4297_v11 = vpack.c.bf16 %v1070_v6, %v1069_v5 }
 0x549   :  { %801 = vperm.xlu1 %4445, %v791_v14   ;;  %v4862_v14 = vld [vmem:[%s5518_s1 + $0x8] sm:$0xff] }
 0x54d   :  { %806 = vperm.xlu1 %4445, %v792_v15   ;;  %v4867_v15 = vld [vmem:[%s5518_s1 + $0x10] sm:$0xff] }
 0x54e   :  { %796 = vperm.xlu0 %4446, %v790_v16   ;;  %v1066_v16 = vsub.f32 1.0, %v4862_v14 }
 0x552   :  { %811 = vperm.xlu0 %4446, %v793_v17   ;;  %v5536_v17 = vsub.f32 1.0, %v4867_v15 }
 0x5c0   :  { %v601_v20 = vpop.xlane.xlu1 %600 }
 0x5c1   :  { %v602_v24 = vcvt.f32.s32 %v601_v20  ;;  %v586_v25 = vpop.xlane.xlu0 %585  ;;  %v4461_v20 = vld [vmem:[%s5519_s16] sm:$0xff]  }
 0x5c2   :  { %v587_v28 = vcvt.f32.s32 %v586_v25  ;;  %3949 = vmatprep.subr.bf16.mxu0 %v4461_v20 }
 0x5c3   :  { %v605_v29 = vadd.s32 %v604_v22, %v602_v24  ;;  %v4462_v22 = vld [vmem:[%s5519_s16 + $0x8] sm:$0xff]  }
 0x5c4   :  { %v590_v30 = vadd.s32 %v589_v26, %v587_v28 }
 0x5c5   :  { %vm637_vm11 = vcmp.eq.s32.totalorder %v4746_v21, %v605_v29  ;;  %755 = vst.msk [vmem:[%s5514_s24 + $0x8] sm:$0xff] %vm753_vm10, %v605_v29  ;;  %v631_v32 = vpop.xlane.xlu1 %630  ;;  %v616_v33 = vpop.xlane.xlu0 %615 }
 0x5c6   :  { %754 = vst.msk [vmem:[%s5514_s24] sm:$0xff] %vm753_vm10, %v590_v30  ;;  %v632_v35 = vcvt.f32.s32 %v631_v32  ;;  %v617_v36 = vcvt.f32.s32 %v616_v33  ;;  %vm636_vm12 = vcmp.eq.s32.totalorder %v4746_v21, %v590_v30  ;;  %v3545_v39 = vsel %vm637_vm11, 1.0, %v4497_v37 }
 0x5c7   :  { %v3544_v38 = vsel %vm636_vm12, 1.0, %v4497_v37  ;;  %vm3495_vm11 = vcmp.eq.s32.totalorder %v4746_v21, 1  ;;  %vm3505_vm12 = vcmask 57344  }
 0x5c8   :  { %v635_v40 = vadd.s32 %v634_v31, %v632_v35  ;;  %v620_v41 = vadd.s32 %v619_v34, %v617_v36  ;;  %3927 = vmatprep.mubr.msk.f32.mxu0 %vm123_vm0, %v3544_v38 }
 0x5c9   :  { %3928 = vmatmul.mubr.msk.f32.vlgmr.msra.gmra.mrb[8].mxu0 %vm123_vm0, %v3545_v39  ;;  %v802_v24 = vpop.permute.xlu1 %801 }
 0x5ca   :  { %757 = vst.msk [vmem:[%s5514_s24 + $0x18] sm:$0xff] %vm753_vm10, %v635_v40  ;;  %756 = vst.msk [vmem:[%s5514_s24 + $0x10] sm:$0xff] %vm753_vm10, %v620_v41  ;;  %vm638_vm13 = vcmp.eq.s32.totalorder %v4746_v21, %v620_v41  ;;  %vm639_vm14 = vcmp.eq.s32.totalorder %v4746_v21, %v635_v40  ;;  %3950 = vmatpush3.bf16.msra.mxu0 %v4461_v20 }
 0x5cb   :  { %v3546_v42 = vsel %vm638_vm13, 1.0, %v4497_v37  ;;  %v3547_v43 = vsel %vm639_vm14, 1.0, %v4497_v37  ;;  %3951 = vmatprep.subr.bf16.mxu0 %v4462_v22 }
 0x5cc   :  { %3930 = vmatprep.mubr.msk.f32.mxu0 %vm123_vm0, %v3546_v42 }
 0x5cd   :  { %3931 = vmatmul.mubr.msk.f32.gmra.mrb[10].mxu0 %vm123_vm0, %v3547_v43  ;;  %v807_v25 = vpop.permute.xlu1 %806  ;;  %v797_v33 = vpop.permute.xlu0 %796 }
 0x5ce   :  { %3952 = vmatpush3.bf16.msra.mxu0 %v4462_v22  ;;  %v1176_v22 = vld [vmem:[%s5522_s20 + $0x10] sm:$0xff] }
 0x5cf   :  { %4301 = vmatprep.subr.bf16.mxu0 %v4498_v23 }
 0x5d1   :  { %v812_v36 = vpop.permute.xlu0 %811 }
 0x69c   :  { %v3929_v45 = vpop.f32.mrb[8].mxu0 }
 0x69d   :  { %v759_v46 = vsub.f32 %v3929_v45, %v4725_v60  ;;  %v734_v47 = vpop.f32.mrb[9].mxu0 }
 0x69e   :  { %v758_v48 = vsub.f32 %v734_v47, %v4723_v57  ;;  %v784_v49 = vpack.c.bf16 %v3929_v45, %v734_v47  ;;  %v4459_v57 = vld [vmem:[%s5516_s14] sm:$0xff]  }
 0x69f   :  { %v763_v50 = vmul.f32 %v759_v46, %v759_v46 }
 0x6a0   :  { %v762_v51 = vmul.f32 %v758_v48, %v758_v48  ;;  %v3932_v52 = vpop.f32.mrb[10].mxu0  ;;  %3933 = vmatprep.subr.bf16.mxu1 %v784_v49 }
 0x6a1   :  { %v767_v53 = vsel %vm227_vm1, %v763_v50, 0.0  ;;  %v761_v54 = vsub.f32 %v3932_v52, %v4735_v62  ;;  %v744_v55 = vpop.f32.mrb[11].mxu0  ;;  %3934 = vmatpush3.bf16.msra.mxu1 %v784_v49  ;;  %v3556_v50 = vld [vmem:[%s5520_s15] ss:$0 sm:$0xff] }
 0x6a2   :  { %v766_v56 = vsel %vm227_vm1, %v762_v51, 0.0  ;;  %v760_v58 = vsub.f32 %v744_v55, %v4729_v61  ;;  %v785_v59 = vpack.c.bf16 %v3932_v52, %v744_v55  ;;  %v4460_v61 = vld [vmem:[%s5516_s14 + $0x8] sm:$0xff]  }
 0x6a3   :  { %v768_v60 = vadd.f32 %v767_v53, %v766_v56  ;;  %v765_v63 = vmul.f32 %v761_v54, %v761_v54 }
 0x6a4   :  { %v764_v0 = vmul.f32 %v760_v58, %v760_v58  ;;  %3935 = vmatprep.subr.bf16.mxu1 %v785_v59 }
 0x6a5   :  { %3936 = vmatpush3.bf16.msra.mxu1 %v785_v59  ;;  %v771_v9 = vsel %vm227_vm1, %v765_v63, 0.0 }
 0x6a6   :  { %v769_v62 = vsel %vm227_vm1, %v764_v0, 0.0  ;;  %3941 = vmatprep.subr.bf16.mxu1 %v4459_v57 }
 0x6a7   :  { %v770_v2 = vadd.f32 %v769_v62, %v768_v60 }
 0x6a8   :  { %3938 = vmatmul.mubr.msk.bf16.vlgmr.msra.gmra.mrb[8].mxu1 %vm227_vm1, %v4458_v1 }
 0x6a9   :  { %3942 = vmatpush3.bf16.msra.mxu1 %v4459_v57  ;;  %3945 = vmatprep.mubr.msk.bf16.mxu1 %vm227_vm1, %v784_v49  ;;  %v772_v10 = vadd.f32 %v771_v9, %v770_v2  ;;  %v4953_v9 = vld [vmem:[%s5521_s18] sm:$0x3] }
 0x6aa   :  { %3943 = vmatprep.subr.bf16.mxu1 %v4460_v61 }
 0x6ab   :  { %773 = vadd.xlane.f32.xlu1 %v772_v10 }
 0x6ad   :  { %3944 = vmatpush3.bf16.msra.mxu1 %v4460_v61 }
 0x6ae   :  { %4298 = vmatprep.subr.bf16.mxu1 %v4297_v11 }
 0x6b0   :  { %3946 = vmatmul.mubr.msk.bf16.vlgmr.msra.gmra.mrb[12].mxu1 %vm227_vm1, %v785_v59 }
 0x6b1   :  { %4300 = vmatpush3.bf16.msra.mxu1 %v4297_v11  ;;  %3961 = vmatprep.mubr.msk.f32.mxu1 %vm1071_vm15, %v1065_v13  ;;  %v1175_v11 = vld [vmem:[%s5522_s20 + $0x8] sm:$0xff] }
 0x6b2   :  { %4307 = vmatprep.subr.bf16.mxu1 %v4498_v23 }
 0x6b8   :  { %3962 = vmatmul.mubr.msk.f32.vlgmr.msra.gmra.mrb[16].mxu1 %vm1071_vm15, %v1066_v16 }
 0x6b9   :  { %3964 = vmatprep.mubr.msk.f32.mxu1 %vm1071_vm15, %v5536_v17 }
 0x6bc   :  { %3965 = vmatmul.mubr.msk.f32.gmra.mrb[18].mxu1 %vm1071_vm15, %v5535_v19 }
 0x6bd   :  { %3994 = vmatprep.mubr.msk.f32.mxu1 %vm4499_vm2, %v4497_v37 }
 0x738   :  { %v774_v26 = vpop.xlane.xlu1 %773 }
 0x739   :  { %v775_v27 = vrot.slane %v774_v26, 4 }
 0x73b   :  { %v776_v28 = vadd.f32 %v775_v27, %v774_v26  ;;  %v1178_v26 = vld [vmem:[%s5522_s20 + $0x20] sm:$0xff]  ;;  %v1179_v27 = vld [vmem:[%s5522_s20 + $0x28] sm:$0xff] }
 0x73d   :  { %v777_v29 = vrot.slane %v776_v28, 2 }
 0x73f   :  { %v778_v30 = vadd.f32 %v777_v29, %v776_v28  ;;  %v4995_v28 = vpack.c.bf16 %v1179_v27, %v1178_v26  ;;  %v1180_v29 = vld [vmem:[%s5522_s20 + $0x30] sm:$0xff]  ;;  %v5094_v26 = vld [vmem:[%s5524_s19 + $0x18] sm:$0xff] }
 0x741   :  { %v779_v31 = vrot.slane %v778_v30, 1 }
 0x743   :  { %v780_v32 = vadd.f32 %v779_v31, %v778_v30  ;;  %v1181_v30 = vld [vmem:[%s5522_s20 + $0x38] sm:$0xff] }
 0x744   :  { %v5007_v31 = vpack.c.bf16 %v1181_v30, %v1180_v29 }
 0x745   :  { %4431 = vpush %v780_v32  ;;  %v3561_v32 = vld [vmem:[%s5523_s17] ss:$0 sm:$0xff] }
 0x776   :  { %s4432_s26 = spop %4431 }
 0x77b   :  { %v3939_v34 = vpop.f32.mrb[8].mxu1 }
 0x77c   :  { %v864_v35 = vpop.f32.mrb[9].mxu1  ;;  %v873_v39 = vadd.f32 %v3939_v34, %v807_v25 }
 0x77d   :  { %v3940_v38 = vpop.f32.mrb[10].mxu1  ;;  %v865_v42 = vadd.f32 %v864_v35, %v797_v33 }
 0x77e   :  { %v876_v40 = vadd.f32 %v3940_v38, %v812_v36  ;;  %v867_v41 = vpop.f32.mrb[11].mxu1 }
 0x77f   :  { %v868_v43 = vadd.f32 %v867_v41, %v802_v24  ;;  %v1177_v24 = vld [vmem:[%s5522_s20 + $0x18] sm:$0xff] }
 0x780   :  { %v958_v44 = vpack.c.bf16 %v876_v40, %v873_v39  ;;  %v4986_v25 = vpack.c.bf16 %v1177_v24, %v1176_v22  ;;  %v5076_v22 = vld [vmem:[%s5525_s21] sm:$0xf]  ;;  %v5082_v24 = vld [vmem:[%s5524_s19 + $0x10] sm:$0xff] }
 0x781   :  { %v957_v45 = vpack.c.bf16 %v868_v43, %v865_v42 }
 0x783   :  { %v3947_v46 = vpop.f32.mrb[12].mxu1  ;;  %3953 = vmatprep.mubr.msk.bf16.mxu0 %vm227_vm1, %v957_v45 }
 0x784   :  { %v942_v47 = vpop.f32.mrb[13].mxu1  ;;  %3954 = vmatmul.mubr.msk.bf16.vlgmr.msra.gmra.mrb[12].mxu0 %vm227_vm1, %v958_v44  ;;  %v4927_v63 = vadd.f32 %v3947_v46, %v3556_v50 }
 0x785   :  { %v3948_v48 = vpop.f32.mrb[14].mxu1  ;;  %3975 = vmatprep.mubr.msk.f32.mxu0 %vm4499_vm2, %v4497_v37  ;;  %v4905_v52 = vadd.f32 %v3556_v50, %v942_v47 }
 0x786   :  { %v945_v49 = vpop.f32.mrb[15].mxu1  ;;  %v4925_v60 = vadd.f32 %v3948_v48, %v3556_v50 }
 0x787   :  { %v4903_v51 = vadd.f32 %v3556_v50, %v945_v49 }
 0x78b   :  { %v4907_v53 = vpop.f32.mrb[16].mxu1 }
 0x78c   :  { %v4909_v54 = vpop.f32.mrb[17].mxu1  ;;  %v1333_v55 = vmul.f32 %v4907_v53, %v4648_v4  ;;  %v4915_v56 = vmul.f32 %v4907_v53, %v4903_v51  ;;  %vm1929_vm8 = vcmp.gt.f32.partialorder %v4907_v53, 0.0 }
 0x78d   :  { %v4302_v58 = vpack.c.bf16 %v4907_v53, %v4909_v54  ;;  %v1332_v59 = vmul.f32 %v4909_v54, %v4643_v3  ;;  %v4923_v57 = vmul.f32 %v4909_v54, %v4905_v52  ;;  %vm1928_vm7 = vcmp.gt.f32.partialorder %v4909_v54, 0.0 }
 0x78f   :  { %v4929_v0 = vpop.f32.mrb[18].mxu1  ;;  %4303 = vmatpush3.bf16.msra.mxu0 %v4302_v58  ;;  %v4320_v4 = vpack.c.bf16 %v1333_v55, %v1332_v59  ;;  %v4356_v1 = vpack.c.bf16 %v4915_v56, %v4923_v57  ;;  %v5061_v58 = vld [vmem:[%s5524_s19] sm:$0xff] }
 0x790   :  { %v4933_v62 = vpop.f32.mrb[19].mxu1  ;;  %4304 = vmatprep.subr.bf16.mxu0 %v4498_v23  ;;  %v1335_v3 = vmul.f32 %v4929_v0, %v4664_v8  ;;  %v4940_v61 = vmul.f32 %v4929_v0, %v4925_v60  ;;  %vm1931_vm10 = vcmp.gt.f32.partialorder %v4929_v0, 0.0 }
 0x791   :  { %v4305_v2 = vpack.c.bf16 %v4929_v0, %v4933_v62  ;;  %v1334_v5 = vmul.f32 %v4933_v62, %v4659_v7  ;;  %v4948_v6 = vmul.f32 %v4933_v62, %v4927_v63  ;;  %v1174_v7 = vld [vmem:[%s5522_s20] sm:$0xff]  ;;  %vm1930_vm9 = vcmp.gt.f32.partialorder %v4933_v62, 0.0 }
 0x792   :  { %v4974_v20 = vpack.c.bf16 %v1175_v11, %v1174_v7  ;;  %v5071_v11 = vld [vmem:[%s5524_s19 + $0x8] sm:$0xff] }
 0x793   :  { %4306 = vmatpush3.bf16.msra.mxu0 %v4305_v2  ;;  %v4323_v8 = vpack.c.bf16 %v1335_v3, %v1334_v5  ;;  %v4359_v10 = vpack.c.bf16 %v4940_v61, %v4948_v6 }
 0x794   :  { %4319 = vmatprep.subr.bf16.mxu0 %v4498_v23  ;;  %4309 = vmatpush3.bf16.msra.mxu1 %v4974_v20 }
 0x795   :  { %4310 = vmatprep.subr.bf16.mxu1 %v4498_v23 }
 0x796   :  { %3976 = vmatmul.mubr.msk.f32.vlgmr.msra.gmra.mrb[16].mxu0 %vm227_vm1, %v4953_v9 }
 0x797   :  { %4321 = vmatpush3.bf16.msra.mxu0 %v4320_v4  ;;  %4005 = vmatprep.mubr.msk.f32.mxu0 %vm4499_vm2, %v4497_v37 }
 0x798   :  { %4322 = vmatprep.subr.bf16.mxu0 %v4498_v23  ;;  %4312 = vmatpush3.bf16.msra.mxu1 %v4986_v25 }
 0x799   :  { %4313 = vmatprep.subr.bf16.mxu1 %v4498_v23 }
 0x79b   :  { %4324 = vmatpush3.bf16.msra.mxu0 %v4323_v8 }
 0x79c   :  { %4325 = vmatprep.subr.bf16.mxu0 %v4498_v23  ;;  %4315 = vmatpush3.bf16.msra.mxu1 %v4995_v28 }
 0x79d   :  { %4316 = vmatprep.subr.bf16.mxu1 %v4498_v23 }
 0x79e   :  { %4006 = vmatmul.mubr.msk.f32.vlgmr.msra.gmra.mrb[18].mxu0 %vm227_vm1, %v4953_v9 }
 0x79f   :  { %4024 = vmatprep.mubr.msk.f32.mxu0 %vm4499_vm2, %v4497_v37  ;;  %4327 = vmatpush3.bf16.msra.mxu0 %v4974_v20 }
 0x7a0   :  { %4328 = vmatprep.subr.bf16.mxu0 %v4498_v23  ;;  %4318 = vmatpush3.bf16.msra.mxu1 %v5007_v31 }
 0x7a3   :  { %4330 = vmatpush3.bf16.msra.mxu0 %v4986_v25 }
 0x7a4   :  { %4331 = vmatprep.subr.bf16.mxu0 %v4498_v23 }
 0x7a7   :  { %4333 = vmatpush3.bf16.msra.mxu0 %v4995_v28 }
 0x7a8   :  { %4334 = vmatprep.subr.bf16.mxu0 %v4498_v23 }
 0x7ab   :  { %4336 = vmatpush3.bf16.msra.mxu0 %v5007_v31 }
 0x7ac   :  { %4343 = vmatprep.subr.bf16.mxu0 %v4498_v23 }
 0x857   :  { %v3955_v33 = vpop.f32.mrb[12].mxu0 }
 0x858   :  { %v5018_v34 = vadd.f32 %v3955_v33, %v3561_v32  ;;  %v1022_v35 = vpop.f32.mrb[13].mxu0 }
 0x859   :  { %v5020_v36 = vadd.f32 %v3561_v32, %v1022_v35  ;;  %v3956_v38 = vpop.f32.mrb[14].mxu0  ;;  %v5110_v35 = vld [vmem:[%s5548_s27 + $0x8] sm:$0xff] }
 0x85a   :  { %v5022_v39 = vadd.f32 %v3956_v38, %v3561_v32  ;;  %v1025_v40 = vpop.f32.mrb[15].mxu0  ;;  %v5028_v42 = vmul.f32 %v4933_v62, %v5018_v34 }
 0x85b   :  { %v5024_v41 = vadd.f32 %v3561_v32, %v1025_v40  ;;  %v5036_v44 = vmul.f32 %v4909_v54, %v5020_v36 }
 0x85c   :  { %v5032_v43 = vmul.f32 %v4929_v0, %v5022_v39 }
 0x85d   :  { %v5040_v45 = vmul.f32 %v4907_v53, %v5024_v41 }
 0x85e   :  { %v4395_v46 = vpack.c.bf16 %v5032_v43, %v5028_v42 }
 0x85f   :  { %v4392_v47 = vpack.c.bf16 %v5040_v45, %v5036_v44 }
 0x869   :  { %v1252_v48 = vpop.f32.mrb[16].mxu0 }
 0x86a   :  { %v3977_v49 = vpop.f32.mrb[17].mxu0  ;;  %3995 = vmatmul.mubr.msk.f32.vlgmr.msra.gmra.mrb[20].mxu1 %vm123_vm0, %v1252_v48  ;;  %v5118_v48 = vld [vmem:[%s5548_s27] sm:$0xff] }
 0x86b   :  { %4029 = vmatprep.mubr.msk.f32.mxu1 %vm1480_vm3, %v5061_v58 }
 0x871   :  { %v1402_v50 = vpop.f32.mrb[18].mxu0 }
 0x872   :  { %v4007_v55 = vpop.f32.mrb[19].mxu0  ;;  %4025 = vmatmul.mubr.msk.f32.vlgmr.msra.gmra.mrb[20].mxu0 %vm123_vm0, %v1402_v50 }
 0x873   :  { %4345 = vmatpush3.bf16.msra.mxu0 %v4974_v20  ;;  %4070 = vmatprep.mubr.msk.f32.mxu0 %vm4499_vm2, %v4497_v37 }
 0x874   :  { %4346 = vmatprep.subr.bf16.mxu0 %v4498_v23 }
 0x877   :  { %4348 = vmatpush3.bf16.msra.mxu0 %v4986_v25 }
 0x878   :  { %4349 = vmatprep.subr.bf16.mxu0 %v4498_v23 }
 0x87b   :  { %4351 = vmatpush3.bf16.msra.mxu0 %v4995_v28 }
 0x87c   :  { %4352 = vmatprep.subr.bf16.mxu0 %v4498_v23 }
 0x87f   :  { %4354 = vmatpush3.bf16.msra.mxu0 %v5007_v31 }
 0x880   :  { %4355 = vmatprep.subr.bf16.mxu0 %v4498_v23 }
 0x93d   :  { %v1325_v59 = vpop.f32.mrb[20].mxu1 }
 0x93e   :  { %v1329_v4 = vmax.f32 %v1325_v59, 1.0  ;;  %v3996_v3 = vpop.f32.mrb[21].mxu1 }
 0x93f   :  { %v5131_v3 = vld [vmem:[%s5548_s27 + $0x18] sm:$0xff] }
 0x940   :  { %4463 = vrcp.f32 %v1329_v4 }
 0x945   :  { %v1475_v2 = vpop.f32.mrb[20].mxu0 }
 0x946   :  { %v4026_v5 = vpop.f32.mrb[21].mxu0 }
 0x94a   :  { %v5065_v8 = vpop.eup %4463 }
 0x94b   :  { %v1479_v7 = vmul.f32 %v5065_v8, %v1475_v2 }
 0x94d   :  { %4027 = vmatprep.subr.msk.mxu1 %vm1493_vm4, %v1479_v7 }
 0x94e   :  { %4028 = vmatpush3.msk.msra.mxu1 %vm1493_vm4, %v1479_v7 }
 0x94f   :  { %4030 = vmatmul.mubr.msk.f32.vlgmr.msra.gmra.mrb[22].mxu1 %vm1480_vm3, %v5071_v11  ;;  %4035 = vmatprep.subr.msk.mxu1 %vm1595_vm5, %v5076_v22 }
 0x950   :  { %4032 = vmatprep.mubr.msk.f32.mxu1 %vm1480_vm3, %v5082_v24  ;;  %4036 = vmatpush3.msk.msra.mxu1 %vm1595_vm5, %v5076_v22 }
 0x951   :  { %4337 = vmatprep.subr.bf16.mxu1 %v4498_v23 }
 0x953   :  { %4033 = vmatmul.mubr.msk.f32.gmra.mrb[24].mxu1 %vm1480_vm3, %v5094_v26 }
 0xa22   :  { %v4031_v27 = vpop.f32.mrb[22].mxu1 }
 0xa23   :  { %v1563_v29 = vpop.f32.mrb[23].mxu1 }
 0xa24   :  { %4037 = vmatprep.mubr.msk.f32.mxu1 %vm1582_vm6, %v1563_v29 }
 0xa25   :  { %4038 = vmatmul.mubr.msk.f32.vlgmr.msra.gmra.mrb[26].mxu1 %vm1582_vm6, %v4031_v27  ;;  %v5140_v27 = vld [vmem:[%s5548_s27 + $0x10] sm:$0xff]  ;;  %s4500_s27 = smov 64  }
 0xa26   :  { %v4034_v30 = vpop.f32.mrb[24].mxu1 }
 0xa27   :  { %v1573_v32 = vpop.f32.mrb[25].mxu1 }
 0xa28   :  { %4040 = vmatprep.mubr.msk.f32.mxu1 %vm1582_vm6, %v1573_v32 }
 0xa29   :  { %4041 = vmatmul.mubr.msk.f32.gmra.mrb[28].mxu1 %vm1582_vm6, %v4034_v30 }
 0xa2a   :  { %4051 = vmatprep.mubr.msk.f32.mxu1 %vm4499_vm2, %v4497_v37 }
 0xaf8   :  { %v4039_v33 = vpop.f32.mrb[26].mxu1 }
 0xaf9   :  { %v5113_v38 = vsub.f32 %v5110_v35, %v4039_v33  ;;  %v1665_v40 = vpop.f32.mrb[27].mxu1 }
 0xafa   :  { %v5121_v49 = vsub.f32 %v5118_v48, %v1665_v40 }
 0xafb   :  { %v1689_v50 = vmul.f32 %v5113_v38, %v5113_v38 }
 0xafc   :  { %v1688_v55 = vmul.f32 %v5121_v49, %v5121_v49  ;;  %v4042_v59 = vpop.f32.mrb[28].mxu1 }
 0xafd   :  { %v1693_v4 = vmul.f32 %v4907_v53, %v1689_v50  ;;  %v5134_v2 = vsub.f32 %v5131_v3, %v4042_v59  ;;  %v1675_v5 = vpop.f32.mrb[29].mxu1 }
 0xafe   :  { %v1692_v7 = vmul.f32 %v1688_v55, %v4909_v54  ;;  %v5143_v29 = vsub.f32 %v5140_v27, %v1675_v5 }
 0xaff   :  { %v1691_v30 = vmul.f32 %v5134_v2, %v5134_v2 }
 0xb00   :  { %v4338_v32 = vpack.c.bf16 %v1693_v4, %v1692_v7  ;;  %v1690_v33 = vmul.f32 %v5143_v29, %v5143_v29 }
 0xb01   :  { %v1695_v40 = vmul.f32 %v4929_v0, %v1691_v30 }
 0xb02   :  { %v1694_v50 = vmul.f32 %v1690_v33, %v4933_v62  ;;  %4339 = vmatpush3.bf16.msra.mxu1 %v4338_v32 }
 0xb03   :  { %4340 = vmatprep.subr.bf16.mxu1 %v4498_v23 }
 0xb04   :  { %v4341_v55 = vpack.c.bf16 %v1695_v40, %v1694_v50 }
 0xb06   :  { %4342 = vmatpush3.bf16.msra.mxu1 %v4341_v55 }
 0xb09   :  { %4052 = vmatmul.mubr.msk.f32.vlgmr.msra.gmra.mrb[30].mxu1 %vm227_vm1, %v4953_v9 }
 0xb0a   :  { %4075 = vmatprep.mubr.msk.f32.mxu1 %vm1480_vm3, %v5061_v58 }
 0xbdc   :  { %v1762_v59 = vpop.f32.mrb[30].mxu1 }
 0xbdd   :  { %v4053_v4 = vpop.f32.mrb[31].mxu1  ;;  %4071 = vmatmul.mubr.msk.f32.vlgmr.msra.gmra.mrb[22].mxu0 %vm123_vm0, %v1762_v59 }
 0xbde   :  { %4357 = vmatpush3.bf16.msra.mxu0 %v4356_v1  ;;  %4097 = vmatprep.mubr.msk.f32.mxu0 %vm4499_vm2, %v4497_v37 }
 0xbdf   :  { %4358 = vmatprep.subr.bf16.mxu0 %v4498_v23 }
 0xbe2   :  { %4360 = vmatpush3.bf16.msra.mxu0 %v4359_v10 }
 0xbe5   :  { %4098 = vmatmul.mubr.msk.f32.vlgmr.msra.gmra.mrb[24].mxu0 %vm227_vm1, %v4953_v9 }
 0xbe6   :  { %4121 = vmatprep.mubr.msk.f32.mxu0 %vm1480_vm3, %v5061_v58 }
 0xcb0   :  { %v1835_v5 = vpop.f32.mrb[22].mxu0 }
 0xcb1   :  { %v1839_v7 = vmul.f32 %v5065_v8, %v1835_v5  ;;  %v4072_v56 = vpop.f32.mrb[23].mxu0 }
 0xcb3   :  { %4073 = vmatprep.subr.msk.mxu1 %vm1493_vm4, %v1839_v7 }
 0xcb4   :  { %4074 = vmatpush3.msk.msra.mxu1 %vm1493_vm4, %v1839_v7 }
 0xcb5   :  { %4076 = vmatmul.mubr.msk.f32.vlgmr.msra.gmra.mrb[32].mxu1 %vm1480_vm3, %v5071_v11  ;;  %4081 = vmatprep.subr.msk.mxu1 %vm1595_vm5, %v5076_v22 }
 0xcb6   :  { %4078 = vmatprep.mubr.msk.f32.mxu1 %vm1480_vm3, %v5082_v24  ;;  %4082 = vmatpush3.msk.msra.mxu1 %vm1595_vm5, %v5076_v22 }
 0xcb7   :  { %4361 = vmatprep.subr.bf16.mxu1 %v4498_v23 }
 0xcb8   :  { %v2111_v57 = vpop.f32.mrb[24].mxu0 }
 0xcb9   :  { %4079 = vmatmul.mubr.msk.f32.gmra.mrb[34].mxu1 %vm1480_vm3, %v5094_v26  ;;  %v4099_v1 = vpop.f32.mrb[25].mxu0 }
 0xd88   :  { %v4077_v61 = vpop.f32.mrb[32].mxu1 }
 0xd89   :  { %v1909_v6 = vpop.f32.mrb[33].mxu1 }
 0xd8a   :  { %4083 = vmatprep.mubr.msk.f32.mxu1 %vm1582_vm6, %v1909_v6 }
 0xd8b   :  { %4084 = vmatmul.mubr.msk.f32.vlgmr.msra.gmra.mrb[36].mxu1 %vm1582_vm6, %v4077_v61 }
 0xd8c   :  { %4363 = vmatpush3.bf16.msra.mxu1 %v4974_v20  ;;  %v4080_v10 = vpop.f32.mrb[34].mxu1 }
 0xd8d   :  { %v1919_v30 = vpop.f32.mrb[35].mxu1  ;;  %4364 = vmatprep.subr.bf16.mxu1 %v4498_v23 }
 0xd8e   :  { %4086 = vmatprep.mubr.msk.f32.mxu1 %vm1582_vm6, %v1919_v30 }
 0xd8f   :  { %4087 = vmatmul.mubr.msk.f32.gmra.mrb[38].mxu1 %vm1582_vm6, %v4080_v10 }
 0xd90   :  { %4366 = vmatpush3.bf16.msra.mxu1 %v4986_v25  ;;  %4116 = vmatprep.mubr.msk.f32.mxu1 %vm4499_vm2, %v4497_v37 }
 0xd91   :  { %4367 = vmatprep.subr.bf16.mxu1 %v4498_v23 }
 0xd94   :  { %4369 = vmatpush3.bf16.msra.mxu1 %v4995_v28 }
 0xd95   :  { %4370 = vmatprep.subr.bf16.mxu1 %v4498_v23 }
 0xd98   :  { %4372 = vmatpush3.bf16.msra.mxu1 %v5007_v31 }
 0xd99   :  { %4373 = vmatprep.subr.bf16.mxu1 %v4498_v23 }
 0xd9b   :  { %4117 = vmatmul.mubr.msk.f32.vlgmr.msra.gmra.mrb[40].mxu1 %vm123_vm0, %v2111_v57 }
 0xd9c   :  { %4143 = vmatprep.mubr.msk.f32.mxu1 %vm4499_vm2, %v4497_v37 }
 0xe5e   :  { %v5201_v32 = vpop.f32.mrb[36].mxu1 }
 0xe5f   :  { %v5203_v33 = vpop.f32.mrb[37].mxu1  ;;  %v2016_v12 = vadd.f32 1e-06, %v5201_v32 }
 0xe61   :  { %4465 = vrsqrt.f32 %v2016_v12 }
 0xe62   :  { %v5205_v40 = vpop.f32.mrb[38].mxu1 }
 0xe63   :  { %v5207_v50 = vpop.f32.mrb[39].mxu1  ;;  %v2026_v14 = vadd.f32 1e-06, %v5205_v40 }
 0xe6e   :  { %v2184_v55 = vpop.f32.mrb[40].mxu1 }
 0xe6f   :  { %v2188_v59 = vmul.f32 %v5065_v8, %v2184_v55  ;;  %v4118_v4 = vpop.f32.mrb[41].mxu1 }
 0xe71   :  { %4119 = vmatprep.subr.msk.mxu0 %vm1493_vm4, %v2188_v59 }
 0xe72   :  { %4120 = vmatpush3.msk.msra.mxu0 %vm1493_vm4, %v2188_v59 }
 0xe73   :  { %4122 = vmatmul.mubr.msk.f32.vlgmr.msra.gmra.mrb[26].mxu0 %vm1480_vm3, %v5071_v11  ;;  %4127 = vmatprep.subr.msk.mxu0 %vm1595_vm5, %v5076_v22 }
 0xe74   :  { %4124 = vmatprep.mubr.msk.f32.mxu0 %vm1480_vm3, %v5082_v24  ;;  %4128 = vmatpush3.msk.msra.mxu0 %vm1595_vm5, %v5076_v22 }
 0xe75   :  { %4379 = vmatprep.subr.bf16.mxu0 %v4498_v23 }
 0xe77   :  { %4125 = vmatmul.mubr.msk.f32.gmra.mrb[28].mxu0 %vm1480_vm3, %v5094_v26 }
 0xf46   :  { %v4123_v5 = vpop.f32.mrb[26].mxu0 }
 0xf47   :  { %v2258_v7 = vpop.f32.mrb[27].mxu0 }
 0xf48   :  { %4129 = vmatprep.mubr.msk.f32.mxu0 %vm1582_vm6, %v2258_v7 }
 0xf49   :  { %4130 = vmatmul.mubr.msk.f32.vlgmr.msra.gmra.mrb[30].mxu0 %vm1582_vm6, %v4123_v5 }
 0xf4a   :  { %v4126_v56 = vpop.f32.mrb[28].mxu0  ;;  %4381 = vmatpush3.bf16.msra.mxu0 %v4974_v20 }
 0xf4b   :  { %v2268_v57 = vpop.f32.mrb[29].mxu0  ;;  %4382 = vmatprep.subr.bf16.mxu0 %v4498_v23 }
 0xf4c   :  { %4132 = vmatprep.mubr.msk.f32.mxu0 %vm1582_vm6, %v2268_v57 }
 0xf4d   :  { %4133 = vmatmul.mubr.msk.f32.gmra.mrb[32].mxu0 %vm1582_vm6, %v4126_v56 }
 0xf4e   :  { %4384 = vmatpush3.bf16.msra.mxu0 %v4986_v25  ;;  %4162 = vmatprep.mubr.msk.f32.mxu0 %vm4499_vm2, %v4497_v37 }
 0xf4f   :  { %4385 = vmatprep.subr.bf16.mxu0 %v4498_v23 }
 0xf52   :  { %4387 = vmatpush3.bf16.msra.mxu0 %v4995_v28 }
 0xf53   :  { %4388 = vmatprep.subr.bf16.mxu0 %v4498_v23 }
 0xf56   :  { %4390 = vmatpush3.bf16.msra.mxu0 %v5007_v31 }
 0xf57   :  { %4391 = vmatprep.subr.bf16.mxu0 %v4498_v23 }
0x101c   :  { %v4131_v1 = vpop.f32.mrb[30].mxu0 }
0x101d   :  { %v5238_v61 = vsub.f32 %v4903_v51, %v4131_v1  ;;  %v2355_v6 = vpop.f32.mrb[31].mxu0 }
0x101e   :  { %v5241_v10 = vsub.f32 %v4905_v52, %v2355_v6 }
0x101f   :  { %v2379_v30 = vmul.f32 %v5238_v61, %v5238_v61 }
0x1020   :  { %v2378_v55 = vmul.f32 %v5241_v10, %v5241_v10  ;;  %v4134_v59 = vpop.f32.mrb[32].mxu0 }
0x1021   :  { %v2383_v4 = vmul.f32 %v4907_v53, %v2379_v30  ;;  %v5249_v5 = vsub.f32 %v4925_v60, %v4134_v59  ;;  %v2365_v7 = vpop.f32.mrb[33].mxu0 }
0x1022   :  { %v2382_v56 = vmul.f32 %v2378_v55, %v4909_v54  ;;  %v5253_v57 = vsub.f32 %v4927_v63, %v2365_v7 }
0x1023   :  { %v2381_v1 = vmul.f32 %v5249_v5, %v5249_v5 }
0x1024   :  { %v4374_v6 = vpack.c.bf16 %v2383_v4, %v2382_v56  ;;  %v2380_v19 = vmul.f32 %v5253_v57, %v5253_v57  ;;  %v3413_v56 = vsel %vm1071_vm15, %v1065_v13, 0.0  ;;  %v2011_v13 = vadd.f32 1e-06, %v5203_v33  ;;  %v4466_v33 = vpop.eup %4465 }
0x1025   :  { %v2385_v17 = vmul.f32 %v4929_v0, %v2381_v1  ;;  %v3414_v1 = vsel %vm1071_vm15, %v1066_v16, 0.0  ;;  %v2021_v16 = vadd.f32 1e-06, %v5207_v50 }
0x1026   :  { %v2384_v30 = vmul.f32 %v2380_v19, %v4933_v62  ;;  %4375 = vmatpush3.bf16.msra.mxu1 %v4374_v6  ;;  %v3415_v6 = vadd.f32 %v3414_v1, %v3413_v56  ;;  %4467 = vrsqrt.f32 %v2011_v13 }
0x1027   :  { %4376 = vmatprep.subr.bf16.mxu1 %v4498_v23  ;;  %4469 = vrsqrt.f32 %v2026_v14 }
0x1028   :  { %v4377_v59 = vpack.c.bf16 %v2385_v17, %v2384_v30  ;;  %v5557_v30 = vsub.f32 1.0, %v4867_v15  ;;  %4471 = vrsqrt.f32 %v2021_v16 }
0x102a   :  { %4378 = vmatpush3.bf16.msra.mxu1 %v4377_v59  ;;  %v3416_v59 = vsel %vm1071_vm15, %v5557_v30, 0.0 }
0x102d   :  { %4144 = vmatmul.mubr.msk.f32.vlgmr.msra.gmra.mrb[42].mxu1 %vm227_vm1, %v4953_v9 }
0x102e   :  { %4167 = vmatprep.mubr.msk.f32.mxu1 %vm1480_vm3, %v5061_v58 }
0x1030   :  { %v4468_v40 = vpop.eup %4467 }
0x1031   :  { %v2033_v1 = vmul.f32 %v4468_v40, %v5121_v49 }
0x1100   :  { %v2452_v55 = vpop.f32.mrb[42].mxu1 }
0x1101   :  { %v4145_v4 = vpop.f32.mrb[43].mxu1  ;;  %4163 = vmatmul.mubr.msk.f32.vlgmr.msra.gmra.mrb[34].mxu0 %vm123_vm0, %v2452_v55  ;;  %v3417_v55 = vadd.f32 %v3416_v59, %v3415_v6 }
0x1102   :  { %4393 = vmatpush3.bf16.msra.mxu0 %v4392_v47  ;;  %4189 = vmatprep.mubr.msk.f32.mxu0 %vm4499_vm2, %v4497_v37  ;;  %v5558_v4 = vsub.f32 1.0, %v4874_v18 }
0x1103   :  { %4394 = vmatprep.subr.bf16.mxu0 %v4498_v23 }
0x1106   :  { %4396 = vmatpush3.bf16.msra.mxu0 %v4395_v46 }
0x1109   :  { %4190 = vmatmul.mubr.msk.f32.vlgmr.msra.gmra.mrb[36].mxu0 %vm227_vm1, %v4953_v9 }
0x110a   :  { %4213 = vmatprep.mubr.msk.f32.mxu0 %vm1480_vm3, %v5061_v58 }
0x11d4   :  { %v2525_v17 = vpop.f32.mrb[34].mxu0 }
0x11d5   :  { %v2529_v19 = vmul.f32 %v5065_v8, %v2525_v17  ;;  %v4164_v44 = vpop.f32.mrb[35].mxu0  ;;  %v3418_v17 = vsel %vm1071_vm15, %v5558_v4, 0.0 }
0x11d7   :  { %4165 = vmatprep.subr.msk.mxu1 %vm1493_vm4, %v2529_v19 }
0x11d8   :  { %4166 = vmatpush3.msk.msra.mxu1 %vm1493_vm4, %v2529_v19  ;;  %v3419_v19 = vadd.f32 %v3418_v17, %v3417_v55 }
0x11d9   :  { %4168 = vmatmul.mubr.msk.f32.vlgmr.msra.gmra.mrb[44].mxu1 %vm1480_vm3, %v5071_v11  ;;  %4173 = vmatprep.subr.msk.mxu1 %vm1595_vm5, %v5076_v22 }
0x11da   :  { %4170 = vmatprep.mubr.msk.f32.mxu1 %vm1480_vm3, %v5082_v24  ;;  %4174 = vmatpush3.msk.msra.mxu1 %vm1595_vm5, %v5076_v22 }
0x11db   :  { %4397 = vmatprep.subr.bf16.mxu1 %v4498_v23  ;;  %3420 = vadd.xlane.f32.xlu0 %v3419_v19 }
0x11dc   :  { %v2797_v42 = vpop.f32.mrb[36].mxu0 }
0x11dd   :  { %4171 = vmatmul.mubr.msk.f32.gmra.mrb[46].mxu1 %vm1480_vm3, %v5094_v26  ;;  %v4191_v43 = vpop.f32.mrb[37].mxu0 }
0x12ac   :  { %v4169_v45 = vpop.f32.mrb[44].mxu1 }
0x12ad   :  { %v2599_v46 = vpop.f32.mrb[45].mxu1 }
0x12ae   :  { %4175 = vmatprep.mubr.msk.f32.mxu1 %vm1582_vm6, %v2599_v46 }
0x12af   :  { %4176 = vmatmul.mubr.msk.f32.vlgmr.msra.gmra.mrb[48].mxu1 %vm1582_vm6, %v4169_v45 }
0x12b0   :  { %4399 = vmatpush3.bf16.msra.mxu1 %v4974_v20  ;;  %v4172_v47 = vpop.f32.mrb[46].mxu1 }
0x12b1   :  { %v2609_v7 = vpop.f32.mrb[47].mxu1  ;;  %4400 = vmatprep.subr.bf16.mxu1 %v4498_v23 }
0x12b2   :  { %4178 = vmatprep.mubr.msk.f32.mxu1 %vm1582_vm6, %v2609_v7  ;;  %v2034_v7 = vmul.f32 %v4466_v33, %v5113_v38 }
0x12b3   :  { %4179 = vmatmul.mubr.msk.f32.gmra.mrb[50].mxu1 %vm1582_vm6, %v4172_v47  ;;  %v4470_v47 = vpop.eup %4469 }
0x12b4   :  { %4402 = vmatpush3.bf16.msra.mxu1 %v4986_v25  ;;  %4208 = vmatprep.mubr.msk.f32.mxu1 %vm4499_vm2, %v4497_v37  ;;  %v4472_v50 = vpop.eup %4471  ;;  %v2036_v55 = vmul.f32 %v4470_v47, %v5134_v2  ;;  %v5338_v38 = vsel %vm1929_vm8, %v2034_v7, %v5110_v35  ;;  %v5347_v2 = vsel %vm1928_vm7, %v2033_v1, %v5118_v48 }
0x12b5   :  { %4403 = vmatprep.subr.bf16.mxu1 %v4498_v23  ;;  %v2035_v4 = vmul.f32 %v4472_v50, %v5143_v29 }
0x12b8   :  { %4405 = vmatpush3.bf16.msra.mxu1 %v4995_v28 }
0x12b9   :  { %4406 = vmatprep.subr.bf16.mxu1 %v4498_v23 }
0x12bc   :  { %4408 = vmatpush3.bf16.msra.mxu1 %v5007_v31 }
0x12bd   :  { %4409 = vmatprep.subr.bf16.mxu1 %v4498_v23 }
0x12bf   :  { %4209 = vmatmul.mubr.msk.f32.vlgmr.msra.gmra.mrb[52].mxu1 %vm123_vm0, %v2797_v42 }
0x12c0   :  { %4235 = vmatprep.mubr.msk.f32.mxu1 %vm4499_vm2, %v4497_v37 }
0x1382   :  { %v4177_v15 = vpop.f32.mrb[48].mxu1 }
0x1383   :  { %v2702_v44 = vadd.f32 1e-06, %v4177_v15  ;;  %v2696_v42 = vpop.f32.mrb[49].mxu1  ;;  %v5364_v15 = vsel %vm1930_vm9, %v2035_v4, %v5140_v27 }
0x1384   :  { %v2697_v18 = vadd.f32 1e-06, %v2696_v42 }
0x1385   :  { %4473 = vrsqrt.f32 %v2702_v44 }
0x1386   :  { %4475 = vrsqrt.f32 %v2697_v18  ;;  %v4180_v43 = vpop.f32.mrb[50].mxu1 }
0x1387   :  { %v2712_v45 = vadd.f32 1e-06, %v4180_v43  ;;  %v2706_v46 = vpop.f32.mrb[51].mxu1 }
0x1388   :  { %v2707_v32 = vadd.f32 1e-06, %v2706_v46 }
0x1389   :  { %4477 = vrsqrt.f32 %v2712_v45 }
0x138a   :  { %4479 = vrsqrt.f32 %v2707_v32 }
0x138f   :  { %v4474_v56 = vpop.eup %4473 }
0x1390   :  { %v4476_v6 = vpop.eup %4475  ;;  %v2720_v30 = vmul.f32 %v4474_v56, %v5238_v61 }
0x1391   :  { %v2719_v59 = vmul.f32 %v4476_v6, %v5241_v10 }
0x1392   :  { %v2870_v17 = vpop.f32.mrb[52].mxu1  ;;  %v2724_v49 = vsel %vm1929_vm8, %v2720_v30, %v4903_v51  ;;  %v3421_v30 = vpop.xlane.xlu0 %3420 }
0x1393   :  { %v4478_v61 = vpop.eup %4477  ;;  %v2874_v10 = vmul.f32 %v5065_v8, %v2870_v17  ;;  %v4210_v19 = vpop.f32.mrb[53].mxu1  ;;  %v2723_v29 = vsel %vm1928_vm7, %v2719_v59, %v4905_v52  ;;  %v3431_v35 = vsub.f32 %v5338_v38, %v2724_v49  ;;  %v3422_v59 = vrot.slane %v3421_v30, 4 }
0x1394   :  { %v4480_v12 = vpop.eup %4479  ;;  %v2722_v13 = vmul.f32 %v4478_v61, %v5249_v5  ;;  %v3430_v14 = vsub.f32 %v5347_v2, %v2723_v29  ;;  %v5369_v5 = vsel %vm1931_vm10, %v2036_v55, %v5131_v3 }
0x1395   :  { %v2721_v16 = vmul.f32 %v4480_v12, %v5253_v57  ;;  %4211 = vmatprep.subr.msk.mxu0 %vm1493_vm4, %v2874_v10  ;;  %v3435_v48 = vmul.f32 %v4907_v53, %v3431_v35  ;;  %v3423_v55 = vadd.f32 %v3422_v59, %v3421_v30 }
0x1396   :  { %4212 = vmatpush3.msk.msra.mxu0 %vm1493_vm4, %v2874_v10  ;;  %v2726_v57 = vsel %vm1931_vm10, %v2722_v13, %v4925_v60  ;;  %v3434_v44 = vmul.f32 %v3430_v14, %v4909_v54 }
0x1397   :  { %4214 = vmatmul.mubr.msk.f32.vlgmr.msra.gmra.mrb[38].mxu0 %vm1480_vm3, %v5071_v11  ;;  %v2725_v42 = vsel %vm1930_vm9, %v2721_v16, %v4927_v63  ;;  %v3433_v27 = vsub.f32 %v5369_v5, %v2726_v57  ;;  %v3447_v18 = vmul.f32 %v3435_v48, %v3435_v48  ;;  %4219 = vmatprep.subr.msk.mxu0 %vm1595_vm5, %v5076_v22  ;;  %v3424_v4 = vrot.slane %v3423_v55, 2 }
0x1398   :  { %4216 = vmatprep.mubr.msk.f32.mxu0 %vm1480_vm3, %v5082_v24  ;;  %v3432_v3 = vsub.f32 %v5364_v15, %v2725_v42  ;;  %v3446_v43 = vmul.f32 %v3434_v44, %v3434_v44  ;;  %4220 = vmatpush3.msk.msra.mxu0 %vm1595_vm5, %v5076_v22 }
0x1399   :  { %v3437_v45 = vmul.f32 %v4929_v0, %v3433_v27  ;;  %v3451_v46 = vsel %vm123_vm0, %v3447_v18, 0.0  ;;  %4415 = vmatprep.subr.bf16.mxu0 %v4498_v23  ;;  %v3425_v17 = vadd.f32 %v3424_v4, %v3423_v55 }
0x139a   :  { %v3436_v32 = vmul.f32 %v3432_v3, %v4933_v62  ;;  %v3450_v33 = vsel %vm123_vm0, %v3446_v43, 0.0 }
0x139b   :  { %4217 = vmatmul.mubr.msk.f32.gmra.mrb[40].mxu0 %vm1480_vm3, %v5094_v26  ;;  %v3452_v40 = vadd.f32 %v3451_v46, %v3450_v33  ;;  %v3449_v50 = vmul.f32 %v3437_v45, %v3437_v45  ;;  %v3426_v49 = vrot.slane %v3425_v17, 1 }
0x139c   :  { %v3448_v47 = vmul.f32 %v3436_v32, %v3436_v32 }
0x139d   :  { %v3455_v1 = vsel %vm123_vm0, %v3449_v50, 0.0  ;;  %v3427_v61 = vadd.f32 %v3426_v49, %v3425_v17 }
0x139e   :  { %v3453_v7 = vsel %vm123_vm0, %v3448_v47, 0.0 }
0x139f   :  { %v3454_v56 = vadd.f32 %v3453_v7, %v3452_v40  ;;  %4433 = vpush %v3427_v61 }
0x13a1   :  { %v3456_v6 = vadd.f32 %v3455_v1, %v3454_v56 }
0x13a3   :  { %3457 = vadd.xlane.f32.xlu0 %v3456_v6 }
0x13b9   :  { %1041 = vrot.lane.b32.xlu0 %v5020_v36, %s4500_s27 }
0x13bd   :  { %1047 = vrot.lane.b32.xlu0 %v5022_v39, %s4500_s27 }
0x13d0   :  { %s4434_s20 = spop %4433 }
0x1430   :  { %v3458_v10 = vpop.xlane.xlu0 %3457 }
0x1431   :  { %v3459_v19 = vrot.slane %v3458_v10, 4 }
0x1433   :  { %v3460_v29 = vadd.f32 %v3459_v19, %v3458_v10 }
0x1434   :  { %v1042_v35 = vpop.permute.xlu0 %1041 }
0x1435   :  { %v3461_v12 = vrot.slane %v3460_v29, 2  ;;  %v1053_v13 = vsel %vm123_vm0, %v4905_v52, %v1042_v35 }
0x1436   :  { %1057 = vst [vmem:[%s5526_s23] sm:$0xff] %v1053_v13 }
0x1437   :  { %v3462_v14 = vadd.f32 %v3461_v12, %v3460_v29 }
0x1438   :  { %v1048_v16 = vpop.permute.xlu0 %1047 }
0x1439   :  { %v1056_v48 = vsel %vm123_vm0, %v4925_v60, %v1048_v16  ;;  %v3463_v57 = vrot.slane %v3462_v14, 1 }
0x143a   :  { %1060 = vst [vmem:[%s5526_s23 + $0x18] sm:$0xff] %v1056_v48 }
0x143b   :  { %v3464_v44 = vadd.f32 %v3463_v57, %v3462_v14 }
0x143d   :  { %4435 = vpush %v3464_v44 }
0x146a   :  { %v4215_v42 = vpop.f32.mrb[38].mxu0 }
0x146b   :  { %v2944_v27 = vpop.f32.mrb[39].mxu0 }
0x146c   :  { %4221 = vmatprep.mubr.msk.f32.mxu0 %vm1582_vm6, %v2944_v27 }
0x146d   :  { %4222 = vmatmul.mubr.msk.f32.vlgmr.msra.gmra.mrb[42].mxu0 %vm1582_vm6, %v4215_v42 }
0x146e   :  { %v4218_v52 = vpop.f32.mrb[40].mxu0  ;;  %4417 = vmatpush3.bf16.msra.mxu0 %v4974_v20  ;;  %s4436_s17 = spop %4435 }
0x146f   :  { %v2954_v18 = vpop.f32.mrb[41].mxu0  ;;  %4418 = vmatprep.subr.bf16.mxu0 %v4498_v23 }
0x1470   :  { %4224 = vmatprep.mubr.msk.f32.mxu0 %vm1582_vm6, %v2954_v18 }
0x1471   :  { %4225 = vmatmul.mubr.msk.f32.gmra.mrb[44].mxu0 %vm1582_vm6, %v4218_v52 }
0x1472   :  { %4420 = vmatpush3.bf16.msra.mxu0 %v4986_v25  ;;  %4254 = vmatprep.mubr.msk.f32.mxu0 %vm4499_vm2, %v4497_v37 }
0x1473   :  { %4421 = vmatprep.subr.bf16.mxu0 %v4498_v23 }
0x1476   :  { %4423 = vmatpush3.bf16.msra.mxu0 %v4995_v28 }
0x1477   :  { %4424 = vmatprep.subr.bf16.mxu0 %v4498_v23 }
0x147a   :  { %4426 = vmatpush3.bf16.msra.mxu0 %v5007_v31 }
0x1540   :  { %v4223_v60 = vpop.f32.mrb[42].mxu0 }
0x1541   :  { %v3061_v20 = vsub.f32 %v5024_v41, %v4223_v60  ;;  %v3041_v3 = vpop.f32.mrb[43].mxu0 }
0x1542   :  { %v3060_v43 = vsub.f32 %v5020_v36, %v3041_v3 }
0x1543   :  { %v3065_v45 = vmul.f32 %v3061_v20, %v3061_v20 }
0x1544   :  { %v3064_v46 = vmul.f32 %v3060_v43, %v3060_v43  ;;  %v4226_v25 = vpop.f32.mrb[44].mxu0 }
0x1545   :  { %v3069_v32 = vmul.f32 %v4907_v53, %v3065_v45  ;;  %v3063_v33 = vsub.f32 %v5022_v39, %v4226_v25  ;;  %v3051_v40 = vpop.f32.mrb[45].mxu0 }
0x1546   :  { %v3068_v28 = vmul.f32 %v3064_v46, %v4909_v54  ;;  %v3062_v47 = vsub.f32 %v5018_v34, %v3051_v40 }
0x1547   :  { %v3067_v50 = vmul.f32 %v3063_v33, %v3063_v33 }
0x1548   :  { %v4410_v31 = vpack.c.bf16 %v3069_v32, %v3068_v28  ;;  %v3066_v7 = vmul.f32 %v3062_v47, %v3062_v47 }
0x1549   :  { %v3071_v56 = vmul.f32 %v4929_v0, %v3067_v50 }
0x154a   :  { %v3070_v1 = vmul.f32 %v3066_v7, %v4933_v62  ;;  %4411 = vmatpush3.bf16.msra.mxu1 %v4410_v31 }
0x154b   :  { %4412 = vmatprep.subr.bf16.mxu1 %v4498_v23 }
0x154c   :  { %v4413_v6 = vpack.c.bf16 %v3071_v56, %v3070_v1 }
0x154e   :  { %4414 = vmatpush3.bf16.msra.mxu1 %v4413_v6  ;;  %v3429_v6 = vstv %s4434_s20 }
0x1551   :  { %4236 = vmatmul.mubr.msk.f32.vlgmr.msra.gmra.mrb[54].mxu1 %vm227_vm1, %v4953_v9  ;;  %vm3491_vm1 = vcmp.eq.s32.totalorder %v4746_v21, 0 }
0x1552   :  { %4259 = vmatprep.mubr.msk.f32.mxu1 %vm1480_vm3, %v5061_v58 }
0x1624   :  { %v3138_v30 = vpop.f32.mrb[54].mxu1 }
0x1625   :  { %v4237_v59 = vpop.f32.mrb[55].mxu1  ;;  %4255 = vmatmul.mubr.msk.f32.vlgmr.msra.gmra.mrb[46].mxu0 %vm123_vm0, %v3138_v30  ;;  %v3466_v30 = vstv %s4436_s17 }
0x1626   :  { %v782_v59 = vstv %s4432_s26 }
0x16f8   :  { %v3211_v55 = vpop.f32.mrb[46].mxu0 }
0x16f9   :  { %v3215_v4 = vmul.f32 %v5065_v8, %v3211_v55  ;;  %v4256_v17 = vpop.f32.mrb[47].mxu0  ;;  %v3644_v55 = vsel %vm3491_vm1, 1.0, %v4497_v37 }
0x16fa   :  { %v3645_v17 = vsel %vm3495_vm11, 1.0, %v4497_v37 }
0x16fb   :  { %4257 = vmatprep.subr.msk.mxu1 %vm1493_vm4, %v3215_v4 }
0x16fc   :  { %4258 = vmatpush3.msk.msra.mxu1 %vm1493_vm4, %v3215_v4 }
0x16fd   :  { %4260 = vmatmul.mubr.msk.f32.vlgmr.msra.gmra.mrb[56].mxu1 %vm1480_vm3, %v5071_v11  ;;  %4265 = vmatprep.subr.msk.mxu1 %vm1595_vm5, %v5076_v22 }
0x16fe   :  { %4262 = vmatprep.mubr.msk.f32.mxu1 %vm1480_vm3, %v5082_v24  ;;  %4266 = vmatpush3.msk.msra.mxu1 %vm1595_vm5, %v5076_v22 }
0x1701   :  { %4263 = vmatmul.mubr.msk.f32.gmra.mrb[58].mxu1 %vm1480_vm3, %v5094_v26 }
0x17d0   :  { %v4261_v23 = vpop.f32.mrb[56].mxu1 }
0x17d1   :  { %v3285_v9 = vpop.f32.mrb[57].mxu1 }
0x17d2   :  { %4267 = vmatprep.mubr.msk.f32.mxu1 %vm1582_vm6, %v3285_v9 }
0x17d3   :  { %4268 = vmatmul.mubr.msk.f32.vlgmr.msra.gmra.mrb[60].mxu1 %vm1582_vm6, %v4261_v23  ;;  %v783_v23 = vmul.f32 0.0009765625, %v782_v59 }
0x17d4   :  { %v4264_v58 = vpop.f32.mrb[58].mxu1 }
0x17d5   :  { %v3295_v8 = vpop.f32.mrb[59].mxu1 }
0x17d6   :  { %4270 = vmatprep.mubr.msk.f32.mxu1 %vm1582_vm6, %v3295_v8 }
0x17d7   :  { %4271 = vmatmul.mubr.msk.f32.gmra.mrb[62].mxu1 %vm1582_vm6, %v4264_v58 }
0x18a6   :  { %v4269_v11 = vpop.f32.mrb[60].mxu1 }
0x18a7   :  { %v3388_v24 = vadd.f32 1e-06, %v4269_v11  ;;  %v3382_v49 = vpop.f32.mrb[61].mxu1 }
0x18a8   :  { %v3383_v61 = vadd.f32 1e-06, %v3382_v49 }
0x18a9   :  { %4481 = vrsqrt.f32 %v3388_v24 }
0x18aa   :  { %4483 = vrsqrt.f32 %v3383_v61  ;;  %v4272_v22 = vpop.f32.mrb[62].mxu1 }
0x18ab   :  { %v3398_v26 = vadd.f32 1e-06, %v4272_v22  ;;  %v3392_v10 = vpop.f32.mrb[63].mxu1 }
0x18ac   :  { %v3393_v19 = vadd.f32 1e-06, %v3392_v10 }
0x18ad   :  { %4485 = vrsqrt.f32 %v3398_v26 }
0x18ae   :  { %4487 = vrsqrt.f32 %v3393_v19 }
0x18af   :  { %4489 = vrcp.f32 %v3429_v6 }
0x18b3   :  { %v4482_v29 = vpop.eup %4481 }
0x18b4   :  { %v4484_v35 = vpop.eup %4483  ;;  %v3406_v12 = vmul.f32 %v4482_v29, %v3061_v20 }
0x18b5   :  { %v3405_v13 = vmul.f32 %v4484_v35, %v3060_v43 }
0x18b6   :  { %v3410_v14 = vsel %vm1929_vm8, %v3406_v12, %v5024_v41 }
0x18b7   :  { %v4486_v16 = vpop.eup %4485  ;;  %v3409_v48 = vsel %vm1928_vm7, %v3405_v13, %v5020_v36  ;;  %v3439_v57 = vsub.f32 %v5338_v38, %v3410_v14 }
0x18b8   :  { %v4488_v44 = vpop.eup %4487  ;;  %v3408_v42 = vmul.f32 %v4486_v16, %v3063_v33  ;;  %v3438_v27 = vsub.f32 %v5347_v2, %v3409_v48 }
0x18b9   :  { %v3407_v52 = vmul.f32 %v4488_v44, %v3062_v47  ;;  %v3443_v18 = vmul.f32 %v4907_v53, %v3439_v57 }
0x18ba   :  { %v3412_v60 = vsel %vm1931_vm10, %v3408_v42, %v5022_v39  ;;  %v3442_v20 = vmul.f32 %v3438_v27, %v4909_v54 }
0x18bb   :  { %v3411_v3 = vsel %vm1930_vm9, %v3407_v52, %v5018_v34  ;;  %v3441_v36 = vsub.f32 %v5369_v5, %v3412_v60  ;;  %v3470_v38 = vmul.f32 %v3443_v18, %v3443_v18 }
0x18bc   :  { %v3440_v43 = vsub.f32 %v5364_v15, %v3411_v3  ;;  %v3469_v45 = vmul.f32 %v3442_v20, %v3442_v20 }
0x18bd   :  { %v3445_v2 = vmul.f32 %v4929_v0, %v3441_v36  ;;  %v3474_v53 = vsel %vm123_vm0, %v3470_v38, 0.0 }
0x18be   :  { %v3444_v46 = vmul.f32 %v3440_v43, %v4933_v62  ;;  %v3473_v39 = vsel %vm123_vm0, %v3469_v45, 0.0 }
0x18bf   :  { %v3475_v25 = vadd.f32 %v3474_v53, %v3473_v39  ;;  %v3472_v32 = vmul.f32 %v3445_v2, %v3445_v2 }
0x18c0   :  { %v3471_v54 = vmul.f32 %v3444_v46, %v3444_v46 }
0x18c1   :  { %v3478_v5 = vsel %vm123_vm0, %v3472_v32, 0.0 }
0x18c2   :  { %v3476_v33 = vsel %vm123_vm0, %v3471_v54, 0.0 }
0x18c3   :  { %v3477_v40 = vadd.f32 %v3476_v33, %v3475_v25 }
0x18c5   :  { %v3479_v28 = vadd.f32 %v3478_v5, %v3477_v40 }
0x18c7   :  { %3480 = vadd.xlane.f32.xlu1 %v3479_v28 }
0x18d8   :  { %1043 = vrot.lane.b32.xlu1 %v5024_v41, %s4500_s27 }
0x18dc   :  { %1045 = vrot.lane.b32.xlu1 %v5018_v34, %s4500_s27 }
0x1954   :  { %v3481_v0 = vpop.xlane.xlu1 %3480 }
0x1955   :  { %v3482_v62 = vrot.slane %v3481_v0, 4 }
0x1957   :  { %v3483_v15 = vadd.f32 %v3482_v62, %v3481_v0 }
0x1958   :  { %v1044_v47 = vpop.permute.xlu1 %1043 }
0x1959   :  { %v3484_v50 = vrot.slane %v3483_v15, 2  ;;  %v1054_v31 = vsel %vm123_vm0, %v4903_v51, %v1044_v47  ;;  %v4490_v51 = vpop.eup %4489 }
0x195a   :  { %1058 = vst [vmem:[%s5526_s23 + $0x8] sm:$0xff] %v1054_v31 }
0x195b   :  { %v3485_v7 = vadd.f32 %v3484_v50, %v3483_v15 }
0x195c   :  { %v1046_v56 = vpop.permute.xlu1 %1045 }
0x195d   :  { %v1055_v41 = vsel %vm123_vm0, %v4927_v63, %v1046_v56  ;;  %v3486_v1 = vrot.slane %v3485_v7, 1  ;;  %vm3500_vm0 = vcmp.eq.s32.totalorder %v4746_v21, 2  ;;  %v3468_v63 = vmul.f32 %v4490_v51, %v3466_v30 }
0x195e   :  { %1059 = vst [vmem:[%s5526_s23 + $0x10] sm:$0xff] %v1055_v41  ;;  %v3646_v58 = vsel %vm3500_vm0, 1.0, %v4497_v37 }
0x195f   :  { %v3487_v34 = vadd.f32 %v3486_v1, %v3485_v7  ;;  %v3494_v8 = vmul.f32 %v3644_v55, %v3468_v63  ;;  %v3503_v24 = vmul.f32 %v3646_v58, %v783_v23 }
0x1961   :  { %4437 = vpush %v3487_v34 }
0x1992   :  { %s4438_s0 = spop %4437 }
0x1993   :  { %v3489_v4 = vstv %s4438_s0 }
0x1994   :  { %v3490_v9 = vmul.f32 %v4490_v51, %v3489_v4 }
0x1996   :  { %v3498_v11 = vmul.f32 %v3645_v17, %v3490_v9 }
0x1998   :  { %v3499_v49 = vadd.f32 %v3498_v11, %v3494_v8 }
0x199a   :  { %v3504_v61 = vadd.f32 %v3503_v24, %v3499_v49 }
0x199c   :  { %3506 = vst.msk [vmem:[%s5527_s25] sm:$0x1] %vm3505_vm12, %v3504_v61 }

// kernel: squeeze.6
= control target key start
LH: loop header
LB: loop body
LE: loop exit
PB: predicated region body
PF: predicated region fallthrough
CT: control target
= control target key end

     0   :  { %vm643_vm0 = vcmask 1047556   ;;  %s1598_s10 = smov 12   ;;  %vm645_vm1 = vcmask 31744   ;;  %s2184_s0 = inlined_call_operand.vmem [shape: f32[1,2,4,4,4,4,4], index: 0, kind: input, shape index: {}]   ;;  %s2185_s1 = inlined_call_operand.hbm [shape: f32[2,4,16,16], index: 1, kind: output, shape index: {}]  }
   0x1   :  { %v1563_v0 = vld [vmem:[%s2184_s0 + $0x1c] sm:$0xf]  ;;  %v1564_v1 = vld [vmem:[%s2184_s0 + $0x18] sm:$0xf]  ;;  %v1565_v2 = vld [vmem:[%s2184_s0 + $0x14] sm:$0xf] }
   0x2   :  { %609 = vst [vmem:[#allocation2 + $0x38] sm:$0xf] %v1563_v0  ;;  %614 = vst [vmem:[#allocation2 + $0x30] sm:$0xf] %v1564_v1  ;;  %v1566_v3 = vld [vmem:[%s2184_s0 + $0x10] sm:$0xf] }
   0x3   :  { %619 = vst [vmem:[#allocation2 + $0x28] sm:$0xf] %v1565_v2  ;;  %v1567_v4 = vld [vmem:[%s2184_s0 + $0xc] sm:$0xf]  ;;  %v1568_v5 = vld [vmem:[%s2184_s0 + $0x8] sm:$0xf] }
   0x4   :  { %624 = vst [vmem:[#allocation2 + $0x20] sm:$0xf] %v1566_v3  ;;  %629 = vst [vmem:[#allocation2 + $0x18] sm:$0xf] %v1567_v4  ;;  %v1569_v6 = vld [vmem:[%s2184_s0 + $0x4] sm:$0xf] }
   0x5   :  { %634 = vst [vmem:[#allocation2 + $0x10] sm:$0xf] %v1568_v5  ;;  %v639_v7 = vld [vmem:[%s2184_s0] sm:$0xf]  ;;  %638 = vst [vmem:[#allocation2 + $0x8] sm:$0xf] %v1569_v6 }
   0x6   :  { %640 = vst [vmem:[#allocation2] sm:$0xf] %v639_v7  ;;  %v1499_v8 = vld [vmem:[%s2184_s0 + $0x11c] sm:$0xf]  ;;  %v1500_v9 = vld [vmem:[%s2184_s0 + $0x118] sm:$0xf] }
   0x7   :  { %v1501_v10 = vld [vmem:[%s2184_s0 + $0x114] sm:$0xf]  ;;  %289 = vst [vmem:[#allocation2 + $0x238] sm:$0xf] %v1499_v8  ;;  %294 = vst [vmem:[#allocation2 + $0x230] sm:$0xf] %v1500_v9 }
   0x8   :  { %299 = vst [vmem:[#allocation2 + $0x228] sm:$0xf] %v1501_v10  ;;  %v1502_v11 = vld [vmem:[%s2184_s0 + $0x110] sm:$0xf]  ;;  %v1503_v12 = vld [vmem:[%s2184_s0 + $0x10c] sm:$0xf] }
   0x9   :  { %v1504_v13 = vld [vmem:[%s2184_s0 + $0x108] sm:$0xf]  ;;  %304 = vst [vmem:[#allocation2 + $0x220] sm:$0xf] %v1502_v11  ;;  %309 = vst [vmem:[#allocation2 + $0x218] sm:$0xf] %v1503_v12 }
   0xa   :  { %314 = vst [vmem:[#allocation2 + $0x210] sm:$0xf] %v1504_v13  ;;  %v1505_v14 = vld [vmem:[%s2184_s0 + $0x104] sm:$0xf]  ;;  %v1506_v15 = vld [vmem:[%s2184_s0 + $0x100] sm:$0xf] }
   0xb   :  { %v1531_v16 = vld [vmem:[%s2184_s0 + $0x9c] sm:$0xf]  ;;  %319 = vst [vmem:[#allocation2 + $0x208] sm:$0xf] %v1505_v14  ;;  %324 = vst [vmem:[#allocation2 + $0x200] sm:$0xf] %v1506_v15 }
   0xc   :  { %449 = vst [vmem:[#allocation2 + $0x138] sm:$0xf] %v1531_v16  ;;  %v1532_v17 = vld [vmem:[%s2184_s0 + $0x98] sm:$0xf]  ;;  %v1533_v18 = vld [vmem:[%s2184_s0 + $0x94] sm:$0xf] }
   0xd   :  { %v1534_v19 = vld [vmem:[%s2184_s0 + $0x90] sm:$0xf]  ;;  %454 = vst [vmem:[#allocation2 + $0x130] sm:$0xf] %v1532_v17  ;;  %459 = vst [vmem:[#allocation2 + $0x128] sm:$0xf] %v1533_v18 }
   0xe   :  { %464 = vst [vmem:[#allocation2 + $0x120] sm:$0xf] %v1534_v19  ;;  %v1535_v20 = vld [vmem:[%s2184_s0 + $0x8c] sm:$0xf]  ;;  %v1536_v21 = vld [vmem:[%s2184_s0 + $0x88] sm:$0xf] }
   0xf   :  { %v1537_v22 = vld [vmem:[%s2184_s0 + $0x84] sm:$0xf]  ;;  %469 = vst [vmem:[#allocation2 + $0x118] sm:$0xf] %v1535_v20  ;;  %474 = vst [vmem:[#allocation2 + $0x110] sm:$0xf] %v1536_v21 }
  0x10   :  { %479 = vst [vmem:[#allocation2 + $0x108] sm:$0xf] %v1537_v22  ;;  %v1538_v23 = vld [vmem:[%s2184_s0 + $0x80] sm:$0xf]  ;;  %v1467_v24 = vld [vmem:[%s2184_s0 + $0x19c] sm:$0xf] }
  0x11   :  { %v1468_v25 = vld [vmem:[%s2184_s0 + $0x198] sm:$0xf]  ;;  %484 = vst [vmem:[#allocation2 + $0x100] sm:$0xf] %v1538_v23  ;;  %129 = vst [vmem:[#allocation2 + $0x338] sm:$0xf] %v1467_v24 }
  0x12   :  { %v785_v26 = vld [vmem:[#allocation2 + $0x3] ss:$8 sm:$0xf0]   ;;  %134 = vst [vmem:[#allocation2 + $0x330] sm:$0xf] %v1468_v25 }
  0x13   :  { %v1469_v27 = vld [vmem:[%s2184_s0 + $0x194] sm:$0xf]  ;;  %v783_v28 = vld [vmem:[#allocation2 + $0x3] ss:$8 sm:$0xf]  }
  0x14   :  { %139 = vst [vmem:[#allocation2 + $0x328] sm:$0xf] %v1469_v27  ;;  %v1470_v29 = vld [vmem:[%s2184_s0 + $0x190] sm:$0xf]  ;;  %v787_v30 = vsel %vm643_vm0, %v785_v26, %v783_v28  ;;  %v1471_v31 = vld [vmem:[%s2184_s0 + $0x18c] sm:$0xf] }
  0x15   :  { %144 = vst [vmem:[#allocation2 + $0x320] sm:$0xf] %v1470_v29  ;;  %v1472_v32 = vld [vmem:[%s2184_s0 + $0x188] sm:$0xf]  ;;  %v1473_v33 = vld [vmem:[%s2184_s0 + $0x184] sm:$0xf]  ;;  %788 = vrot.lane.b32.xlu0 %v787_v30, %s1598_s10 }
  0x16   :  { %v806_v34 = vld [vmem:[#allocation2 + $0x203] ss:$8 sm:$0xf0]   ;;  %149 = vst [vmem:[#allocation2 + $0x318] sm:$0xf] %v1471_v31 }
  0x17   :  { %154 = vst [vmem:[#allocation2 + $0x310] sm:$0xf] %v1472_v32  ;;  %159 = vst [vmem:[#allocation2 + $0x308] sm:$0xf] %v1473_v33  ;;  %v1474_v35 = vld [vmem:[%s2184_s0 + $0x180] sm:$0xf] }
  0x18   :  { %v804_v36 = vld [vmem:[#allocation2 + $0x203] ss:$8 sm:$0xf]   ;;  %164 = vst [vmem:[#allocation2 + $0x300] sm:$0xf] %v1474_v35 }
  0x19   :  { %v1555_v37 = vld [vmem:[%s2184_s0 + $0x3c] sm:$0xf]  ;;  %v808_v38 = vsel %vm643_vm0, %v806_v34, %v804_v36  ;;  %v795_v39 = vld [vmem:[#allocation2 + $0x103] ss:$8 sm:$0xf0]  }
  0x1a   :  { %569 = vst [vmem:[#allocation2 + $0x78] sm:$0xf] %v1555_v37  ;;  %v1556_v40 = vld [vmem:[%s2184_s0 + $0x38] sm:$0xf]  ;;  %809 = vrot.lane.b32.xlu1 %v808_v38, %s1598_s10  ;;  %v1557_v41 = vld [vmem:[%s2184_s0 + $0x34] sm:$0xf] }
  0x1b   :  { %574 = vst [vmem:[#allocation2 + $0x70] sm:$0xf] %v1556_v40  ;;  %v1558_v42 = vld [vmem:[%s2184_s0 + $0x30] sm:$0xf]  ;;  %v1559_v43 = vld [vmem:[%s2184_s0 + $0x2c] sm:$0xf] }
  0x1c   :  { %v793_v44 = vld [vmem:[#allocation2 + $0x103] ss:$8 sm:$0xf]   ;;  %579 = vst [vmem:[#allocation2 + $0x68] sm:$0xf] %v1557_v41 }
  0x1d   :  { %584 = vst [vmem:[#allocation2 + $0x60] sm:$0xf] %v1558_v42  ;;  %589 = vst [vmem:[#allocation2 + $0x58] sm:$0xf] %v1559_v43  ;;  %v1560_v45 = vld [vmem:[%s2184_s0 + $0x28] sm:$0xf]  ;;  %v797_v46 = vsel %vm643_vm0, %v795_v39, %v793_v44 }
  0x1e   :  { %594 = vst [vmem:[#allocation2 + $0x50] sm:$0xf] %v1560_v45  ;;  %v1561_v47 = vld [vmem:[%s2184_s0 + $0x24] sm:$0xf]  ;;  %v1562_v48 = vld [vmem:[%s2184_s0 + $0x20] sm:$0xf]  ;;  %798 = vrot.lane.b32.xlu0 %v797_v46, %s1598_s10 }
  0x1f   :  { %v1523_v49 = vld [vmem:[%s2184_s0 + $0xbc] sm:$0xf]  ;;  %v817_v50 = vld [vmem:[#allocation2 + $0x303] ss:$8 sm:$0xf0]  }
  0x20   :  { %599 = vst [vmem:[#allocation2 + $0x48] sm:$0xf] %v1561_v47  ;;  %604 = vst [vmem:[#allocation2 + $0x40] sm:$0xf] %v1562_v48  ;;  %v1524_v51 = vld [vmem:[%s2184_s0 + $0xb8] sm:$0xf] }
  0x21   :  { %409 = vst [vmem:[#allocation2 + $0x178] sm:$0xf] %v1523_v49  ;;  %414 = vst [vmem:[#allocation2 + $0x170] sm:$0xf] %v1524_v51  ;;  %v1525_v52 = vld [vmem:[%s2184_s0 + $0xb4] sm:$0xf] }
  0x22   :  { %v1526_v53 = vld [vmem:[%s2184_s0 + $0xb0] sm:$0xf]  ;;  %v1527_v54 = vld [vmem:[%s2184_s0 + $0xac] sm:$0xf]  ;;  %419 = vst [vmem:[#allocation2 + $0x168] sm:$0xf] %v1525_v52 }
  0x23   :  { %v815_v55 = vld [vmem:[#allocation2 + $0x303] ss:$8 sm:$0xf]   ;;  %424 = vst [vmem:[#allocation2 + $0x160] sm:$0xf] %v1526_v53 }
  0x24   :  { %429 = vst [vmem:[#allocation2 + $0x158] sm:$0xf] %v1527_v54  ;;  %v1528_v56 = vld [vmem:[%s2184_s0 + $0xa8] sm:$0xf]  ;;  %v819_v57 = vsel %vm643_vm0, %v817_v50, %v815_v55  ;;  %v1529_v58 = vld [vmem:[%s2184_s0 + $0xa4] sm:$0xf] }
  0x25   :  { %434 = vst [vmem:[#allocation2 + $0x150] sm:$0xf] %v1528_v56  ;;  %v1530_v59 = vld [vmem:[%s2184_s0 + $0xa0] sm:$0xf]  ;;  %v1491_v60 = vld [vmem:[%s2184_s0 + $0x13c] sm:$0xf]  ;;  %820 = vrot.lane.b32.xlu1 %v819_v57, %s1598_s10 }
  0x26   :  { %439 = vst [vmem:[#allocation2 + $0x148] sm:$0xf] %v1529_v58  ;;  %444 = vst [vmem:[#allocation2 + $0x140] sm:$0xf] %v1530_v59  ;;  %v1492_v61 = vld [vmem:[%s2184_s0 + $0x138] sm:$0xf] }
  0x27   :  { %249 = vst [vmem:[#allocation2 + $0x278] sm:$0xf] %v1491_v60  ;;  %v1493_v62 = vld [vmem:[%s2184_s0 + $0x134] sm:$0xf]  ;;  %v1494_v63 = vld [vmem:[%s2184_s0 + $0x130] sm:$0xf] }
  0x28   :  { %v828_v0 = vld [vmem:[#allocation2 + $0x43] ss:$8 sm:$0xf0]   ;;  %254 = vst [vmem:[#allocation2 + $0x270] sm:$0xf] %v1492_v61 }
  0x29   :  { %259 = vst [vmem:[#allocation2 + $0x268] sm:$0xf] %v1493_v62  ;;  %264 = vst [vmem:[#allocation2 + $0x260] sm:$0xf] %v1494_v63  ;;  %v1495_v1 = vld [vmem:[%s2184_s0 + $0x12c] sm:$0xf] }
  0x2a   :  { %269 = vst [vmem:[#allocation2 + $0x258] sm:$0xf] %v1495_v1  ;;  %v1496_v2 = vld [vmem:[%s2184_s0 + $0x128] sm:$0xf]  ;;  %v1497_v3 = vld [vmem:[%s2184_s0 + $0x124] sm:$0xf] }
  0x2b   :  { %v1498_v4 = vld [vmem:[%s2184_s0 + $0x120] sm:$0xf]  ;;  %274 = vst [vmem:[#allocation2 + $0x250] sm:$0xf] %v1496_v2  ;;  %279 = vst [vmem:[#allocation2 + $0x248] sm:$0xf] %v1497_v3 }
  0x2c   :  { %v826_v5 = vld [vmem:[#allocation2 + $0x43] ss:$8 sm:$0xf]   ;;  %284 = vst [vmem:[#allocation2 + $0x240] sm:$0xf] %v1498_v4 }
  0x2d   :  { %v1459_v6 = vld [vmem:[%s2184_s0 + $0x1bc] sm:$0xf]  ;;  %v830_v7 = vsel %vm643_vm0, %v828_v0, %v826_v5  ;;  %v1460_v8 = vld [vmem:[%s2184_s0 + $0x1b8] sm:$0xf]  ;;  %v1461_v9 = vld [vmem:[%s2184_s0 + $0x1b4] sm:$0xf] }
  0x2e   :  { %89 = vst [vmem:[#allocation2 + $0x378] sm:$0xf] %v1459_v6  ;;  %v1462_v10 = vld [vmem:[%s2184_s0 + $0x1b0] sm:$0xf]  ;;  %831 = vrot.lane.b32.xlu0 %v830_v7, %s1598_s10  ;;  %94 = vst [vmem:[#allocation2 + $0x370] sm:$0xf] %v1460_v8 }
  0x2f   :  { %v839_v11 = vld [vmem:[#allocation2 + $0x143] ss:$8 sm:$0xf0]   ;;  %99 = vst [vmem:[#allocation2 + $0x368] sm:$0xf] %v1461_v9 }
  0x30   :  { %104 = vst [vmem:[#allocation2 + $0x360] sm:$0xf] %v1462_v10  ;;  %v1463_v12 = vld [vmem:[%s2184_s0 + $0x1ac] sm:$0xf]  ;;  %v1464_v13 = vld [vmem:[%s2184_s0 + $0x1a8] sm:$0xf] }
  0x31   :  { %109 = vst [vmem:[#allocation2 + $0x358] sm:$0xf] %v1463_v12  ;;  %v1465_v14 = vld [vmem:[%s2184_s0 + $0x1a4] sm:$0xf]  ;;  %v1466_v15 = vld [vmem:[%s2184_s0 + $0x1a0] sm:$0xf] }
  0x32   :  { %v837_v16 = vld [vmem:[#allocation2 + $0x143] ss:$8 sm:$0xf]   ;;  %114 = vst [vmem:[#allocation2 + $0x350] sm:$0xf] %v1464_v13 }
  0x33   :  { %119 = vst [vmem:[#allocation2 + $0x348] sm:$0xf] %v1465_v14  ;;  %124 = vst [vmem:[#allocation2 + $0x340] sm:$0xf] %v1466_v15  ;;  %v1547_v17 = vld [vmem:[%s2184_s0 + $0x5c] sm:$0xf]  ;;  %v841_v18 = vsel %vm643_vm0, %v839_v11, %v837_v16 }
  0x34   :  { %v850_v19 = vld [vmem:[#allocation2 + $0x243] ss:$8 sm:$0xf0]   ;;  %529 = vst [vmem:[#allocation2 + $0xb8] sm:$0xf] %v1547_v17  ;;  %842 = vrot.lane.b32.xlu1 %v841_v18, %s1598_s10 }
  0x35   :  { %v1548_v20 = vld [vmem:[%s2184_s0 + $0x58] sm:$0xf]  ;;  %v1549_v21 = vld [vmem:[%s2184_s0 + $0x54] sm:$0xf]  ;;  %v1550_v22 = vld [vmem:[%s2184_s0 + $0x50] sm:$0xf] }
  0x36   :  { %534 = vst [vmem:[#allocation2 + $0xb0] sm:$0xf] %v1548_v20  ;;  %v1551_v23 = vld [vmem:[%s2184_s0 + $0x4c] sm:$0xf]  ;;  %539 = vst [vmem:[#allocation2 + $0xa8] sm:$0xf] %v1549_v21 }
  0x37   :  { %v848_v24 = vld [vmem:[#allocation2 + $0x243] ss:$8 sm:$0xf]   ;;  %544 = vst [vmem:[#allocation2 + $0xa0] sm:$0xf] %v1550_v22 }
  0x38   :  { %549 = vst [vmem:[#allocation2 + $0x98] sm:$0xf] %v1551_v23  ;;  %v1552_v25 = vld [vmem:[%s2184_s0 + $0x48] sm:$0xf]  ;;  %v852_v26 = vsel %vm643_vm0, %v850_v19, %v848_v24  ;;  %v1553_v27 = vld [vmem:[%s2184_s0 + $0x44] sm:$0xf] }
  0x39   :  { %554 = vst [vmem:[#allocation2 + $0x90] sm:$0xf] %v1552_v25  ;;  %v1554_v28 = vld [vmem:[%s2184_s0 + $0x40] sm:$0xf]  ;;  %v1515_v29 = vld [vmem:[%s2184_s0 + $0xdc] sm:$0xf]  ;;  %853 = vrot.lane.b32.xlu0 %v852_v26, %s1598_s10 }
  0x3a   :  { %v861_v30 = vld [vmem:[#allocation2 + $0x343] ss:$8 sm:$0xf0]   ;;  %559 = vst [vmem:[#allocation2 + $0x88] sm:$0xf] %v1553_v27 }
  0x3b   :  { %564 = vst [vmem:[#allocation2 + $0x80] sm:$0xf] %v1554_v28  ;;  %369 = vst [vmem:[#allocation2 + $0x1b8] sm:$0xf] %v1515_v29  ;;  %v1516_v31 = vld [vmem:[%s2184_s0 + $0xd8] sm:$0xf] }
  0x3c   :  { %374 = vst [vmem:[#allocation2 + $0x1b0] sm:$0xf] %v1516_v31  ;;  %v1517_v32 = vld [vmem:[%s2184_s0 + $0xd4] sm:$0xf]  ;;  %v1518_v33 = vld [vmem:[%s2184_s0 + $0xd0] sm:$0xf] }
  0x3d   :  { %v1519_v34 = vld [vmem:[%s2184_s0 + $0xcc] sm:$0xf]  ;;  %v859_v35 = vld [vmem:[#allocation2 + $0x343] ss:$8 sm:$0xf]  }
  0x3e   :  { %379 = vst [vmem:[#allocation2 + $0x1a8] sm:$0xf] %v1517_v32  ;;  %384 = vst [vmem:[#allocation2 + $0x1a0] sm:$0xf] %v1518_v33  ;;  %v1520_v36 = vld [vmem:[%s2184_s0 + $0xc8] sm:$0xf]  ;;  %v863_v37 = vsel %vm643_vm0, %v861_v30, %v859_v35 }
  0x3f   :  { %389 = vst [vmem:[#allocation2 + $0x198] sm:$0xf] %v1519_v34  ;;  %394 = vst [vmem:[#allocation2 + $0x190] sm:$0xf] %v1520_v36  ;;  %v1521_v38 = vld [vmem:[%s2184_s0 + $0xc4] sm:$0xf]  ;;  %864 = vrot.lane.b32.xlu1 %v863_v37, %s1598_s10 }
  0x40   :  { %v1522_v39 = vld [vmem:[%s2184_s0 + $0xc0] sm:$0xf]  ;;  %v1483_v40 = vld [vmem:[%s2184_s0 + $0x15c] sm:$0xf]  ;;  %399 = vst [vmem:[#allocation2 + $0x188] sm:$0xf] %v1521_v38 }
  0x41   :  { %404 = vst [vmem:[#allocation2 + $0x180] sm:$0xf] %v1522_v39  ;;  %209 = vst [vmem:[#allocation2 + $0x2b8] sm:$0xf] %v1483_v40  ;;  %v1484_v41 = vld [vmem:[%s2184_s0 + $0x158] sm:$0xf] }
  0x42   :  { %v1485_v42 = vld [vmem:[%s2184_s0 + $0x154] sm:$0xf]  ;;  %v1486_v43 = vld [vmem:[%s2184_s0 + $0x150] sm:$0xf]  ;;  %214 = vst [vmem:[#allocation2 + $0x2b0] sm:$0xf] %v1484_v41 }
  0x43   :  { %v872_v44 = vld [vmem:[#allocation2 + $0x83] ss:$8 sm:$0xf0]   ;;  %219 = vst [vmem:[#allocation2 + $0x2a8] sm:$0xf] %v1485_v42 }
  0x44   :  { %224 = vst [vmem:[#allocation2 + $0x2a0] sm:$0xf] %v1486_v43  ;;  %v1487_v45 = vld [vmem:[%s2184_s0 + $0x14c] sm:$0xf]  ;;  %v1488_v46 = vld [vmem:[%s2184_s0 + $0x148] sm:$0xf] }
  0x45   :  { %229 = vst [vmem:[#allocation2 + $0x298] sm:$0xf] %v1487_v45  ;;  %v1489_v47 = vld [vmem:[%s2184_s0 + $0x144] sm:$0xf]  ;;  %v1490_v48 = vld [vmem:[%s2184_s0 + $0x140] sm:$0xf] }
  0x46   :  { %v870_v49 = vld [vmem:[#allocation2 + $0x83] ss:$8 sm:$0xf]   ;;  %234 = vst [vmem:[#allocation2 + $0x290] sm:$0xf] %v1488_v46 }
  0x47   :  { %239 = vst [vmem:[#allocation2 + $0x288] sm:$0xf] %v1489_v47  ;;  %244 = vst [vmem:[#allocation2 + $0x280] sm:$0xf] %v1490_v48  ;;  %v1451_v50 = vld [vmem:[%s2184_s0 + $0x1dc] sm:$0xf]  ;;  %v874_v51 = vsel %vm643_vm0, %v872_v44, %v870_v49 }
  0x48   :  { %49 = vst [vmem:[#allocation2 + $0x3b8] sm:$0xf] %v1451_v50  ;;  %v1452_v52 = vld [vmem:[%s2184_s0 + $0x1d8] sm:$0xf]  ;;  %v1453_v53 = vld [vmem:[%s2184_s0 + $0x1d4] sm:$0xf]  ;;  %875 = vrot.lane.b32.xlu0 %v874_v51, %s1598_s10 }
  0x49   :  { %v1454_v54 = vld [vmem:[%s2184_s0 + $0x1d0] sm:$0xf]  ;;  %54 = vst [vmem:[#allocation2 + $0x3b0] sm:$0xf] %v1452_v52  ;;  %59 = vst [vmem:[#allocation2 + $0x3a8] sm:$0xf] %v1453_v53 }
  0x4a   :  { %v883_v55 = vld [vmem:[#allocation2 + $0x183] ss:$8 sm:$0xf0]   ;;  %64 = vst [vmem:[#allocation2 + $0x3a0] sm:$0xf] %v1454_v54 }
  0x4b   :  { %v1455_v56 = vld [vmem:[%s2184_s0 + $0x1cc] sm:$0xf]  ;;  %v1456_v57 = vld [vmem:[%s2184_s0 + $0x1c8] sm:$0xf]  ;;  %v1457_v58 = vld [vmem:[%s2184_s0 + $0x1c4] sm:$0xf] }
  0x4c   :  { %69 = vst [vmem:[#allocation2 + $0x398] sm:$0xf] %v1455_v56  ;;  %v1458_v59 = vld [vmem:[%s2184_s0 + $0x1c0] sm:$0xf]  ;;  %74 = vst [vmem:[#allocation2 + $0x390] sm:$0xf] %v1456_v57 }
  0x4d   :  { %v881_v60 = vld [vmem:[#allocation2 + $0x183] ss:$8 sm:$0xf]   ;;  %79 = vst [vmem:[#allocation2 + $0x388] sm:$0xf] %v1457_v58 }
  0x4e   :  { %84 = vst [vmem:[#allocation2 + $0x380] sm:$0xf] %v1458_v59  ;;  %v1539_v61 = vld [vmem:[%s2184_s0 + $0x7c] sm:$0xf]  ;;  %v885_v62 = vsel %vm643_vm0, %v883_v55, %v881_v60  ;;  %v1540_v0 = vld [vmem:[%s2184_s0 + $0x78] sm:$0xf] }
  0x4f   :  { %v894_v63 = vld [vmem:[#allocation2 + $0x283] ss:$8 sm:$0xf0]   ;;  %489 = vst [vmem:[#allocation2 + $0xf8] sm:$0xf] %v1539_v61  ;;  %886 = vrot.lane.b32.xlu1 %v885_v62, %s1598_s10 }
  0x50   :  { %494 = vst [vmem:[#allocation2 + $0xf0] sm:$0xf] %v1540_v0  ;;  %v1541_v1 = vld [vmem:[%s2184_s0 + $0x74] sm:$0xf]  ;;  %v1542_v2 = vld [vmem:[%s2184_s0 + $0x70] sm:$0xf] }
  0x51   :  { %v1543_v3 = vld [vmem:[%s2184_s0 + $0x6c] sm:$0xf]  ;;  %v892_v4 = vld [vmem:[#allocation2 + $0x283] ss:$8 sm:$0xf]  }
  0x52   :  { %499 = vst [vmem:[#allocation2 + $0xe8] sm:$0xf] %v1541_v1  ;;  %504 = vst [vmem:[#allocation2 + $0xe0] sm:$0xf] %v1542_v2  ;;  %v1544_v5 = vld [vmem:[%s2184_s0 + $0x68] sm:$0xf]  ;;  %v896_v6 = vsel %vm643_vm0, %v894_v63, %v892_v4 }
  0x53   :  { %509 = vst [vmem:[#allocation2 + $0xd8] sm:$0xf] %v1543_v3  ;;  %514 = vst [vmem:[#allocation2 + $0xd0] sm:$0xf] %v1544_v5  ;;  %v1545_v7 = vld [vmem:[%s2184_s0 + $0x64] sm:$0xf]  ;;  %897 = vrot.lane.b32.xlu0 %v896_v6, %s1598_s10 }
  0x54   :  { %v1546_v8 = vld [vmem:[%s2184_s0 + $0x60] sm:$0xf]  ;;  %v1507_v9 = vld [vmem:[%s2184_s0 + $0xfc] sm:$0xf]  ;;  %519 = vst [vmem:[#allocation2 + $0xc8] sm:$0xf] %v1545_v7 }
  0x55   :  { %v905_v10 = vld [vmem:[#allocation2 + $0x383] ss:$8 sm:$0xf0]   ;;  %524 = vst [vmem:[#allocation2 + $0xc0] sm:$0xf] %v1546_v8 }
  0x56   :  { %329 = vst [vmem:[#allocation2 + $0x1f8] sm:$0xf] %v1507_v9  ;;  %v1508_v11 = vld [vmem:[%s2184_s0 + $0xf8] sm:$0xf]  ;;  %v1509_v12 = vld [vmem:[%s2184_s0 + $0xf4] sm:$0xf] }
  0x57   :  { %334 = vst [vmem:[#allocation2 + $0x1f0] sm:$0xf] %v1508_v11  ;;  %v1510_v13 = vld [vmem:[%s2184_s0 + $0xf0] sm:$0xf]  ;;  %v1511_v14 = vld [vmem:[%s2184_s0 + $0xec] sm:$0xf] }
  0x58   :  { %v903_v15 = vld [vmem:[#allocation2 + $0x383] ss:$8 sm:$0xf]   ;;  %339 = vst [vmem:[#allocation2 + $0x1e8] sm:$0xf] %v1509_v12 }
  0x59   :  { %344 = vst [vmem:[#allocation2 + $0x1e0] sm:$0xf] %v1510_v13  ;;  %349 = vst [vmem:[#allocation2 + $0x1d8] sm:$0xf] %v1511_v14  ;;  %v1512_v16 = vld [vmem:[%s2184_s0 + $0xe8] sm:$0xf]  ;;  %v907_v17 = vsel %vm643_vm0, %v905_v10, %v903_v15 }
  0x5a   :  { %354 = vst [vmem:[#allocation2 + $0x1d0] sm:$0xf] %v1512_v16  ;;  %v1513_v18 = vld [vmem:[%s2184_s0 + $0xe4] sm:$0xf]  ;;  %v1514_v19 = vld [vmem:[%s2184_s0 + $0xe0] sm:$0xf]  ;;  %908 = vrot.lane.b32.xlu1 %v907_v17, %s1598_s10 }
  0x5b   :  { %v1475_v20 = vld [vmem:[%s2184_s0 + $0x17c] sm:$0xf]  ;;  %359 = vst [vmem:[#allocation2 + $0x1c8] sm:$0xf] %v1513_v18  ;;  %364 = vst [vmem:[#allocation2 + $0x1c0] sm:$0xf] %v1514_v19 }
  0x5c   :  { %169 = vst [vmem:[#allocation2 + $0x2f8] sm:$0xf] %v1475_v20  ;;  %v1476_v21 = vld [vmem:[%s2184_s0 + $0x178] sm:$0xf]  ;;  %v1477_v22 = vld [vmem:[%s2184_s0 + $0x174] sm:$0xf] }
  0x5d   :  { %v1478_v23 = vld [vmem:[%s2184_s0 + $0x170] sm:$0xf]  ;;  %174 = vst [vmem:[#allocation2 + $0x2f0] sm:$0xf] %v1476_v21  ;;  %179 = vst [vmem:[#allocation2 + $0x2e8] sm:$0xf] %v1477_v22 }
  0x5e   :  { %v916_v24 = vld [vmem:[#allocation2 + $0xc3] ss:$8 sm:$0xf0]   ;;  %184 = vst [vmem:[#allocation2 + $0x2e0] sm:$0xf] %v1478_v23 }
  0x5f   :  { %v1479_v25 = vld [vmem:[%s2184_s0 + $0x16c] sm:$0xf]  ;;  %v1480_v26 = vld [vmem:[%s2184_s0 + $0x168] sm:$0xf]  ;;  %v1481_v27 = vld [vmem:[%s2184_s0 + $0x164] sm:$0xf] }
  0x60   :  { %189 = vst [vmem:[#allocation2 + $0x2d8] sm:$0xf] %v1479_v25  ;;  %v1482_v28 = vld [vmem:[%s2184_s0 + $0x160] sm:$0xf]  ;;  %194 = vst [vmem:[#allocation2 + $0x2d0] sm:$0xf] %v1480_v26 }
  0x61   :  { %v914_v29 = vld [vmem:[#allocation2 + $0xc3] ss:$8 sm:$0xf]   ;;  %199 = vst [vmem:[#allocation2 + $0x2c8] sm:$0xf] %v1481_v27 }
  0x62   :  { %204 = vst [vmem:[#allocation2 + $0x2c0] sm:$0xf] %v1482_v28  ;;  %v1443_v30 = vld [vmem:[%s2184_s0 + $0x1fc] sm:$0xf]  ;;  %v918_v31 = vsel %vm643_vm0, %v916_v24, %v914_v29  ;;  %v1444_v32 = vld [vmem:[%s2184_s0 + $0x1f8] sm:$0xf] }
  0x63   :  { %9 = vst [vmem:[#allocation2 + $0x3f8] sm:$0xf] %v1443_v30  ;;  %v1445_v33 = vld [vmem:[%s2184_s0 + $0x1f4] sm:$0xf]  ;;  %v1446_v34 = vld [vmem:[%s2184_s0 + $0x1f0] sm:$0xf]  ;;  %919 = vrot.lane.b32.xlu0 %v918_v31, %s1598_s10 }
  0x64   :  { %v927_v35 = vld [vmem:[#allocation2 + $0x1c3] ss:$8 sm:$0xf0]   ;;  %14 = vst [vmem:[#allocation2 + $0x3f0] sm:$0xf] %v1444_v32 }
  0x65   :  { %19 = vst [vmem:[#allocation2 + $0x3e8] sm:$0xf] %v1445_v33  ;;  %24 = vst [vmem:[#allocation2 + $0x3e0] sm:$0xf] %v1446_v34  ;;  %v1447_v36 = vld [vmem:[%s2184_s0 + $0x1ec] sm:$0xf] }
  0x66   :  { %29 = vst [vmem:[#allocation2 + $0x3d8] sm:$0xf] %v1447_v36  ;;  %v1448_v37 = vld [vmem:[%s2184_s0 + $0x1e8] sm:$0xf]  ;;  %v1449_v38 = vld [vmem:[%s2184_s0 + $0x1e4] sm:$0xf] }
  0x67   :  { %v1450_v39 = vld [vmem:[%s2184_s0 + $0x1e0] sm:$0xf]  ;;  %34 = vst [vmem:[#allocation2 + $0x3d0] sm:$0xf] %v1448_v37  ;;  %39 = vst [vmem:[#allocation2 + $0x3c8] sm:$0xf] %v1449_v38 }
  0x68   :  { %v925_v40 = vld [vmem:[#allocation2 + $0x1c3] ss:$8 sm:$0xf]   ;;  %44 = vst [vmem:[#allocation2 + $0x3c0] sm:$0xf] %v1450_v39  ;;  %s1599_s0 = smov 8  }
  0x69   :  { %v929_v41 = vsel %vm643_vm0, %v927_v35, %v925_v40  ;;  %v938_v42 = vld [vmem:[#allocation2 + $0x2c3] ss:$8 sm:$0xf0]   ;;  %v958_v43 = vld [vmem:[#allocation2 + $0x2] ss:$8 sm:$0xf]  }
  0x6a   :  { %930 = vrot.lane.b32.xlu1 %v929_v41, %s1598_s10  ;;  %v936_v44 = vld [vmem:[#allocation2 + $0x2c3] ss:$8 sm:$0xf]   ;;  %v960_v45 = vld [vmem:[#allocation2 + $0x2] ss:$8 sm:$0xf0]  }
  0x6b   :  { %v940_v46 = vsel %vm643_vm0, %v938_v42, %v936_v44  ;;  %v968_v48 = vld [vmem:[#allocation2 + $0x102] ss:$8 sm:$0xf]   ;;  %v962_v49 = vsel %vm643_vm0, %v960_v45, %v958_v43  ;;  %v1133_v29 = vld [vmem:[#allocation2 + $0x1] ss:$8 sm:$0xf]  }
  0x6c   :  { %941 = vrot.lane.b32.xlu0 %v940_v46, %s1598_s10  ;;  %v949_v47 = vld [vmem:[#allocation2 + $0x3c3] ss:$8 sm:$0xf0]   ;;  %v970_v50 = vld [vmem:[#allocation2 + $0x102] ss:$8 sm:$0xf0]  }
  0x6d   :  { %v979_v51 = vld [vmem:[#allocation2 + $0x202] ss:$8 sm:$0xf]   ;;  %v972_v55 = vsel %vm643_vm0, %v970_v50, %v968_v48  ;;  %v1135_v32 = vld [vmem:[#allocation2 + $0x1] ss:$8 sm:$0xf0]  }
  0x6e   :  { %v981_v53 = vld [vmem:[#allocation2 + $0x202] ss:$8 sm:$0xf0]   ;;  %v641_v33 = vld [vmem:[#allocation2] ss:$8 sm:$0xf]  }
  0x6f   :  { %v947_v52 = vld [vmem:[#allocation2 + $0x3c3] ss:$8 sm:$0xf]   ;;  %v983_v56 = vsel %vm643_vm0, %v981_v53, %v979_v51  ;;  %v990_v57 = vld [vmem:[#allocation2 + $0x302] ss:$8 sm:$0xf]  }
  0x70   :  { %v951_v54 = vsel %vm643_vm0, %v949_v47, %v947_v52  ;;  %963 = vrot.lane.b32.xlu0 %v962_v49, %s1599_s0  ;;  %v992_v58 = vld [vmem:[#allocation2 + $0x302] ss:$8 sm:$0xf0]   ;;  %v642_v34 = vld [vmem:[#allocation2] ss:$8 sm:$0xf0]   ;;  %v1137_v47 = vsel %vm643_vm0, %v1135_v32, %v1133_v29 }
  0x71   :  { %952 = vrot.lane.b32.xlu1 %v951_v54, %s1598_s10  ;;  %v1001_v59 = vld [vmem:[#allocation2 + $0x42] ss:$8 sm:$0xf]   ;;  %v994_v61 = vsel %vm643_vm0, %v992_v58, %v990_v57  ;;  %v711_v35 = vld [vmem:[#allocation2 + $0x200] ss:$8 sm:$0xf]   ;;  %v644_v36 = vsel %vm643_vm0, %v642_v34, %v641_v33 }
  0x72   :  { %v1003_v60 = vld [vmem:[#allocation2 + $0x42] ss:$8 sm:$0xf0]   ;;  %v713_v37 = vld [vmem:[#allocation2 + $0x200] ss:$8 sm:$0xf0]  }
  0x73   :  { %v1005_v62 = vsel %vm643_vm0, %v1003_v60, %v1001_v59  ;;  %v1012_v63 = vld [vmem:[#allocation2 + $0x142] ss:$8 sm:$0xf]   ;;  %v675_v38 = vld [vmem:[#allocation2 + $0x100] ss:$8 sm:$0xf]   ;;  %v715_v43 = vsel %vm643_vm0, %v713_v37, %v711_v35 }
  0x74   :  { %984 = vrot.lane.b32.xlu0 %v983_v56, %s1599_s0  ;;  %v1014_v0 = vld [vmem:[#allocation2 + $0x142] ss:$8 sm:$0xf0]   ;;  %v1143_v39 = vld [vmem:[#allocation2 + $0x101] ss:$8 sm:$0xf]  }
  0x75   :  { %973 = vrot.lane.b32.xlu1 %v972_v55, %s1599_s0  ;;  %v1023_v1 = vld [vmem:[#allocation2 + $0x242] ss:$8 sm:$0xf]   ;;  %v1016_v3 = vsel %vm643_vm0, %v1014_v0, %v1012_v63  ;;  %v1145_v40 = vld [vmem:[#allocation2 + $0x101] ss:$8 sm:$0xf0]  }
  0x76   :  { %v1025_v2 = vld [vmem:[#allocation2 + $0x242] ss:$8 sm:$0xf0]   ;;  %v1154_v41 = vld [vmem:[#allocation2 + $0x201] ss:$8 sm:$0xf]   ;;  %v1147_v0 = vsel %vm643_vm0, %v1145_v40, %v1143_v39 }
  0x77   :  { %v1027_v4 = vsel %vm643_vm0, %v1025_v2, %v1023_v1  ;;  %v1034_v5 = vld [vmem:[#allocation2 + $0x342] ss:$8 sm:$0xf]   ;;  %v1156_v42 = vld [vmem:[#allocation2 + $0x201] ss:$8 sm:$0xf0]  }
  0x78   :  { %1006 = vrot.lane.b32.xlu0 %v1005_v62, %s1599_s0  ;;  %v1036_v6 = vld [vmem:[#allocation2 + $0x342] ss:$8 sm:$0xf0]   ;;  %646 = vst.msk [vmem:[#allocation0] sm:$0xff] %vm645_vm1, %v644_v36   ;;  %718 = vst.msk [vmem:[#allocation0 + $0x40] sm:$0xff] %vm645_vm1, %v715_v43   ;;  %s1600_s10 = smov 4   ;;  %v1158_v1 = vsel %vm643_vm0, %v1156_v42, %v1154_v41 }
  0x79   :  { %995 = vrot.lane.b32.xlu1 %v994_v61, %s1599_s0  ;;  %v1045_v7 = vld [vmem:[#allocation2 + $0x82] ss:$8 sm:$0xf]   ;;  %v1038_v9 = vsel %vm643_vm0, %v1036_v6, %v1034_v5  ;;  %v677_v44 = vld [vmem:[#allocation2 + $0x100] ss:$8 sm:$0xf0]  }
  0x7a   :  { %v1047_v8 = vld [vmem:[#allocation2 + $0x82] ss:$8 sm:$0xf0]   ;;  %v747_v45 = vld [vmem:[#allocation2 + $0x300] ss:$8 sm:$0xf]   ;;  %v679_v48 = vsel %vm643_vm0, %v677_v44, %v675_v38 }
  0x7b   :  { %v1049_v10 = vsel %vm643_vm0, %v1047_v8, %v1045_v7  ;;  %v1056_v11 = vld [vmem:[#allocation2 + $0x182] ss:$8 sm:$0xf]   ;;  %v749_v49 = vld [vmem:[#allocation2 + $0x300] ss:$8 sm:$0xf0]  }
  0x7c   :  { %1028 = vrot.lane.b32.xlu0 %v1027_v4, %s1599_s0  ;;  %v1058_v12 = vld [vmem:[#allocation2 + $0x182] ss:$8 sm:$0xf0]   ;;  %v648_v50 = vld [vmem:[#allocation2 + $0x40] ss:$8 sm:$0xf]   ;;  %v751_v51 = vsel %vm643_vm0, %v749_v49, %v747_v45 }
  0x7d   :  { %1017 = vrot.lane.b32.xlu1 %v1016_v3, %s1599_s0  ;;  %v1067_v13 = vld [vmem:[#allocation2 + $0x282] ss:$8 sm:$0xf]   ;;  %v1060_v15 = vsel %vm643_vm0, %v1058_v12, %v1056_v11  ;;  %682 = vst.msk [vmem:[#allocation0 + $0x20] sm:$0xff] %vm645_vm1, %v679_v48   ;;  %754 = vst.msk [vmem:[#allocation0 + $0x60] sm:$0xff] %vm645_vm1, %v751_v51  }
  0x7e   :  { %v1069_v14 = vld [vmem:[#allocation2 + $0x282] ss:$8 sm:$0xf0]   ;;  %v650_v52 = vld [vmem:[#allocation2 + $0x40] ss:$8 sm:$0xf0]  }
  0x7f   :  { %v1071_v16 = vsel %vm643_vm0, %v1069_v14, %v1067_v13  ;;  %v1078_v17 = vld [vmem:[#allocation2 + $0x382] ss:$8 sm:$0xf]   ;;  %v684_v53 = vld [vmem:[#allocation2 + $0x140] ss:$8 sm:$0xf]   ;;  %v652_v54 = vsel %vm643_vm0, %v650_v52, %v648_v50 }
  0x80   :  { %1050 = vrot.lane.b32.xlu0 %v1049_v10, %s1599_s0  ;;  %v1080_v18 = vld [vmem:[#allocation2 + $0x382] ss:$8 sm:$0xf0]   ;;  %v686_v55 = vld [vmem:[#allocation2 + $0x140] ss:$8 sm:$0xf0]  }
  0x81   :  { %1039 = vrot.lane.b32.xlu1 %v1038_v9, %s1599_s0  ;;  %v1089_v19 = vld [vmem:[#allocation2 + $0xc2] ss:$8 sm:$0xf]   ;;  %v1082_v21 = vsel %vm643_vm0, %v1080_v18, %v1078_v17  ;;  %v720_v56 = vld [vmem:[#allocation2 + $0x240] ss:$8 sm:$0xf]   ;;  %v688_v61 = vsel %vm643_vm0, %v686_v55, %v684_v53 }
  0x82   :  { %v1091_v20 = vld [vmem:[#allocation2 + $0xc2] ss:$8 sm:$0xf0]   ;;  %v1165_v57 = vld [vmem:[#allocation2 + $0x301] ss:$8 sm:$0xf]  }
  0x83   :  { %v1093_v22 = vsel %vm643_vm0, %v1091_v20, %v1089_v19  ;;  %v1100_v23 = vld [vmem:[#allocation2 + $0x1c2] ss:$8 sm:$0xf]   ;;  %v1167_v58 = vld [vmem:[#allocation2 + $0x301] ss:$8 sm:$0xf0]  }
  0x84   :  { %1072 = vrot.lane.b32.xlu0 %v1071_v16, %s1599_s0  ;;  %v1102_v24 = vld [vmem:[#allocation2 + $0x1c2] ss:$8 sm:$0xf0]   ;;  %v1176_v59 = vld [vmem:[#allocation2 + $0x41] ss:$8 sm:$0xf]   ;;  %v1169_v18 = vsel %vm643_vm0, %v1167_v58, %v1165_v57 }
  0x85   :  { %1061 = vrot.lane.b32.xlu1 %v1060_v15, %s1599_s0  ;;  %v1111_v25 = vld [vmem:[#allocation2 + $0x2c2] ss:$8 sm:$0xf]   ;;  %v1104_v30 = vsel %vm643_vm0, %v1102_v24, %v1100_v23  ;;  %v1178_v60 = vld [vmem:[#allocation2 + $0x41] ss:$8 sm:$0xf0]  }
  0x86   :  { %v1113_v26 = vld [vmem:[#allocation2 + $0x2c2] ss:$8 sm:$0xf0]   ;;  %655 = vst.msk [vmem:[#allocation0 + $0x8] sm:$0xff] %vm645_vm1, %v652_v54   ;;  %691 = vst.msk [vmem:[#allocation0 + $0x28] sm:$0xff] %vm645_vm1, %v688_v61   ;;  %v1180_v19 = vsel %vm643_vm0, %v1178_v60, %v1176_v59 }
  0x87   :  { %v1122_v27 = vld [vmem:[#allocation2 + $0x3c2] ss:$8 sm:$0xf]   ;;  %v1115_v31 = vsel %vm643_vm0, %v1113_v26, %v1111_v25  ;;  %v722_v62 = vld [vmem:[#allocation2 + $0x240] ss:$8 sm:$0xf0]  }
  0x88   :  { %1094 = vrot.lane.b32.xlu0 %v1093_v22, %s1599_s0  ;;  %v1124_v28 = vld [vmem:[#allocation2 + $0x3c2] ss:$8 sm:$0xf0]   ;;  %v756_v63 = vld [vmem:[#allocation2 + $0x340] ss:$8 sm:$0xf]   ;;  %v724_v2 = vsel %vm643_vm0, %v722_v62, %v720_v56 }
  0x89   :  { %1083 = vrot.lane.b32.xlu1 %v1082_v21, %s1599_s0  ;;  %v1126_v46 = vsel %vm643_vm0, %v1124_v28, %v1122_v27  ;;  %v758_v3 = vld [vmem:[#allocation2 + $0x340] ss:$8 sm:$0xf0]   ;;  %727 = vst.msk [vmem:[#allocation0 + $0x48] sm:$0xff] %vm645_vm1, %v724_v2  }
  0x8a   :  { %v657_v4 = vld [vmem:[#allocation2 + $0x80] ss:$8 sm:$0xf]   ;;  %v760_v5 = vsel %vm643_vm0, %v758_v3, %v756_v63  ;;  %v1187_v11 = vld [vmem:[#allocation2 + $0x141] ss:$8 sm:$0xf]  }
  0x8b   :  { %v659_v6 = vld [vmem:[#allocation2 + $0x80] ss:$8 sm:$0xf0]   ;;  %763 = vst.msk [vmem:[#allocation0 + $0x68] sm:$0xff] %vm645_vm1, %v760_v5  }
  0x8c   :  { %1116 = vrot.lane.b32.xlu0 %v1115_v31, %s1599_s0  ;;  %v693_v7 = vld [vmem:[#allocation2 + $0x180] ss:$8 sm:$0xf]   ;;  %v661_v8 = vsel %vm643_vm0, %v659_v6, %v657_v4  ;;  %v1189_v12 = vld [vmem:[#allocation2 + $0x141] ss:$8 sm:$0xf0]  }
  0x8d   :  { %1105 = vrot.lane.b32.xlu1 %v1104_v30, %s1599_s0  ;;  %v695_v9 = vld [vmem:[#allocation2 + $0x180] ss:$8 sm:$0xf0]   ;;  %v1198_v13 = vld [vmem:[#allocation2 + $0x241] ss:$8 sm:$0xf]   ;;  %v1191_v34 = vsel %vm643_vm0, %v1189_v12, %v1187_v11 }
  0x8e   :  { %v729_v10 = vld [vmem:[#allocation2 + $0x280] ss:$8 sm:$0xf]   ;;  %v1200_v14 = vld [vmem:[#allocation2 + $0x241] ss:$8 sm:$0xf0]   ;;  %v697_v15 = vsel %vm643_vm0, %v695_v9, %v693_v7 }
  0x8f   :  { %664 = vst.msk [vmem:[#allocation0 + $0x10] sm:$0xff] %vm645_vm1, %v661_v8   ;;  %v731_v16 = vld [vmem:[#allocation2 + $0x280] ss:$8 sm:$0xf0]   ;;  %700 = vst.msk [vmem:[#allocation0 + $0x30] sm:$0xff] %vm645_vm1, %v697_v15   ;;  %v1202_v35 = vsel %vm643_vm0, %v1200_v14, %v1198_v13 }
  0x90   :  { %1138 = vrot.lane.b32.xlu0 %v1137_v47, %s1600_s10  ;;  %v765_v17 = vld [vmem:[#allocation2 + $0x380] ss:$8 sm:$0xf]   ;;  %v733_v20 = vsel %vm643_vm0, %v731_v16, %v729_v10  ;;  %v1209_v29 = vld [vmem:[#allocation2 + $0x341] ss:$8 sm:$0xf]  }
  0x91   :  { %1127 = vrot.lane.b32.xlu1 %v1126_v46, %s1599_s0  ;;  %v767_v21 = vld [vmem:[#allocation2 + $0x380] ss:$8 sm:$0xf0]   ;;  %736 = vst.msk [vmem:[#allocation0 + $0x50] sm:$0xff] %vm645_vm1, %v733_v20  }
  0x92   :  { %v666_v22 = vld [vmem:[#allocation2 + $0xc0] ss:$8 sm:$0xf]   ;;  %v769_v23 = vsel %vm643_vm0, %v767_v21, %v765_v17  ;;  %v1211_v30 = vld [vmem:[#allocation2 + $0x341] ss:$8 sm:$0xf0]  }
  0x93   :  { %v668_v24 = vld [vmem:[#allocation2 + $0xc0] ss:$8 sm:$0xf0]   ;;  %772 = vst.msk [vmem:[#allocation0 + $0x70] sm:$0xff] %vm645_vm1, %v769_v23  }
  0x94   :  { %1159 = vrot.lane.b32.xlu0 %v1158_v1, %s1600_s10  ;;  %v702_v25 = vld [vmem:[#allocation2 + $0x1c0] ss:$8 sm:$0xf]   ;;  %v670_v26 = vsel %vm643_vm0, %v668_v24, %v666_v22 }
  0x95   :  { %1148 = vrot.lane.b32.xlu1 %v1147_v0, %s1600_s10  ;;  %v704_v27 = vld [vmem:[#allocation2 + $0x1c0] ss:$8 sm:$0xf0]   ;;  %673 = vst.msk [vmem:[#allocation0 + $0x18] sm:$0xff] %vm645_vm1, %v670_v26  }
  0x96   :  { %v738_v28 = vld [vmem:[#allocation2 + $0x2c0] ss:$8 sm:$0xf]   ;;  %v706_v31 = vsel %vm643_vm0, %v704_v27, %v702_v25 }
  0x97   :  { %v740_v32 = vld [vmem:[#allocation2 + $0x2c0] ss:$8 sm:$0xf0]   ;;  %709 = vst.msk [vmem:[#allocation0 + $0x38] sm:$0xff] %vm645_vm1, %v706_v31  }
  0x98   :  { %1181 = vrot.lane.b32.xlu0 %v1180_v19, %s1600_s10  ;;  %v774_v33 = vld [vmem:[#allocation2 + $0x3c0] ss:$8 sm:$0xf]   ;;  %v742_v36 = vsel %vm643_vm0, %v740_v32, %v738_v28 }
  0x99   :  { %1170 = vrot.lane.b32.xlu1 %v1169_v18, %s1600_s10  ;;  %v776_v37 = vld [vmem:[#allocation2 + $0x3c0] ss:$8 sm:$0xf0]  }
  0x9a   :  { %2 = vsyncpa [#allocation1], 0  ;;  %v1220_v38 = vld [vmem:[#allocation2 + $0x81] ss:$8 sm:$0xf]   ;;  %745 = vst.msk [vmem:[#allocation0 + $0x58] sm:$0xff] %vm645_vm1, %v742_v36   ;;  %v778_v40 = vsel %vm643_vm0, %v776_v37, %v774_v33  ;;  %v1213_v41 = vsel %vm643_vm0, %v1211_v30, %v1209_v29  ;;  %v789_v59 = vpop.permute.xlu0 %788   ;;  %v810_v0 = vpop.permute.xlu1 %809  }
  0x9b   :  { %v1222_v39 = vld [vmem:[#allocation2 + $0x81] ss:$8 sm:$0xf0]   ;;  %781 = vst.msk [vmem:[#allocation0 + $0x78] sm:$0xff] %vm645_vm1, %v778_v40   ;;  %vm790_vm2 = vcmask 130144   ;;  %vm965_vm3 = vcmask 97344  }
  0x9c   :  { %1203 = vrot.lane.b32.xlu0 %v1202_v35, %s1600_s10  ;;  %v1224_v42 = vsel %vm643_vm0, %v1222_v39, %v1220_v38  ;;  %v1231_v43 = vld [vmem:[#allocation2 + $0x181] ss:$8 sm:$0xf]   ;;  %791 = vst.msk [vmem:[#allocation0] sm:$0xff] %vm790_vm2, %v789_v59   ;;  %813 = vst.msk [vmem:[#allocation0 + $0x40] sm:$0xff] %vm790_vm2, %v810_v0   ;;  %vm1140_vm4 = vcmask 64544  }
  0x9d   :  { %1192 = vrot.lane.b32.xlu1 %v1191_v34, %s1600_s10  ;;  %v1233_v44 = vld [vmem:[#allocation2 + $0x181] ss:$8 sm:$0xf0]   ;;  %s1601_s8 = smov [#allocation0]  }
  0x9e   :  { %v1242_v45 = vld [vmem:[#allocation2 + $0x281] ss:$8 sm:$0xf]   ;;  %v1235_v47 = vsel %vm643_vm0, %v1233_v44, %v1231_v43  ;;  %v799_v2 = vpop.permute.xlu0 %798   ;;  %v821_v3 = vpop.permute.xlu1 %820   ;;  %s1311_s9 = sshll.u32 %s1601_s8, 4  ;;  %s1312_s9 = int_to_ptr.vmem [resolvable:$true] %s1311_s9 }
  0x9f   :  { %v1244_v46 = vld [vmem:[#allocation2 + $0x281] ss:$8 sm:$0xf0]   ;;  %802 = vst.msk [vmem:[#allocation0 + $0x20] sm:$0xff] %vm790_vm2, %v799_v2   ;;  %824 = vst.msk [vmem:[#allocation0 + $0x60] sm:$0xff] %vm790_vm2, %v821_v3   ;;  %s1574_s11 = scalar_lea.vmem %s1312_s9, 2048  ;;  %p1579_p1 = scmp.lt.s32.totalorder %s1312_s9, %s1312_s9 }
  0xa0   :  { %1225 = vrot.lane.b32.xlu0 %v1224_v42, %s1600_s10  ;;  %v1246_v48 = vsel %vm643_vm0, %v1244_v46, %v1242_v45  ;;  %v1253_v49 = vld [vmem:[#allocation2 + $0x381] ss:$8 sm:$0xf]   ;;  %p1575_p0 = scmp.ne.s32.totalorder %s1312_s9, %s1574_s11  ;;  %p1580_p2 = scmp.lt.s32.totalorder %s1574_s11, %s1574_s11 }
  0xa1   :  { %1214 = vrot.lane.b32.xlu1 %v1213_v41, %s1600_s10  ;;  %v1255_v50 = vld [vmem:[#allocation2 + $0x381] ss:$8 sm:$0xf0]  }
  0xa2   :  { %v1264_v51 = vld [vmem:[#allocation2 + $0xc1] ss:$8 sm:$0xf]   ;;  %v1257_v53 = vsel %vm643_vm0, %v1255_v50, %v1253_v49  ;;  %v832_v4 = vpop.permute.xlu0 %831   ;;  %p1581_p3 = por %p1580_p2, %p1579_p1 }
  0xa3   :  { %v1266_v52 = vld [vmem:[#allocation2 + $0xc1] ss:$8 sm:$0xf0]   ;;  %835 = vst.msk [vmem:[#allocation0 + $0x8] sm:$0xff] %vm790_vm2, %v832_v4  }
  0xa4   :  { %1247 = vrot.lane.b32.xlu0 %v1246_v48, %s1600_s10  ;;  %v1268_v54 = vsel %vm643_vm0, %v1266_v52, %v1264_v51  ;;  %v1275_v55 = vld [vmem:[#allocation2 + $0x1c1] ss:$8 sm:$0xf]   ;;  %p1582_p4 = pnand %p1581_p3, %p1575_p0 }
  0xa5   :  { %1236 = vrot.lane.b32.xlu1 %v1235_v47, %s1600_s10  ;;  %v1277_v56 = vld [vmem:[#allocation2 + $0x1c1] ss:$8 sm:$0xf0]  }
  0xa6   :  { %v1286_v57 = vld [vmem:[#allocation2 + $0x2c1] ss:$8 sm:$0xf]   ;;  %v1279_v60 = vsel %vm643_vm0, %v1277_v56, %v1275_v55  ;;  %v843_v5 = vpop.permute.xlu1 %842  }
  0xa7   :  { %v1288_v58 = vld [vmem:[#allocation2 + $0x2c1] ss:$8 sm:$0xf0]   ;;  %846 = vst.msk [vmem:[#allocation0 + $0x28] sm:$0xff] %vm790_vm2, %v843_v5  }
  0xa8   :  { %1269 = vrot.lane.b32.xlu0 %v1268_v54, %s1600_s10  ;;  %v1290_v61 = vsel %vm643_vm0, %v1288_v58, %v1286_v57  ;;  %v1297_v62 = vld [vmem:[#allocation2 + $0x3c1] ss:$8 sm:$0xf]  }
  0xa9   :  { %1258 = vrot.lane.b32.xlu1 %v1257_v53, %s1600_s10  ;;  %v1299_v63 = vld [vmem:[#allocation2 + $0x3c1] ss:$8 sm:$0xf0]  }
  0xaa   :  { %v1301_v1 = vsel %vm643_vm0, %v1299_v63, %v1297_v62 }
  0xab   :  { %v854_v6 = vpop.permute.xlu0 %853  }
  0xac   :  { %1291 = vrot.lane.b32.xlu0 %v1290_v61, %s1600_s10  ;;  %857 = vst.msk [vmem:[#allocation0 + $0x48] sm:$0xff] %vm790_vm2, %v854_v6  }
  0xad   :  { %1280 = vrot.lane.b32.xlu1 %v1279_v60, %s1600_s10 }
  0xb1   :  { %1302 = vrot.lane.b32.xlu1 %v1301_v1, %s1600_s10  ;;  %v865_v7 = vpop.permute.xlu1 %864  }
  0xb2   :  { %868 = vst.msk [vmem:[#allocation0 + $0x68] sm:$0xff] %vm790_vm2, %v865_v7  }
  0xba   :  { %v876_v8 = vpop.permute.xlu0 %875  }
  0xbb   :  { %879 = vst.msk [vmem:[#allocation0 + $0x10] sm:$0xff] %vm790_vm2, %v876_v8  }
  0xc1   :  { %v887_v9 = vpop.permute.xlu1 %886  }
  0xc2   :  { %890 = vst.msk [vmem:[#allocation0 + $0x30] sm:$0xff] %vm790_vm2, %v887_v9  }
  0xc5   :  { %v898_v10 = vpop.permute.xlu0 %897  }
  0xc6   :  { %901 = vst.msk [vmem:[#allocation0 + $0x50] sm:$0xff] %vm790_vm2, %v898_v10  }
  0xcc   :  { %v909_v11 = vpop.permute.xlu1 %908  }
  0xcd   :  { %912 = vst.msk [vmem:[#allocation0 + $0x70] sm:$0xff] %vm790_vm2, %v909_v11  }
  0xd5   :  { %v920_v12 = vpop.permute.xlu0 %919  }
  0xd6   :  { %923 = vst.msk [vmem:[#allocation0 + $0x18] sm:$0xff] %vm790_vm2, %v920_v12  }
  0xdc   :  { %v931_v13 = vpop.permute.xlu1 %930  }
  0xdd   :  { %934 = vst.msk [vmem:[#allocation0 + $0x38] sm:$0xff] %vm790_vm2, %v931_v13  }
  0xde   :  { %v942_v14 = vpop.permute.xlu0 %941  }
  0xdf   :  { %945 = vst.msk [vmem:[#allocation0 + $0x58] sm:$0xff] %vm790_vm2, %v942_v14  }
  0xe2   :  { %v964_v16 = vpop.permute.xlu0 %963  }
  0xe3   :  { %v953_v15 = vpop.permute.xlu1 %952   ;;  %966 = vst.msk [vmem:[#allocation0] sm:$0xff] %vm965_vm3, %v964_v16  }
  0xe4   :  { %956 = vst.msk [vmem:[#allocation0 + $0x78] sm:$0xff] %vm790_vm2, %v953_v15  }
  0xe6   :  { %v985_v18 = vpop.permute.xlu0 %984  }
  0xe7   :  { %v974_v17 = vpop.permute.xlu1 %973   ;;  %988 = vst.msk [vmem:[#allocation0 + $0x40] sm:$0xff] %vm965_vm3, %v985_v18  }
  0xe8   :  { %977 = vst.msk [vmem:[#allocation0 + $0x20] sm:$0xff] %vm965_vm3, %v974_v17  }
  0xea   :  { %v1007_v20 = vpop.permute.xlu0 %1006  }
  0xeb   :  { %v996_v19 = vpop.permute.xlu1 %995   ;;  %1010 = vst.msk [vmem:[#allocation0 + $0x8] sm:$0xff] %vm965_vm3, %v1007_v20  }
  0xec   :  { %999 = vst.msk [vmem:[#allocation0 + $0x60] sm:$0xff] %vm965_vm3, %v996_v19  }
  0xee   :  { %v1029_v22 = vpop.permute.xlu0 %1028  }
  0xef   :  { %v1018_v21 = vpop.permute.xlu1 %1017   ;;  %1032 = vst.msk [vmem:[#allocation0 + $0x48] sm:$0xff] %vm965_vm3, %v1029_v22  }
  0xf0   :  { %1021 = vst.msk [vmem:[#allocation0 + $0x28] sm:$0xff] %vm965_vm3, %v1018_v21  }
  0xf2   :  { %v1051_v24 = vpop.permute.xlu0 %1050  }
  0xf3   :  { %v1040_v23 = vpop.permute.xlu1 %1039   ;;  %1054 = vst.msk [vmem:[#allocation0 + $0x10] sm:$0xff] %vm965_vm3, %v1051_v24  }
  0xf4   :  { %1043 = vst.msk [vmem:[#allocation0 + $0x68] sm:$0xff] %vm965_vm3, %v1040_v23  }
  0xf6   :  { %v1073_v26 = vpop.permute.xlu0 %1072  }
  0xf7   :  { %v1062_v25 = vpop.permute.xlu1 %1061   ;;  %1076 = vst.msk [vmem:[#allocation0 + $0x50] sm:$0xff] %vm965_vm3, %v1073_v26  }
  0xf8   :  { %1065 = vst.msk [vmem:[#allocation0 + $0x30] sm:$0xff] %vm965_vm3, %v1062_v25  }
  0xfa   :  { %v1095_v28 = vpop.permute.xlu0 %1094  }
  0xfb   :  { %v1084_v27 = vpop.permute.xlu1 %1083   ;;  %1098 = vst.msk [vmem:[#allocation0 + $0x18] sm:$0xff] %vm965_vm3, %v1095_v28  }
  0xfc   :  { %1087 = vst.msk [vmem:[#allocation0 + $0x70] sm:$0xff] %vm965_vm3, %v1084_v27  }
  0xfe   :  { %v1117_v30 = vpop.permute.xlu0 %1116  }
  0xff   :  { %v1106_v29 = vpop.permute.xlu1 %1105   ;;  %1120 = vst.msk [vmem:[#allocation0 + $0x58] sm:$0xff] %vm965_vm3, %v1117_v30  }
 0x100   :  { %1109 = vst.msk [vmem:[#allocation0 + $0x38] sm:$0xff] %vm965_vm3, %v1106_v29  }
 0x102   :  { %v1139_v32 = vpop.permute.xlu0 %1138  }
 0x103   :  { %v1128_v31 = vpop.permute.xlu1 %1127   ;;  %1141 = vst.msk [vmem:[#allocation0] sm:$0xff] %vm1140_vm4, %v1139_v32  }
 0x104   :  { %1131 = vst.msk [vmem:[#allocation0 + $0x78] sm:$0xff] %vm965_vm3, %v1128_v31  }
 0x106   :  { %v1160_v34 = vpop.permute.xlu0 %1159  }
 0x107   :  { %v1149_v33 = vpop.permute.xlu1 %1148   ;;  %1163 = vst.msk [vmem:[#allocation0 + $0x40] sm:$0xff] %vm1140_vm4, %v1160_v34  }
 0x108   :  { %1152 = vst.msk [vmem:[#allocation0 + $0x20] sm:$0xff] %vm1140_vm4, %v1149_v33  }
 0x10a   :  { %v1182_v36 = vpop.permute.xlu0 %1181  }
 0x10b   :  { %v1171_v35 = vpop.permute.xlu1 %1170   ;;  %1185 = vst.msk [vmem:[#allocation0 + $0x8] sm:$0xff] %vm1140_vm4, %v1182_v36  }
 0x10c   :  { %1174 = vst.msk [vmem:[#allocation0 + $0x60] sm:$0xff] %vm1140_vm4, %v1171_v35  }
 0x10e   :  { %v1204_v38 = vpop.permute.xlu0 %1203  }
 0x10f   :  { %v1193_v37 = vpop.permute.xlu1 %1192   ;;  %1207 = vst.msk [vmem:[#allocation0 + $0x48] sm:$0xff] %vm1140_vm4, %v1204_v38  }
 0x110   :  { %1196 = vst.msk [vmem:[#allocation0 + $0x28] sm:$0xff] %vm1140_vm4, %v1193_v37  }
 0x112   :  { %v1226_v40 = vpop.permute.xlu0 %1225  }
 0x113   :  { %v1215_v39 = vpop.permute.xlu1 %1214   ;;  %1229 = vst.msk [vmem:[#allocation0 + $0x10] sm:$0xff] %vm1140_vm4, %v1226_v40  }
 0x114   :  { %1218 = vst.msk [vmem:[#allocation0 + $0x68] sm:$0xff] %vm1140_vm4, %v1215_v39  }
 0x116   :  { %v1248_v42 = vpop.permute.xlu0 %1247  }
 0x117   :  { %v1237_v41 = vpop.permute.xlu1 %1236   ;;  %1251 = vst.msk [vmem:[#allocation0 + $0x50] sm:$0xff] %vm1140_vm4, %v1248_v42  }
 0x118   :  { %1240 = vst.msk [vmem:[#allocation0 + $0x30] sm:$0xff] %vm1140_vm4, %v1237_v41  }
 0x11a   :  { %v1270_v44 = vpop.permute.xlu0 %1269  }
 0x11b   :  { %v1259_v43 = vpop.permute.xlu1 %1258   ;;  %1273 = vst.msk [vmem:[#allocation0 + $0x18] sm:$0xff] %vm1140_vm4, %v1270_v44  }
 0x11c   :  { %1262 = vst.msk [vmem:[#allocation0 + $0x70] sm:$0xff] %vm1140_vm4, %v1259_v43  }
 0x11e   :  { %v1292_v46 = vpop.permute.xlu0 %1291  }
 0x11f   :  { %v1281_v45 = vpop.permute.xlu1 %1280   ;;  %1295 = vst.msk [vmem:[#allocation0 + $0x58] sm:$0xff] %vm1140_vm4, %v1292_v46  }
 0x120   :  { %1284 = vst.msk [vmem:[#allocation0 + $0x38] sm:$0xff] %vm1140_vm4, %v1281_v45  }
 0x123   :  { %v1303_v47 = vpop.permute.xlu1 %1302  }
 0x124   :  { %1306 = vst.msk [vmem:[#allocation0 + $0x78] sm:$0xff] %vm1140_vm4, %v1303_v47  }
 0x125   :  { %1585 = shalt.err (!%p1582_p4)
}
 0x126   :  { %s1586_s14 = scalar_lea.hbm %s2185_s1, 2048 }
 0x127   :  { %p1587_p5 = scmp.ne.s32.totalorder %s2185_s1, %s1586_s14  ;;  %p1590_p6 = scmp.lt.u32.totalorder %s1586_s14, %s2185_s1 }
 0x129   :  { %p1592_p7 = pnand %p1590_p6, %p1587_p5 }
 0x12b   :  { %1595 = shalt.err (!%p1592_p7)
}
 0x12c   :  { %1314 = dma.vmem_to_hbm [thread:$0]  %s1312_s9, 2048, %s2185_s1, [#allocation1]  }
 0x12d   :  { %1596 = dma.done.wait [#allocation1], 2048  }
 0x12e   :  { %1597 = vsyncadd [#allocation1], 4294965248 }
 0x12f   :  { %1316 = vsyncpa [#allocation1], 1 }

</bundles_post_ra>
